<compile_context>
chip_gen: v7x
topology: tpu7x:2x2x1
jax: 0.10.0
libtpu: 0.0.40
codegen_flags: <defaults>
</compile_context>

<pallas_src>
import numpy as np

import jax
import jax.numpy as jnp
from jax import lax
from jax.experimental import pallas as pl
from jax.experimental.pallas import tpu as pltpu

_SLOPE = 0.2   # LeakyReLU negative slope
_EPS = 1e-5    # BatchNorm eps


def _leaky(x):
    return jnp.where(x >= 0, x, _SLOPE * x)


# ---------------------------------------------------------------------------
# Fused decoder kernel.
#
# Scratch layout (f32, one 9-row block per (batch, row-phase); rows 0 and 8 of
# every block stay zero and implement the vertical zero padding; horizontal
# zero padding is folded into the width matrices):
#   r1: (B*9,  7*C1)  layer-1 act.  row = b*9           + 1 + iy, lane = ix*C1 + c
#   r2: (B*18, 14*C2) layer-2 act.  row = b*18 + ry*9   + 1 + m,  lane = x*C2 + c
#                                   (image row = 2*m + ry)
#   r3: (B*36, 28*C3) layer-3 act.  row = b*36 + rho*9  + 1 + q,  lane = x*C3 + c
#                                   (image row = 4*q + rho)
# Output: (B, 4, 7, 28) with out[b, rho, t, x] = image[b, 4*t + rho, x].
# ---------------------------------------------------------------------------
def _decoder_kernel(z_ref, w1_ref, m2_ref, m3_ref, m4_ref,
                    b1_ref, b2_ref, b3_ref, b4_ref,
                    out_ref, r1, r2, r3):
    B = z_ref.shape[0]
    f32 = jnp.float32
    bf16 = jnp.bfloat16

    # Zero the scratch once (only the pad rows strictly need it).
    r1[...] = jnp.zeros(r1.shape, r1.dtype)
    r2[...] = jnp.zeros(r2.shape, r2.dtype)
    r3[...] = jnp.zeros(r3.shape, r3.dtype)

    z = z_ref[...].astype(bf16)                                    # (B, L)

    # ---- Layer 1: ConvTranspose(L, C1, 7) on a 1x1 input == per-row dense matmul.
    for iy in range(7):
        y = jnp.dot(z, w1_ref[iy], preferred_element_type=f32)     # (B, 7*C1)
        y = _leaky(y + b1_ref[...])
        for b in range(B):
            r1[pl.ds(b * 9 + 1 + iy, 1), :] = y[b:b + 1, :]

    # ---- Layer 2: ConvTranspose(C1, C2, 4, s=2, p=1); output rows split mod 2.
    a1 = r1[...].astype(bf16)                                      # (B*9, 7*C1)
    R2 = [[jnp.dot(a1, m2_ref[ry, ay], preferred_element_type=f32)
           for ay in range(2)] for ry in range(2)]                 # each (B*9, 14*C2)
    for b in range(B):
        for ry in range(2):
            base = b * 9 + ry
            acc = (R2[ry][0][base:base + 7, :]
                   + R2[ry][1][base + 1:base + 8, :]
                   + b2_ref[...])
            r2[pl.ds(b * 18 + ry * 9 + 1, 7), :] = _leaky(acc)

    # ---- Layer 3: ConvTranspose(C2, C3, 4, s=2, p=1); output rows split mod 4.
    a2 = r2[...].astype(bf16)                                      # (B*18, 14*C2)
    R3 = [[jnp.dot(a2, m3_ref[u, cy], preferred_element_type=f32)
           for cy in range(2)] for u in range(2)]                  # each (B*18, 28*C3)
    for b in range(B):
        for s in range(2):
            for u in range(2):
                rho = 2 * s + u
                acc = b3_ref[...]
                for cy in range(2):
                    e = s + u + cy - 1
                    plane = e % 2
                    rowoff = 1 + (e - plane) // 2
                    start = b * 18 + plane * 9 + rowoff
                    acc = acc + R3[u][cy][start:start + 7, :]
                r3[pl.ds(b * 36 + rho * 9 + 1, 7), :] = _leaky(acc)

    # ---- Layer 4: Conv2d(C3, 1, 3, p=1) + Tanh; output rows split mod 4.
    a3 = r3[...].astype(bf16)                                      # (B*36, 28*C3)
    R4 = [jnp.dot(a3, m4_ref[dy], preferred_element_type=f32)
          for dy in range(3)]                                      # each (B*36, 28)
    for b in range(B):
        for rho in range(4):
            acc = b4_ref[...]
            for dy in range(3):
                g = rho + dy - 1
                plane = g % 4
                rowoff = 1 + (g - plane) // 4
                start = b * 36 + plane * 9 + rowoff
                acc = acc + R4[dy][start:start + 7, :]
            out_ref[b, rho, :, :] = jnp.tanh(acc)


def decoder_forward(prep, z):
    """Forward pass: one pallas_call + a tiny XLA re-interleave of the output."""
    B = z.shape[0]
    n1 = prep["w1"].shape[2]     # 7  * C1
    n2 = prep["m2"].shape[3]     # 14 * C2
    n3 = prep["m3"].shape[3]     # 28 * C3

    out_ph = pl.pallas_call(
        _decoder_kernel,
        out_shape=jax.ShapeDtypeStruct((B, 4, 7, 28), jnp.float32),
        scratch_shapes=[
            pltpu.VMEM((B * 9, n1), jnp.float32),
            pltpu.VMEM((B * 18, n2), jnp.float32),
            pltpu.VMEM((B * 36, n3), jnp.float32),
        ],
        compiler_params=pltpu.CompilerParams(vmem_limit_bytes=16 * 1024 * 1024),
    )(z, prep["w1"], prep["m2"], prep["m3"], prep["m4"],
      prep["b1"], prep["b2"], prep["b3"], prep["b4"])

    # out_ph[b, rho, t, x] -> image row 4*t + rho  (6 KB, one cheap XLA op).
    img = jnp.transpose(out_ph, (0, 2, 1, 3)).reshape(B, 28, 28)
    return img[:, None, :, :]                                      # (B, 1, 28, 28)


# ---------------------------------------------------------------------------
# One-time parameter preparation (hoisted out of the forward path).
# ---------------------------------------------------------------------------
def prepare_decoder_params(params, model_size, latent_size):
    C1, C2, C3 = 4 * model_size, 2 * model_size, model_size

    def fold(bn):
        gamma, beta, mean, var = (np.asarray(a, np.float32) for a in bn)
        scale = gamma / np.sqrt(var + _EPS)
        shift = beta - mean * scale
        return scale, shift

    s1, t1 = fold(params["bn1"])
    s2, t2 = fold(params["bn2"])
    s3, t3 = fold(params["bn3"])

    w1 = np.asarray(params["ct1_w"], np.float32)   # (L, C1, 7, 7)
    b1 = np.asarray(params["ct1_b"], np.float32)
    w2 = np.asarray(params["ct2_w"], np.float32)   # (C1, C2, 4, 4)
    b2 = np.asarray(params["ct2_b"], np.float32)
    w3 = np.asarray(params["ct3_w"], np.float32)   # (C2, C3, 4, 4)
    b3 = np.asarray(params["ct3_b"], np.float32)
    wc = np.asarray(params["conv_w"], np.float32)  # (1, C3, 3, 3)
    bc = np.asarray(params["conv_b"], np.float32)  # (1,)

    # Layer 1: W1mat[iy, ci, ix*C1 + co] = W1[ci, co, iy, ix] * s1[co]
    w1s = w1 * s1[None, :, None, None]
    w1mat = np.transpose(w1s, (2, 0, 3, 1)).reshape(7, latent_size, 7 * C1)
    bias1 = np.tile(b1 * s1 + t1, 7)[None, :]

    # Layer 2 "width matrices": out[2my+ry, 2mx+rx, co] =
    #   sum_{ay,bx,ci} W2[ci,co,3-2ay-ry,3-2bx-rx] * x[my+ry+ay-1, mx+rx+bx-1, ci]
    w2s = w2 * s2[None, :, None, None]
    m2 = np.zeros((2, 2, 7 * C1, 14 * C2), np.float32)
    for ry in range(2):
        for ay in range(2):
            ky = 3 - 2 * ay - ry
            for mx in range(7):
                for rx in range(2):
                    for bx in range(2):
                        ix = mx + rx + bx - 1
                        if 0 <= ix < 7:
                            kx = 3 - 2 * bx - rx
                            m2[ry, ay,
                               ix * C1:(ix + 1) * C1,
                               (2 * mx + rx) * C2:(2 * mx + rx + 1) * C2] += w2s[:, :, ky, kx]
    bias2 = np.tile(b2 * s2 + t2, 14)[None, :]

    # Layer 3 width matrices (same construction, 14 -> 28).
    w3s = w3 * s3[None, :, None, None]
    m3 = np.zeros((2, 2, 14 * C2, 28 * C3), np.float32)
    for u in range(2):
        for cy in range(2):
            ky = 3 - 2 * cy - u
            for nx in range(14):
                for ux in range(2):
                    for cx in range(2):
                        xin = nx + ux + cx - 1
                        if 0 <= xin < 14:
                            kx = 3 - 2 * cx - ux
                            m3[u, cy,
                               xin * C2:(xin + 1) * C2,
                               (2 * nx + ux) * C3:(2 * nx + ux + 1) * C3] += w3s[:, :, ky, kx]
    bias3 = np.tile(b3 * s3 + t3, 28)[None, :]

    # Layer 4 width matrices: out[y, xo] = sum_{dy,dx,ci} Wc[0,ci,dy,dx]*x[y+dy-1, xo+dx-1, ci]
    m4 = np.zeros((3, 28 * C3, 28), np.float32)
    for dy in range(3):
        for xo in range(28):
            for dx in range(3):
                xin = xo + dx - 1
                if 0 <= xin < 28:
                    m4[dy, xin * C3:(xin + 1) * C3, xo] += wc[0, :, dy, dx]
    bias4 = np.tile(bc, 28)[None, :]

    return {
        "w1": jnp.asarray(w1mat, jnp.bfloat16),
        "m2": jnp.asarray(m2, jnp.bfloat16),
        "m3": jnp.asarray(m3, jnp.bfloat16),
        "m4": jnp.asarray(m4, jnp.bfloat16),
        "b1": jnp.asarray(bias1, jnp.float32),
        "b2": jnp.asarray(bias2, jnp.float32),
        "b3": jnp.asarray(bias3, jnp.float32),
        "b4": jnp.asarray(bias4, jnp.float32),
    }


# ---------------------------------------------------------------------------
# Deterministic parameter initialization (PyTorch layouts).
# ---------------------------------------------------------------------------
def _bn_init(key, c):
    k1, k2, k3, k4 = jax.random.split(key, 4)
    gamma = 1.0 + 0.1 * jax.random.normal(k1, (c,), jnp.float32)
    beta = 0.1 * jax.random.normal(k2, (c,), jnp.float32)
    mean = 0.1 * jax.random.normal(k3, (c,), jnp.float32)
    var = 1.0 + 0.5 * jax.random.uniform(k4, (c,), jnp.float32)
    return gamma, beta, mean, var


def init_params(key, model_size, latent_size):
    C1, C2, C3 = model_size * 4, model_size * 2, model_size
    ks = jax.random.split(key, 11)
    nrm = lambda k, s: 0.05 * jax.random.normal(k, s, jnp.float32)
    return {
        # ConvTranspose2d weights: (Cin, Cout, kH, kW)
        "ct1_w": nrm(ks[0], (latent_size, C1, 7, 7)), "ct1_b": nrm(ks[1], (C1,)),
        "bn1": _bn_init(ks[2], C1),
        "ct2_w": nrm(ks[3], (C1, C2, 4, 4)), "ct2_b": nrm(ks[4], (C2,)),
        "bn2": _bn_init(ks[5], C2),
        "ct3_w": nrm(ks[6], (C2, C3, 4, 4)), "ct3_b": nrm(ks[7], (C3,)),
        "bn3": _bn_init(ks[8], C3),
        # Conv2d weight: (Cout, Cin, kH, kW)
        "conv_w": nrm(ks[9], (1, C3, 3, 3)), "conv_b": nrm(ks[10], (1,)),
    }


# ---------------------------------------------------------------------------
# Pure-JAX (XLA) reference with the same bf16 rounding, for a numerical check.
# ---------------------------------------------------------------------------
def _bf(x):
    return x.astype(jnp.bfloat16).astype(jnp.float32)


def reference_forward(params, z, model_size, latent_size):
    def fold(bn):
        gamma, beta, mean, var = bn
        scale = gamma / jnp.sqrt(var + _EPS)
        return scale, beta - mean * scale

    s1, t1 = fold(params["bn1"])
    s2, t2 = fold(params["bn2"])
    s3, t3 = fold(params["bn3"])
    hp = lax.Precision.HIGHEST

    # Layer 1
    w1s = params["ct1_w"] * s1[None, :, None, None]
    h = jnp.einsum("bc,cdij->bdij", _bf(z), _bf(w1s), precision=hp)
    h = _leaky(h + (params["ct1_b"] * s1 + t1)[None, :, None, None])

    # Layer 2 (transposed conv == dilated conv with flipped / channel-swapped kernel)
    w2e = jnp.transpose(params["ct2_w"] * s2[None, :, None, None],
                        (1, 0, 2, 3))[:, :, ::-1, ::-1]
    h = lax.conv_general_dilated(_bf(h), _bf(w2e), window_strides=(1, 1),
                                 padding=((2, 2), (2, 2)), lhs_dilation=(2, 2),
                                 rhs_dilation=(1, 1),
                                 dimension_numbers=("NCHW", "OIHW", "NCHW"),
                                 precision=hp)
    h = _leaky(h + (params["ct2_b"] * s2 + t2)[None, :, None, None])

    # Layer 3
    w3e = jnp.transpose(params["ct3_w"] * s3[None, :, None, None],
                        (1, 0, 2, 3))[:, :, ::-1, ::-1]
    h = lax.conv_general_dilated(_bf(h), _bf(w3e), window_strides=(1, 1),
                                 padding=((2, 2), (2, 2)), lhs_dilation=(2, 2),
                                 rhs_dilation=(1, 1),
                                 dimension_numbers=("NCHW", "OIHW", "NCHW"),
                                 precision=hp)
    h = _leaky(h + (params["ct3_b"] * s3 + t3)[None, :, None, None])

    # Layer 4
    h = lax.conv_general_dilated(_bf(h), _bf(params["conv_w"]), window_strides=(1, 1),
                                 padding=((1, 1), (1, 1)),
                                 dimension_numbers=("NCHW", "OIHW", "NCHW"),
                                 precision=hp)
    h = h + params["conv_b"][None, :, None, None]
    return jnp.tanh(h)


if __name__ == "__main__":
    model_size = 8
    latent_size = 16
    batch = 2

    key = jax.random.PRNGKey(0)
    pkey, zkey = jax.random.split(key)
    params = init_params(pkey, model_size, latent_size)
    z = jax.random.normal(zkey, (batch, latent_size), jnp.float32)

    # One-time weight preprocessing (hoisted out of the forward path).
    prep = prepare_decoder_params(params, model_size, latent_size)

    fwd = jax.jit(decoder_forward)
    out = jax.block_until_ready(fwd(prep, z))

    assert out.shape == (batch, 1, 28, 28), out.shape
    assert bool(jnp.all(jnp.isfinite(out)))
    assert bool(jnp.all(jnp.abs(out) <= 1.0))  # tanh output range

    # Numerical check against an XLA reference using the same bf16 rounding.
    ref = reference_forward(params, z, model_size, latent_size)
    err = float(jnp.max(jnp.abs(out - ref)))
    assert err < 5e-3, f"max abs diff vs reference = {err}"

    print("KERNEL_OK")
</pallas_src>

<mosaic_0001>
module attributes {stable_mosaic.version = 11 : i64} {
  func.func @_decoder_kernel(%arg0: memref<2x16xf32, #tpu.memory_space<vmem>>, %arg1: memref<7x16x224xbf16, #tpu.memory_space<vmem>>, %arg2: memref<2x2x224x224xbf16, #tpu.memory_space<vmem>>, %arg3: memref<2x2x224x224xbf16, #tpu.memory_space<vmem>>, %arg4: memref<3x224x28xbf16, #tpu.memory_space<vmem>>, %arg5: memref<1x224xf32, #tpu.memory_space<vmem>>, %arg6: memref<1x224xf32, #tpu.memory_space<vmem>>, %arg7: memref<1x224xf32, #tpu.memory_space<vmem>>, %arg8: memref<1x28xf32, #tpu.memory_space<vmem>>, %arg9: memref<2x4x7x28xf32, #tpu.memory_space<vmem>>, %arg10: memref<18x224xf32, #tpu.memory_space<vmem>>, %arg11: memref<36x224xf32, #tpu.memory_space<vmem>>, %arg12: memref<72x224xf32, #tpu.memory_space<vmem>>) attributes {dimension_semantics = [], scalar_prefetch = 0 : i64, scratch_operands = 3 : i64, tpu.core_type = #tpu.core_type<tc>} {
    %cst = arith.constant 0.000000e+00 : f32
    %0 = vector.broadcast %cst : f32 to vector<18x224xf32>
    %c0 = arith.constant 0 : index
    %c0_0 = arith.constant 0 : index
    %1 = vector.load %arg10[%c0, %c0_0] : memref<18x224xf32, #tpu.memory_space<vmem>>, vector<18x224xf32>
    tpu.vector_store %arg10[%c0, %c0_0], %0 {strides = array<i32>} : memref<18x224xf32, #tpu.memory_space<vmem>>, vector<18x224xf32>,
    %cst_1 = arith.constant 0.000000e+00 : f32
    %2 = vector.broadcast %cst_1 : f32 to vector<36x224xf32>
    %c0_2 = arith.constant 0 : index
    %c0_3 = arith.constant 0 : index
    %3 = vector.load %arg11[%c0_2, %c0_3] : memref<36x224xf32, #tpu.memory_space<vmem>>, vector<36x224xf32>
    tpu.vector_store %arg11[%c0_2, %c0_3], %2 {strides = array<i32>} : memref<36x224xf32, #tpu.memory_space<vmem>>, vector<36x224xf32>,
    %cst_4 = arith.constant 0.000000e+00 : f32
    %4 = vector.broadcast %cst_4 : f32 to vector<72x224xf32>
    %c0_5 = arith.constant 0 : index
    %c0_6 = arith.constant 0 : index
    %5 = vector.load %arg12[%c0_5, %c0_6] : memref<72x224xf32, #tpu.memory_space<vmem>>, vector<72x224xf32>
    tpu.vector_store %arg12[%c0_5, %c0_6], %4 {strides = array<i32>} : memref<72x224xf32, #tpu.memory_space<vmem>>, vector<72x224xf32>,
    %c0_7 = arith.constant 0 : index
    %c0_8 = arith.constant 0 : index
    %6 = vector.load %arg0[%c0_7, %c0_8] : memref<2x16xf32, #tpu.memory_space<vmem>>, vector<2x16xf32>
    %7 = arith.truncf %6 : vector<2x16xf32> to vector<2x16xbf16>
    %c0_9 = arith.constant 0 : index
    %c0_10 = arith.constant 0 : index
    %c0_11 = arith.constant 0 : index
    %8 = vector.load %arg1[%c0_9, %c0_10, %c0_11] : memref<7x16x224xbf16, #tpu.memory_space<vmem>>, vector<1x16x224xbf16>
    %9 = vector.shape_cast %8 : vector<1x16x224xbf16> to vector<16x224xbf16>
    %cst_12 = arith.constant dense<0.000000e+00> : vector<2x224xf32>
    %10 = tpu.matmul %7, %9, %cst_12 {dimension_numbers = #tpu.dot_dimension_numbers<[1], [0], [0], [1], [0, 0, 1, 1], [], []>} : vector<2x16xbf16>, vector<16x224xbf16>, vector<2x224xf32> -> vector<2x224xf32>
    %c0_13 = arith.constant 0 : index
    %c0_14 = arith.constant 0 : index
    %11 = vector.load %arg5[%c0_13, %c0_14] : memref<1x224xf32, #tpu.memory_space<vmem>>, vector<1x224xf32>
    %12 = vector.broadcast %11 : vector<1x224xf32> to vector<2x224xf32>
    %13 = arith.addf %10, %12 : vector<2x224xf32>
    %cst_15 = arith.constant 0.000000e+00 : f32
    %14 = vector.broadcast %cst_15 : f32 to vector<2x224xf32>
    %15 = arith.cmpf oge, %13, %14 : vector<2x224xf32>
    %cst_16 = arith.constant 2.000000e-01 : f32
    %16 = vector.broadcast %cst_16 : f32 to vector<2x224xf32>
    %17 = arith.mulf %16, %13 : vector<2x224xf32>
    %18 = arith.select %15, %13, %17 : vector<2x224xi1>, vector<2x224xf32>
    %19 = vector.extract_strided_slice %18 {offsets = [0, 0], sizes = [1, 224], strides = [1, 1]} : vector<2x224xf32> to vector<1x224xf32>
    %c1 = arith.constant 1 : index
    %c0_17 = arith.constant 0 : index
    %20 = vector.load %arg10[%c1, %c0_17] : memref<18x224xf32, #tpu.memory_space<vmem>>, vector<1x224xf32>
    tpu.vector_store %arg10[%c1, %c0_17], %19 {strides = array<i32>} : memref<18x224xf32, #tpu.memory_space<vmem>>, vector<1x224xf32>,
    %21 = vector.extract_strided_slice %18 {offsets = [1, 0], sizes = [1, 224], strides = [1, 1]} : vector<2x224xf32> to vector<1x224xf32>
    %c10 = arith.constant 10 : index
    %c0_18 = arith.constant 0 : index
    %22 = vector.load %arg10[%c10, %c0_18] : memref<18x224xf32, #tpu.memory_space<vmem>>, vector<1x224xf32>
    tpu.vector_store %arg10[%c10, %c0_18], %21 {strides = array<i32>} : memref<18x224xf32, #tpu.memory_space<vmem>>, vector<1x224xf32>,
    %c1_19 = arith.constant 1 : index
    %c0_20 = arith.constant 0 : index
    %c0_21 = arith.constant 0 : index
    %23 = vector.load %arg1[%c1_19, %c0_20, %c0_21] : memref<7x16x224xbf16, #tpu.memory_space<vmem>>, vector<1x16x224xbf16>
    %24 = vector.shape_cast %23 : vector<1x16x224xbf16> to vector<16x224xbf16>
    %cst_22 = arith.constant dense<0.000000e+00> : vector<2x224xf32>
    %25 = tpu.matmul %7, %24, %cst_22 {dimension_numbers = #tpu.dot_dimension_numbers<[1], [0], [0], [1], [0, 0, 1, 1], [], []>} : vector<2x16xbf16>, vector<16x224xbf16>, vector<2x224xf32> -> vector<2x224xf32>
    %c0_23 = arith.constant 0 : index
    %c0_24 = arith.constant 0 : index
    %26 = vector.load %arg5[%c0_23, %c0_24] : memref<1x224xf32, #tpu.memory_space<vmem>>, vector<1x224xf32>
    %27 = vector.broadcast %26 : vector<1x224xf32> to vector<2x224xf32>
    %28 = arith.addf %25, %27 : vector<2x224xf32>
    %cst_25 = arith.constant 0.000000e+00 : f32
    %29 = vector.broadcast %cst_25 : f32 to vector<2x224xf32>
    %30 = arith.cmpf oge, %28, %29 : vector<2x224xf32>
    %cst_26 = arith.constant 2.000000e-01 : f32
    %31 = vector.broadcast %cst_26 : f32 to vector<2x224xf32>
    %32 = arith.mulf %31, %28 : vector<2x224xf32>
    %33 = arith.select %30, %28, %32 : vector<2x224xi1>, vector<2x224xf32>
    %34 = vector.extract_strided_slice %33 {offsets = [0, 0], sizes = [1, 224], strides = [1, 1]} : vector<2x224xf32> to vector<1x224xf32>
    %c2 = arith.constant 2 : index
    %c0_27 = arith.constant 0 : index
    %35 = vector.load %arg10[%c2, %c0_27] : memref<18x224xf32, #tpu.memory_space<vmem>>, vector<1x224xf32>
    tpu.vector_store %arg10[%c2, %c0_27], %34 {strides = array<i32>} : memref<18x224xf32, #tpu.memory_space<vmem>>, vector<1x224xf32>,
    %36 = vector.extract_strided_slice %33 {offsets = [1, 0], sizes = [1, 224], strides = [1, 1]} : vector<2x224xf32> to vector<1x224xf32>
    %c11 = arith.constant 11 : index
    %c0_28 = arith.constant 0 : index
    %37 = vector.load %arg10[%c11, %c0_28] : memref<18x224xf32, #tpu.memory_space<vmem>>, vector<1x224xf32>
    tpu.vector_store %arg10[%c11, %c0_28], %36 {strides = array<i32>} : memref<18x224xf32, #tpu.memory_space<vmem>>, vector<1x224xf32>,
    %c2_29 = arith.constant 2 : index
    %c0_30 = arith.constant 0 : index
    %c0_31 = arith.constant 0 : index
    %38 = vector.load %arg1[%c2_29, %c0_30, %c0_31] : memref<7x16x224xbf16, #tpu.memory_space<vmem>>, vector<1x16x224xbf16>
    %39 = vector.shape_cast %38 : vector<1x16x224xbf16> to vector<16x224xbf16>
    %cst_32 = arith.constant dense<0.000000e+00> : vector<2x224xf32>
    %40 = tpu.matmul %7, %39, %cst_32 {dimension_numbers = #tpu.dot_dimension_numbers<[1], [0], [0], [1], [0, 0, 1, 1], [], []>} : vector<2x16xbf16>, vector<16x224xbf16>, vector<2x224xf32> -> vector<2x224xf32>
    %c0_33 = arith.constant 0 : index
    %c0_34 = arith.constant 0 : index
    %41 = vector.load %arg5[%c0_33, %c0_34] : memref<1x224xf32, #tpu.memory_space<vmem>>, vector<1x224xf32>
    %42 = vector.broadcast %41 : vector<1x224xf32> to vector<2x224xf32>
    %43 = arith.addf %40, %42 : vector<2x224xf32>
    %cst_35 = arith.constant 0.000000e+00 : f32
    %44 = vector.broadcast %cst_35 : f32 to vector<2x224xf32>
    %45 = arith.cmpf oge, %43, %44 : vector<2x224xf32>
    %cst_36 = arith.constant 2.000000e-01 : f32
    %46 = vector.broadcast %cst_36 : f32 to vector<2x224xf32>
    %47 = arith.mulf %46, %43 : vector<2x224xf32>
    %48 = arith.select %45, %43, %47 : vector<2x224xi1>, vector<2x224xf32>
    %49 = vector.extract_strided_slice %48 {offsets = [0, 0], sizes = [1, 224], strides = [1, 1]} : vector<2x224xf32> to vector<1x224xf32>
    %c3 = arith.constant 3 : index
    %c0_37 = arith.constant 0 : index
    %50 = vector.load %arg10[%c3, %c0_37] : memref<18x224xf32, #tpu.memory_space<vmem>>, vector<1x224xf32>
    tpu.vector_store %arg10[%c3, %c0_37], %49 {strides = array<i32>} : memref<18x224xf32, #tpu.memory_space<vmem>>, vector<1x224xf32>,
    %51 = vector.extract_strided_slice %48 {offsets = [1, 0], sizes = [1, 224], strides = [1, 1]} : vector<2x224xf32> to vector<1x224xf32>
    %c12 = arith.constant 12 : index
    %c0_38 = arith.constant 0 : index
    %52 = vector.load %arg10[%c12, %c0_38] : memref<18x224xf32, #tpu.memory_space<vmem>>, vector<1x224xf32>
    tpu.vector_store %arg10[%c12, %c0_38], %51 {strides = array<i32>} : memref<18x224xf32, #tpu.memory_space<vmem>>, vector<1x224xf32>,
    %c3_39 = arith.constant 3 : index
    %c0_40 = arith.constant 0 : index
    %c0_41 = arith.constant 0 : index
    %53 = vector.load %arg1[%c3_39, %c0_40, %c0_41] : memref<7x16x224xbf16, #tpu.memory_space<vmem>>, vector<1x16x224xbf16>
    %54 = vector.shape_cast %53 : vector<1x16x224xbf16> to vector<16x224xbf16>
    %cst_42 = arith.constant dense<0.000000e+00> : vector<2x224xf32>
    %55 = tpu.matmul %7, %54, %cst_42 {dimension_numbers = #tpu.dot_dimension_numbers<[1], [0], [0], [1], [0, 0, 1, 1], [], []>} : vector<2x16xbf16>, vector<16x224xbf16>, vector<2x224xf32> -> vector<2x224xf32>
    %c0_43 = arith.constant 0 : index
    %c0_44 = arith.constant 0 : index
    %56 = vector.load %arg5[%c0_43, %c0_44] : memref<1x224xf32, #tpu.memory_space<vmem>>, vector<1x224xf32>
    %57 = vector.broadcast %56 : vector<1x224xf32> to vector<2x224xf32>
    %58 = arith.addf %55, %57 : vector<2x224xf32>
    %cst_45 = arith.constant 0.000000e+00 : f32
    %59 = vector.broadcast %cst_45 : f32 to vector<2x224xf32>
    %60 = arith.cmpf oge, %58, %59 : vector<2x224xf32>
    %cst_46 = arith.constant 2.000000e-01 : f32
    %61 = vector.broadcast %cst_46 : f32 to vector<2x224xf32>
    %62 = arith.mulf %61, %58 : vector<2x224xf32>
    %63 = arith.select %60, %58, %62 : vector<2x224xi1>, vector<2x224xf32>
    %64 = vector.extract_strided_slice %63 {offsets = [0, 0], sizes = [1, 224], strides = [1, 1]} : vector<2x224xf32> to vector<1x224xf32>
    %c4 = arith.constant 4 : index
    %c0_47 = arith.constant 0 : index
    %65 = vector.load %arg10[%c4, %c0_47] : memref<18x224xf32, #tpu.memory_space<vmem>>, vector<1x224xf32>
    tpu.vector_store %arg10[%c4, %c0_47], %64 {strides = array<i32>} : memref<18x224xf32, #tpu.memory_space<vmem>>, vector<1x224xf32>,
    %66 = vector.extract_strided_slice %63 {offsets = [1, 0], sizes = [1, 224], strides = [1, 1]} : vector<2x224xf32> to vector<1x224xf32>
    %c13 = arith.constant 13 : index
    %c0_48 = arith.constant 0 : index
    %67 = vector.load %arg10[%c13, %c0_48] : memref<18x224xf32, #tpu.memory_space<vmem>>, vector<1x224xf32>
    tpu.vector_store %arg10[%c13, %c0_48], %66 {strides = array<i32>} : memref<18x224xf32, #tpu.memory_space<vmem>>, vector<1x224xf32>,
    %c4_49 = arith.constant 4 : index
    %c0_50 = arith.constant 0 : index
    %c0_51 = arith.constant 0 : index
    %68 = vector.load %arg1[%c4_49, %c0_50, %c0_51] : memref<7x16x224xbf16, #tpu.memory_space<vmem>>, vector<1x16x224xbf16>
    %69 = vector.shape_cast %68 : vector<1x16x224xbf16> to vector<16x224xbf16>
    %cst_52 = arith.constant dense<0.000000e+00> : vector<2x224xf32>
    %70 = tpu.matmul %7, %69, %cst_52 {dimension_numbers = #tpu.dot_dimension_numbers<[1], [0], [0], [1], [0, 0, 1, 1], [], []>} : vector<2x16xbf16>, vector<16x224xbf16>, vector<2x224xf32> -> vector<2x224xf32>
    %c0_53 = arith.constant 0 : index
    %c0_54 = arith.constant 0 : index
    %71 = vector.load %arg5[%c0_53, %c0_54] : memref<1x224xf32, #tpu.memory_space<vmem>>, vector<1x224xf32>
    %72 = vector.broadcast %71 : vector<1x224xf32> to vector<2x224xf32>
    %73 = arith.addf %70, %72 : vector<2x224xf32>
    %cst_55 = arith.constant 0.000000e+00 : f32
    %74 = vector.broadcast %cst_55 : f32 to vector<2x224xf32>
    %75 = arith.cmpf oge, %73, %74 : vector<2x224xf32>
    %cst_56 = arith.constant 2.000000e-01 : f32
    %76 = vector.broadcast %cst_56 : f32 to vector<2x224xf32>
    %77 = arith.mulf %76, %73 : vector<2x224xf32>
    %78 = arith.select %75, %73, %77 : vector<2x224xi1>, vector<2x224xf32>
    %79 = vector.extract_strided_slice %78 {offsets = [0, 0], sizes = [1, 224], strides = [1, 1]} : vector<2x224xf32> to vector<1x224xf32>
    %c5 = arith.constant 5 : index
    %c0_57 = arith.constant 0 : index
    %80 = vector.load %arg10[%c5, %c0_57] : memref<18x224xf32, #tpu.memory_space<vmem>>, vector<1x224xf32>
    tpu.vector_store %arg10[%c5, %c0_57], %79 {strides = array<i32>} : memref<18x224xf32, #tpu.memory_space<vmem>>, vector<1x224xf32>,
    %81 = vector.extract_strided_slice %78 {offsets = [1, 0], sizes = [1, 224], strides = [1, 1]} : vector<2x224xf32> to vector<1x224xf32>
    %c14 = arith.constant 14 : index
    %c0_58 = arith.constant 0 : index
    %82 = vector.load %arg10[%c14, %c0_58] : memref<18x224xf32, #tpu.memory_space<vmem>>, vector<1x224xf32>
    tpu.vector_store %arg10[%c14, %c0_58], %81 {strides = array<i32>} : memref<18x224xf32, #tpu.memory_space<vmem>>, vector<1x224xf32>,
    %c5_59 = arith.constant 5 : index
    %c0_60 = arith.constant 0 : index
    %c0_61 = arith.constant 0 : index
    %83 = vector.load %arg1[%c5_59, %c0_60, %c0_61] : memref<7x16x224xbf16, #tpu.memory_space<vmem>>, vector<1x16x224xbf16>
    %84 = vector.shape_cast %83 : vector<1x16x224xbf16> to vector<16x224xbf16>
    %cst_62 = arith.constant dense<0.000000e+00> : vector<2x224xf32>
    %85 = tpu.matmul %7, %84, %cst_62 {dimension_numbers = #tpu.dot_dimension_numbers<[1], [0], [0], [1], [0, 0, 1, 1], [], []>} : vector<2x16xbf16>, vector<16x224xbf16>, vector<2x224xf32> -> vector<2x224xf32>
    %c0_63 = arith.constant 0 : index
    %c0_64 = arith.constant 0 : index
    %86 = vector.load %arg5[%c0_63, %c0_64] : memref<1x224xf32, #tpu.memory_space<vmem>>, vector<1x224xf32>
    %87 = vector.broadcast %86 : vector<1x224xf32> to vector<2x224xf32>
    %88 = arith.addf %85, %87 : vector<2x224xf32>
    %cst_65 = arith.constant 0.000000e+00 : f32
    %89 = vector.broadcast %cst_65 : f32 to vector<2x224xf32>
    %90 = arith.cmpf oge, %88, %89 : vector<2x224xf32>
    %cst_66 = arith.constant 2.000000e-01 : f32
    %91 = vector.broadcast %cst_66 : f32 to vector<2x224xf32>
    %92 = arith.mulf %91, %88 : vector<2x224xf32>
    %93 = arith.select %90, %88, %92 : vector<2x224xi1>, vector<2x224xf32>
    %94 = vector.extract_strided_slice %93 {offsets = [0, 0], sizes = [1, 224], strides = [1, 1]} : vector<2x224xf32> to vector<1x224xf32>
    %c6 = arith.constant 6 : index
    %c0_67 = arith.constant 0 : index
    %95 = vector.load %arg10[%c6, %c0_67] : memref<18x224xf32, #tpu.memory_space<vmem>>, vector<1x224xf32>
    tpu.vector_store %arg10[%c6, %c0_67], %94 {strides = array<i32>} : memref<18x224xf32, #tpu.memory_space<vmem>>, vector<1x224xf32>,
    %96 = vector.extract_strided_slice %93 {offsets = [1, 0], sizes = [1, 224], strides = [1, 1]} : vector<2x224xf32> to vector<1x224xf32>
    %c15 = arith.constant 15 : index
    %c0_68 = arith.constant 0 : index
    %97 = vector.load %arg10[%c15, %c0_68] : memref<18x224xf32, #tpu.memory_space<vmem>>, vector<1x224xf32>
    tpu.vector_store %arg10[%c15, %c0_68], %96 {strides = array<i32>} : memref<18x224xf32, #tpu.memory_space<vmem>>, vector<1x224xf32>,
    %c6_69 = arith.constant 6 : index
    %c0_70 = arith.constant 0 : index
    %c0_71 = arith.constant 0 : index
    %98 = vector.load %arg1[%c6_69, %c0_70, %c0_71] : memref<7x16x224xbf16, #tpu.memory_space<vmem>>, vector<1x16x224xbf16>
    %99 = vector.shape_cast %98 : vector<1x16x224xbf16> to vector<16x224xbf16>
    %cst_72 = arith.constant dense<0.000000e+00> : vector<2x224xf32>
    %100 = tpu.matmul %7, %99, %cst_72 {dimension_numbers = #tpu.dot_dimension_numbers<[1], [0], [0], [1], [0, 0, 1, 1], [], []>} : vector<2x16xbf16>, vector<16x224xbf16>, vector<2x224xf32> -> vector<2x224xf32>
    %c0_73 = arith.constant 0 : index
    %c0_74 = arith.constant 0 : index
    %101 = vector.load %arg5[%c0_73, %c0_74] : memref<1x224xf32, #tpu.memory_space<vmem>>, vector<1x224xf32>
    %102 = vector.broadcast %101 : vector<1x224xf32> to vector<2x224xf32>
    %103 = arith.addf %100, %102 : vector<2x224xf32>
    %cst_75 = arith.constant 0.000000e+00 : f32
    %104 = vector.broadcast %cst_75 : f32 to vector<2x224xf32>
    %105 = arith.cmpf oge, %103, %104 : vector<2x224xf32>
    %cst_76 = arith.constant 2.000000e-01 : f32
    %106 = vector.broadcast %cst_76 : f32 to vector<2x224xf32>
    %107 = arith.mulf %106, %103 : vector<2x224xf32>
    %108 = arith.select %105, %103, %107 : vector<2x224xi1>, vector<2x224xf32>
    %109 = vector.extract_strided_slice %108 {offsets = [0, 0], sizes = [1, 224], strides = [1, 1]} : vector<2x224xf32> to vector<1x224xf32>
    %c7 = arith.constant 7 : index
    %c0_77 = arith.constant 0 : index
    %110 = vector.load %arg10[%c7, %c0_77] : memref<18x224xf32, #tpu.memory_space<vmem>>, vector<1x224xf32>
    tpu.vector_store %arg10[%c7, %c0_77], %109 {strides = array<i32>} : memref<18x224xf32, #tpu.memory_space<vmem>>, vector<1x224xf32>,
    %111 = vector.extract_strided_slice %108 {offsets = [1, 0], sizes = [1, 224], strides = [1, 1]} : vector<2x224xf32> to vector<1x224xf32>
    %c16 = arith.constant 16 : index
    %c0_78 = arith.constant 0 : index
    %112 = vector.load %arg10[%c16, %c0_78] : memref<18x224xf32, #tpu.memory_space<vmem>>, vector<1x224xf32>
    tpu.vector_store %arg10[%c16, %c0_78], %111 {strides = array<i32>} : memref<18x224xf32, #tpu.memory_space<vmem>>, vector<1x224xf32>,
    %c0_79 = arith.constant 0 : index
    %c0_80 = arith.constant 0 : index
    %113 = vector.load %arg10[%c0_79, %c0_80] : memref<18x224xf32, #tpu.memory_space<vmem>>, vector<18x224xf32>
    %114 = arith.truncf %113 : vector<18x224xf32> to vector<18x224xbf16>
    %c0_81 = arith.constant 0 : index
    %c0_82 = arith.constant 0 : index
    %c0_83 = arith.constant 0 : index
    %c0_84 = arith.constant 0 : index
    %115 = vector.load %arg2[%c0_81, %c0_82, %c0_83, %c0_84] : memref<2x2x224x224xbf16, #tpu.memory_space<vmem>>, vector<1x1x224x224xbf16>
    %116 = vector.shape_cast %115 : vector<1x1x224x224xbf16> to vector<224x224xbf16>
    %cst_85 = arith.constant dense<0.000000e+00> : vector<18x224xf32>
    %117 = tpu.matmul %114, %116, %cst_85 {dimension_numbers = #tpu.dot_dimension_numbers<[1], [0], [0], [1], [0, 0, 1, 1], [], []>} : vector<18x224xbf16>, vector<224x224xbf16>, vector<18x224xf32> -> vector<18x224xf32>
    %c0_86 = arith.constant 0 : index
    %c1_87 = arith.constant 1 : index
    %c0_88 = arith.constant 0 : index
    %c0_89 = arith.constant 0 : index
    %118 = vector.load %arg2[%c0_86, %c1_87, %c0_88, %c0_89] : memref<2x2x224x224xbf16, #tpu.memory_space<vmem>>, vector<1x1x224x224xbf16>
    %119 = vector.shape_cast %118 : vector<1x1x224x224xbf16> to vector<224x224xbf16>
    %cst_90 = arith.constant dense<0.000000e+00> : vector<18x224xf32>
    %120 = tpu.matmul %114, %119, %cst_90 {dimension_numbers = #tpu.dot_dimension_numbers<[1], [0], [0], [1], [0, 0, 1, 1], [], []>} : vector<18x224xbf16>, vector<224x224xbf16>, vector<18x224xf32> -> vector<18x224xf32>
    %c1_91 = arith.constant 1 : index
    %c0_92 = arith.constant 0 : index
    %c0_93 = arith.constant 0 : index
    %c0_94 = arith.constant 0 : index
    %121 = vector.load %arg2[%c1_91, %c0_92, %c0_93, %c0_94] : memref<2x2x224x224xbf16, #tpu.memory_space<vmem>>, vector<1x1x224x224xbf16>
    %122 = vector.shape_cast %121 : vector<1x1x224x224xbf16> to vector<224x224xbf16>
    %cst_95 = arith.constant dense<0.000000e+00> : vector<18x224xf32>
    %123 = tpu.matmul %114, %122, %cst_95 {dimension_numbers = #tpu.dot_dimension_numbers<[1], [0], [0], [1], [0, 0, 1, 1], [], []>} : vector<18x224xbf16>, vector<224x224xbf16>, vector<18x224xf32> -> vector<18x224xf32>
    %c1_96 = arith.constant 1 : index
    %c1_97 = arith.constant 1 : index
    %c0_98 = arith.constant 0 : index
    %c0_99 = arith.constant 0 : index
    %124 = vector.load %arg2[%c1_96, %c1_97, %c0_98, %c0_99] : memref<2x2x224x224xbf16, #tpu.memory_space<vmem>>, vector<1x1x224x224xbf16>
    %125 = vector.shape_cast %124 : vector<1x1x224x224xbf16> to vector<224x224xbf16>
    %cst_100 = arith.constant dense<0.000000e+00> : vector<18x224xf32>
    %126 = tpu.matmul %114, %125, %cst_100 {dimension_numbers = #tpu.dot_dimension_numbers<[1], [0], [0], [1], [0, 0, 1, 1], [], []>} : vector<18x224xbf16>, vector<224x224xbf16>, vector<18x224xf32> -> vector<18x224xf32>
    %127 = vector.extract_strided_slice %117 {offsets = [0, 0], sizes = [7, 224], strides = [1, 1]} : vector<18x224xf32> to vector<7x224xf32>
    %128 = vector.extract_strided_slice %120 {offsets = [1, 0], sizes = [7, 224], strides = [1, 1]} : vector<18x224xf32> to vector<7x224xf32>
    %129 = arith.addf %127, %128 : vector<7x224xf32>
    %c0_101 = arith.constant 0 : index
    %c0_102 = arith.constant 0 : index
    %130 = vector.load %arg6[%c0_101, %c0_102] : memref<1x224xf32, #tpu.memory_space<vmem>>, vector<1x224xf32>
    %131 = vector.broadcast %130 : vector<1x224xf32> to vector<7x224xf32>
    %132 = arith.addf %129, %131 : vector<7x224xf32>
    %cst_103 = arith.constant 0.000000e+00 : f32
    %133 = vector.broadcast %cst_103 : f32 to vector<7x224xf32>
    %134 = arith.cmpf oge, %132, %133 : vector<7x224xf32>
    %cst_104 = arith.constant 2.000000e-01 : f32
    %135 = vector.broadcast %cst_104 : f32 to vector<7x224xf32>
    %136 = arith.mulf %135, %132 : vector<7x224xf32>
    %137 = arith.select %134, %132, %136 : vector<7x224xi1>, vector<7x224xf32>
    %c1_105 = arith.constant 1 : index
    %c0_106 = arith.constant 0 : index
    %138 = vector.load %arg11[%c1_105, %c0_106] : memref<36x224xf32, #tpu.memory_space<vmem>>, vector<7x224xf32>
    tpu.vector_store %arg11[%c1_105, %c0_106], %137 {strides = array<i32>} : memref<36x224xf32, #tpu.memory_space<vmem>>, vector<7x224xf32>,
    %139 = vector.extract_strided_slice %123 {offsets = [1, 0], sizes = [7, 224], strides = [1, 1]} : vector<18x224xf32> to vector<7x224xf32>
    %140 = vector.extract_strided_slice %126 {offsets = [2, 0], sizes = [7, 224], strides = [1, 1]} : vector<18x224xf32> to vector<7x224xf32>
    %141 = arith.addf %139, %140 : vector<7x224xf32>
    %c0_107 = arith.constant 0 : index
    %c0_108 = arith.constant 0 : index
    %142 = vector.load %arg6[%c0_107, %c0_108] : memref<1x224xf32, #tpu.memory_space<vmem>>, vector<1x224xf32>
    %143 = vector.broadcast %142 : vector<1x224xf32> to vector<7x224xf32>
    %144 = arith.addf %141, %143 : vector<7x224xf32>
    %cst_109 = arith.constant 0.000000e+00 : f32
    %145 = vector.broadcast %cst_109 : f32 to vector<7x224xf32>
    %146 = arith.cmpf oge, %144, %145 : vector<7x224xf32>
    %cst_110 = arith.constant 2.000000e-01 : f32
    %147 = vector.broadcast %cst_110 : f32 to vector<7x224xf32>
    %148 = arith.mulf %147, %144 : vector<7x224xf32>
    %149 = arith.select %146, %144, %148 : vector<7x224xi1>, vector<7x224xf32>
    %c10_111 = arith.constant 10 : index
    %c0_112 = arith.constant 0 : index
    %150 = vector.load %arg11[%c10_111, %c0_112] : memref<36x224xf32, #tpu.memory_space<vmem>>, vector<7x224xf32>
    tpu.vector_store %arg11[%c10_111, %c0_112], %149 {strides = array<i32>} : memref<36x224xf32, #tpu.memory_space<vmem>>, vector<7x224xf32>,
    %151 = vector.extract_strided_slice %117 {offsets = [9, 0], sizes = [7, 224], strides = [1, 1]} : vector<18x224xf32> to vector<7x224xf32>
    %152 = vector.extract_strided_slice %120 {offsets = [10, 0], sizes = [7, 224], strides = [1, 1]} : vector<18x224xf32> to vector<7x224xf32>
    %153 = arith.addf %151, %152 : vector<7x224xf32>
    %c0_113 = arith.constant 0 : index
    %c0_114 = arith.constant 0 : index
    %154 = vector.load %arg6[%c0_113, %c0_114] : memref<1x224xf32, #tpu.memory_space<vmem>>, vector<1x224xf32>
    %155 = vector.broadcast %154 : vector<1x224xf32> to vector<7x224xf32>
    %156 = arith.addf %153, %155 : vector<7x224xf32>
    %cst_115 = arith.constant 0.000000e+00 : f32
    %157 = vector.broadcast %cst_115 : f32 to vector<7x224xf32>
    %158 = arith.cmpf oge, %156, %157 : vector<7x224xf32>
    %cst_116 = arith.constant 2.000000e-01 : f32
    %159 = vector.broadcast %cst_116 : f32 to vector<7x224xf32>
    %160 = arith.mulf %159, %156 : vector<7x224xf32>
    %161 = arith.select %158, %156, %160 : vector<7x224xi1>, vector<7x224xf32>
    %c19 = arith.constant 19 : index
    %c0_117 = arith.constant 0 : index
    %162 = vector.load %arg11[%c19, %c0_117] : memref<36x224xf32, #tpu.memory_space<vmem>>, vector<7x224xf32>
    tpu.vector_store %arg11[%c19, %c0_117], %161 {strides = array<i32>} : memref<36x224xf32, #tpu.memory_space<vmem>>, vector<7x224xf32>,
    %163 = vector.extract_strided_slice %123 {offsets = [10, 0], sizes = [7, 224], strides = [1, 1]} : vector<18x224xf32> to vector<7x224xf32>
    %164 = vector.extract_strided_slice %126 {offsets = [11, 0], sizes = [7, 224], strides = [1, 1]} : vector<18x224xf32> to vector<7x224xf32>
    %165 = arith.addf %163, %164 : vector<7x224xf32>
    %c0_118 = arith.constant 0 : index
    %c0_119 = arith.constant 0 : index
    %166 = vector.load %arg6[%c0_118, %c0_119] : memref<1x224xf32, #tpu.memory_space<vmem>>, vector<1x224xf32>
    %167 = vector.broadcast %166 : vector<1x224xf32> to vector<7x224xf32>
    %168 = arith.addf %165, %167 : vector<7x224xf32>
    %cst_120 = arith.constant 0.000000e+00 : f32
    %169 = vector.broadcast %cst_120 : f32 to vector<7x224xf32>
    %170 = arith.cmpf oge, %168, %169 : vector<7x224xf32>
    %cst_121 = arith.constant 2.000000e-01 : f32
    %171 = vector.broadcast %cst_121 : f32 to vector<7x224xf32>
    %172 = arith.mulf %171, %168 : vector<7x224xf32>
    %173 = arith.select %170, %168, %172 : vector<7x224xi1>, vector<7x224xf32>
    %c28 = arith.constant 28 : index
    %c0_122 = arith.constant 0 : index
    %174 = vector.load %arg11[%c28, %c0_122] : memref<36x224xf32, #tpu.memory_space<vmem>>, vector<7x224xf32>
    tpu.vector_store %arg11[%c28, %c0_122], %173 {strides = array<i32>} : memref<36x224xf32, #tpu.memory_space<vmem>>, vector<7x224xf32>,
    %c0_123 = arith.constant 0 : index
    %c0_124 = arith.constant 0 : index
    %175 = vector.load %arg11[%c0_123, %c0_124] : memref<36x224xf32, #tpu.memory_space<vmem>>, vector<36x224xf32>
    %176 = arith.truncf %175 : vector<36x224xf32> to vector<36x224xbf16>
    %c0_125 = arith.constant 0 : index
    %c0_126 = arith.constant 0 : index
    %c0_127 = arith.constant 0 : index
    %c0_128 = arith.constant 0 : index
    %177 = vector.load %arg3[%c0_125, %c0_126, %c0_127, %c0_128] : memref<2x2x224x224xbf16, #tpu.memory_space<vmem>>, vector<1x1x224x224xbf16>
    %178 = vector.shape_cast %177 : vector<1x1x224x224xbf16> to vector<224x224xbf16>
    %cst_129 = arith.constant dense<0.000000e+00> : vector<36x224xf32>
    %179 = tpu.matmul %176, %178, %cst_129 {dimension_numbers = #tpu.dot_dimension_numbers<[1], [0], [0], [1], [0, 0, 1, 1], [], []>} : vector<36x224xbf16>, vector<224x224xbf16>, vector<36x224xf32> -> vector<36x224xf32>
    %c0_130 = arith.constant 0 : index
    %c1_131 = arith.constant 1 : index
    %c0_132 = arith.constant 0 : index
    %c0_133 = arith.constant 0 : index
    %180 = vector.load %arg3[%c0_130, %c1_131, %c0_132, %c0_133] : memref<2x2x224x224xbf16, #tpu.memory_space<vmem>>, vector<1x1x224x224xbf16>
    %181 = vector.shape_cast %180 : vector<1x1x224x224xbf16> to vector<224x224xbf16>
    %cst_134 = arith.constant dense<0.000000e+00> : vector<36x224xf32>
    %182 = tpu.matmul %176, %181, %cst_134 {dimension_numbers = #tpu.dot_dimension_numbers<[1], [0], [0], [1], [0, 0, 1, 1], [], []>} : vector<36x224xbf16>, vector<224x224xbf16>, vector<36x224xf32> -> vector<36x224xf32>
    %c1_135 = arith.constant 1 : index
    %c0_136 = arith.constant 0 : index
    %c0_137 = arith.constant 0 : index
    %c0_138 = arith.constant 0 : index
    %183 = vector.load %arg3[%c1_135, %c0_136, %c0_137, %c0_138] : memref<2x2x224x224xbf16, #tpu.memory_space<vmem>>, vector<1x1x224x224xbf16>
    %184 = vector.shape_cast %183 : vector<1x1x224x224xbf16> to vector<224x224xbf16>
    %cst_139 = arith.constant dense<0.000000e+00> : vector<36x224xf32>
    %185 = tpu.matmul %176, %184, %cst_139 {dimension_numbers = #tpu.dot_dimension_numbers<[1], [0], [0], [1], [0, 0, 1, 1], [], []>} : vector<36x224xbf16>, vector<224x224xbf16>, vector<36x224xf32> -> vector<36x224xf32>
    %c1_140 = arith.constant 1 : index
    %c1_141 = arith.constant 1 : index
    %c0_142 = arith.constant 0 : index
    %c0_143 = arith.constant 0 : index
    %186 = vector.load %arg3[%c1_140, %c1_141, %c0_142, %c0_143] : memref<2x2x224x224xbf16, #tpu.memory_space<vmem>>, vector<1x1x224x224xbf16>
    %187 = vector.shape_cast %186 : vector<1x1x224x224xbf16> to vector<224x224xbf16>
    %cst_144 = arith.constant dense<0.000000e+00> : vector<36x224xf32>
    %188 = tpu.matmul %176, %187, %cst_144 {dimension_numbers = #tpu.dot_dimension_numbers<[1], [0], [0], [1], [0, 0, 1, 1], [], []>} : vector<36x224xbf16>, vector<224x224xbf16>, vector<36x224xf32> -> vector<36x224xf32>
    %c0_145 = arith.constant 0 : index
    %c0_146 = arith.constant 0 : index
    %189 = vector.load %arg7[%c0_145, %c0_146] : memref<1x224xf32, #tpu.memory_space<vmem>>, vector<1x224xf32>
    %190 = vector.extract_strided_slice %179 {offsets = [9, 0], sizes = [7, 224], strides = [1, 1]} : vector<36x224xf32> to vector<7x224xf32>
    %191 = vector.broadcast %189 : vector<1x224xf32> to vector<7x224xf32>
    %192 = arith.addf %191, %190 : vector<7x224xf32>
    %193 = vector.extract_strided_slice %182 {offsets = [1, 0], sizes = [7, 224], strides = [1, 1]} : vector<36x224xf32> to vector<7x224xf32>
    %194 = arith.addf %192, %193 : vector<7x224xf32>
    %cst_147 = arith.constant 0.000000e+00 : f32
    %195 = vector.broadcast %cst_147 : f32 to vector<7x224xf32>
    %196 = arith.cmpf oge, %194, %195 : vector<7x224xf32>
    %cst_148 = arith.constant 2.000000e-01 : f32
    %197 = vector.broadcast %cst_148 : f32 to vector<7x224xf32>
    %198 = arith.mulf %197, %194 : vector<7x224xf32>
    %199 = arith.select %196, %194, %198 : vector<7x224xi1>, vector<7x224xf32>
    %c1_149 = arith.constant 1 : index
    %c0_150 = arith.constant 0 : index
    %200 = vector.load %arg12[%c1_149, %c0_150] : memref<72x224xf32, #tpu.memory_space<vmem>>, vector<7x224xf32>
    tpu.vector_store %arg12[%c1_149, %c0_150], %199 {strides = array<i32>} : memref<72x224xf32, #tpu.memory_space<vmem>>, vector<7x224xf32>,
    %c0_151 = arith.constant 0 : index
    %c0_152 = arith.constant 0 : index
    %201 = vector.load %arg7[%c0_151, %c0_152] : memref<1x224xf32, #tpu.memory_space<vmem>>, vector<1x224xf32>
    %202 = vector.extract_strided_slice %185 {offsets = [1, 0], sizes = [7, 224], strides = [1, 1]} : vector<36x224xf32> to vector<7x224xf32>
    %203 = vector.broadcast %201 : vector<1x224xf32> to vector<7x224xf32>
    %204 = arith.addf %203, %202 : vector<7x224xf32>
    %205 = vector.extract_strided_slice %188 {offsets = [10, 0], sizes = [7, 224], strides = [1, 1]} : vector<36x224xf32> to vector<7x224xf32>
    %206 = arith.addf %204, %205 : vector<7x224xf32>
    %cst_153 = arith.constant 0.000000e+00 : f32
    %207 = vector.broadcast %cst_153 : f32 to vector<7x224xf32>
    %208 = arith.cmpf oge, %206, %207 : vector<7x224xf32>
    %cst_154 = arith.constant 2.000000e-01 : f32
    %209 = vector.broadcast %cst_154 : f32 to vector<7x224xf32>
    %210 = arith.mulf %209, %206 : vector<7x224xf32>
    %211 = arith.select %208, %206, %210 : vector<7x224xi1>, vector<7x224xf32>
    %c10_155 = arith.constant 10 : index
    %c0_156 = arith.constant 0 : index
    %212 = vector.load %arg12[%c10_155, %c0_156] : memref<72x224xf32, #tpu.memory_space<vmem>>, vector<7x224xf32>
    tpu.vector_store %arg12[%c10_155, %c0_156], %211 {strides = array<i32>} : memref<72x224xf32, #tpu.memory_space<vmem>>, vector<7x224xf32>,
    %c0_157 = arith.constant 0 : index
    %c0_158 = arith.constant 0 : index
    %213 = vector.load %arg7[%c0_157, %c0_158] : memref<1x224xf32, #tpu.memory_space<vmem>>, vector<1x224xf32>
    %214 = vector.extract_strided_slice %179 {offsets = [1, 0], sizes = [7, 224], strides = [1, 1]} : vector<36x224xf32> to vector<7x224xf32>
    %215 = vector.broadcast %213 : vector<1x224xf32> to vector<7x224xf32>
    %216 = arith.addf %215, %214 : vector<7x224xf32>
    %217 = vector.extract_strided_slice %182 {offsets = [10, 0], sizes = [7, 224], strides = [1, 1]} : vector<36x224xf32> to vector<7x224xf32>
    %218 = arith.addf %216, %217 : vector<7x224xf32>
    %cst_159 = arith.constant 0.000000e+00 : f32
    %219 = vector.broadcast %cst_159 : f32 to vector<7x224xf32>
    %220 = arith.cmpf oge, %218, %219 : vector<7x224xf32>
    %cst_160 = arith.constant 2.000000e-01 : f32
    %221 = vector.broadcast %cst_160 : f32 to vector<7x224xf32>
    %222 = arith.mulf %221, %218 : vector<7x224xf32>
    %223 = arith.select %220, %218, %222 : vector<7x224xi1>, vector<7x224xf32>
    %c19_161 = arith.constant 19 : index
    %c0_162 = arith.constant 0 : index
    %224 = vector.load %arg12[%c19_161, %c0_162] : memref<72x224xf32, #tpu.memory_space<vmem>>, vector<7x224xf32>
    tpu.vector_store %arg12[%c19_161, %c0_162], %223 {strides = array<i32>} : memref<72x224xf32, #tpu.memory_space<vmem>>, vector<7x224xf32>,
    %c0_163 = arith.constant 0 : index
    %c0_164 = arith.constant 0 : index
    %225 = vector.load %arg7[%c0_163, %c0_164] : memref<1x224xf32, #tpu.memory_space<vmem>>, vector<1x224xf32>
    %226 = vector.extract_strided_slice %185 {offsets = [10, 0], sizes = [7, 224], strides = [1, 1]} : vector<36x224xf32> to vector<7x224xf32>
    %227 = vector.broadcast %225 : vector<1x224xf32> to vector<7x224xf32>
    %228 = arith.addf %227, %226 : vector<7x224xf32>
    %229 = vector.extract_strided_slice %188 {offsets = [2, 0], sizes = [7, 224], strides = [1, 1]} : vector<36x224xf32> to vector<7x224xf32>
    %230 = arith.addf %228, %229 : vector<7x224xf32>
    %cst_165 = arith.constant 0.000000e+00 : f32
    %231 = vector.broadcast %cst_165 : f32 to vector<7x224xf32>
    %232 = arith.cmpf oge, %230, %231 : vector<7x224xf32>
    %cst_166 = arith.constant 2.000000e-01 : f32
    %233 = vector.broadcast %cst_166 : f32 to vector<7x224xf32>
    %234 = arith.mulf %233, %230 : vector<7x224xf32>
    %235 = arith.select %232, %230, %234 : vector<7x224xi1>, vector<7x224xf32>
    %c28_167 = arith.constant 28 : index
    %c0_168 = arith.constant 0 : index
    %236 = vector.load %arg12[%c28_167, %c0_168] : memref<72x224xf32, #tpu.memory_space<vmem>>, vector<7x224xf32>
    tpu.vector_store %arg12[%c28_167, %c0_168], %235 {strides = array<i32>} : memref<72x224xf32, #tpu.memory_space<vmem>>, vector<7x224xf32>,
    %c0_169 = arith.constant 0 : index
    %c0_170 = arith.constant 0 : index
    %237 = vector.load %arg7[%c0_169, %c0_170] : memref<1x224xf32, #tpu.memory_space<vmem>>, vector<1x224xf32>
    %238 = vector.extract_strided_slice %179 {offsets = [27, 0], sizes = [7, 224], strides = [1, 1]} : vector<36x224xf32> to vector<7x224xf32>
    %239 = vector.broadcast %237 : vector<1x224xf32> to vector<7x224xf32>
    %240 = arith.addf %239, %238 : vector<7x224xf32>
    %241 = vector.extract_strided_slice %182 {offsets = [19, 0], sizes = [7, 224], strides = [1, 1]} : vector<36x224xf32> to vector<7x224xf32>
    %242 = arith.addf %240, %241 : vector<7x224xf32>
    %cst_171 = arith.constant 0.000000e+00 : f32
    %243 = vector.broadcast %cst_171 : f32 to vector<7x224xf32>
    %244 = arith.cmpf oge, %242, %243 : vector<7x224xf32>
    %cst_172 = arith.constant 2.000000e-01 : f32
    %245 = vector.broadcast %cst_172 : f32 to vector<7x224xf32>
    %246 = arith.mulf %245, %242 : vector<7x224xf32>
    %247 = arith.select %244, %242, %246 : vector<7x224xi1>, vector<7x224xf32>
    %c37 = arith.constant 37 : index
    %c0_173 = arith.constant 0 : index
    %248 = vector.load %arg12[%c37, %c0_173] : memref<72x224xf32, #tpu.memory_space<vmem>>, vector<7x224xf32>
    tpu.vector_store %arg12[%c37, %c0_173], %247 {strides = array<i32>} : memref<72x224xf32, #tpu.memory_space<vmem>>, vector<7x224xf32>,
    %c0_174 = arith.constant 0 : index
    %c0_175 = arith.constant 0 : index
    %249 = vector.load %arg7[%c0_174, %c0_175] : memref<1x224xf32, #tpu.memory_space<vmem>>, vector<1x224xf32>
    %250 = vector.extract_strided_slice %185 {offsets = [19, 0], sizes = [7, 224], strides = [1, 1]} : vector<36x224xf32> to vector<7x224xf32>
    %251 = vector.broadcast %249 : vector<1x224xf32> to vector<7x224xf32>
    %252 = arith.addf %251, %250 : vector<7x224xf32>
    %253 = vector.extract_strided_slice %188 {offsets = [28, 0], sizes = [7, 224], strides = [1, 1]} : vector<36x224xf32> to vector<7x224xf32>
    %254 = arith.addf %252, %253 : vector<7x224xf32>
    %cst_176 = arith.constant 0.000000e+00 : f32
    %255 = vector.broadcast %cst_176 : f32 to vector<7x224xf32>
    %256 = arith.cmpf oge, %254, %255 : vector<7x224xf32>
    %cst_177 = arith.constant 2.000000e-01 : f32
    %257 = vector.broadcast %cst_177 : f32 to vector<7x224xf32>
    %258 = arith.mulf %257, %254 : vector<7x224xf32>
    %259 = arith.select %256, %254, %258 : vector<7x224xi1>, vector<7x224xf32>
    %c46 = arith.constant 46 : index
    %c0_178 = arith.constant 0 : index
    %260 = vector.load %arg12[%c46, %c0_178] : memref<72x224xf32, #tpu.memory_space<vmem>>, vector<7x224xf32>
    tpu.vector_store %arg12[%c46, %c0_178], %259 {strides = array<i32>} : memref<72x224xf32, #tpu.memory_space<vmem>>, vector<7x224xf32>,
    %c0_179 = arith.constant 0 : index
    %c0_180 = arith.constant 0 : index
    %261 = vector.load %arg7[%c0_179, %c0_180] : memref<1x224xf32, #tpu.memory_space<vmem>>, vector<1x224xf32>
    %262 = vector.extract_strided_slice %179 {offsets = [19, 0], sizes = [7, 224], strides = [1, 1]} : vector<36x224xf32> to vector<7x224xf32>
    %263 = vector.broadcast %261 : vector<1x224xf32> to vector<7x224xf32>
    %264 = arith.addf %263, %262 : vector<7x224xf32>
    %265 = vector.extract_strided_slice %182 {offsets = [28, 0], sizes = [7, 224], strides = [1, 1]} : vector<36x224xf32> to vector<7x224xf32>
    %266 = arith.addf %264, %265 : vector<7x224xf32>
    %cst_181 = arith.constant 0.000000e+00 : f32
    %267 = vector.broadcast %cst_181 : f32 to vector<7x224xf32>
    %268 = arith.cmpf oge, %266, %267 : vector<7x224xf32>
    %cst_182 = arith.constant 2.000000e-01 : f32
    %269 = vector.broadcast %cst_182 : f32 to vector<7x224xf32>
    %270 = arith.mulf %269, %266 : vector<7x224xf32>
    %271 = arith.select %268, %266, %270 : vector<7x224xi1>, vector<7x224xf32>
    %c55 = arith.constant 55 : index
    %c0_183 = arith.constant 0 : index
    %272 = vector.load %arg12[%c55, %c0_183] : memref<72x224xf32, #tpu.memory_space<vmem>>, vector<7x224xf32>
    tpu.vector_store %arg12[%c55, %c0_183], %271 {strides = array<i32>} : memref<72x224xf32, #tpu.memory_space<vmem>>, vector<7x224xf32>,
    %c0_184 = arith.constant 0 : index
    %c0_185 = arith.constant 0 : index
    %273 = vector.load %arg7[%c0_184, %c0_185] : memref<1x224xf32, #tpu.memory_space<vmem>>, vector<1x224xf32>
    %274 = vector.extract_strided_slice %185 {offsets = [28, 0], sizes = [7, 224], strides = [1, 1]} : vector<36x224xf32> to vector<7x224xf32>
    %275 = vector.broadcast %273 : vector<1x224xf32> to vector<7x224xf32>
    %276 = arith.addf %275, %274 : vector<7x224xf32>
    %277 = vector.extract_strided_slice %188 {offsets = [20, 0], sizes = [7, 224], strides = [1, 1]} : vector<36x224xf32> to vector<7x224xf32>
    %278 = arith.addf %276, %277 : vector<7x224xf32>
    %cst_186 = arith.constant 0.000000e+00 : f32
    %279 = vector.broadcast %cst_186 : f32 to vector<7x224xf32>
    %280 = arith.cmpf oge, %278, %279 : vector<7x224xf32>
    %cst_187 = arith.constant 2.000000e-01 : f32
    %281 = vector.broadcast %cst_187 : f32 to vector<7x224xf32>
    %282 = arith.mulf %281, %278 : vector<7x224xf32>
    %283 = arith.select %280, %278, %282 : vector<7x224xi1>, vector<7x224xf32>
    %c64 = arith.constant 64 : index
    %c0_188 = arith.constant 0 : index
    %284 = vector.load %arg12[%c64, %c0_188] : memref<72x224xf32, #tpu.memory_space<vmem>>, vector<7x224xf32>
    tpu.vector_store %arg12[%c64, %c0_188], %283 {strides = array<i32>} : memref<72x224xf32, #tpu.memory_space<vmem>>, vector<7x224xf32>,
    %c0_189 = arith.constant 0 : index
    %c0_190 = arith.constant 0 : index
    %285 = vector.load %arg12[%c0_189, %c0_190] : memref<72x224xf32, #tpu.memory_space<vmem>>, vector<72x224xf32>
    %286 = arith.truncf %285 : vector<72x224xf32> to vector<72x224xbf16>
    %c0_191 = arith.constant 0 : index
    %c0_192 = arith.constant 0 : index
    %c0_193 = arith.constant 0 : index
    %287 = vector.load %arg4[%c0_191, %c0_192, %c0_193] : memref<3x224x28xbf16, #tpu.memory_space<vmem>>, vector<1x224x28xbf16>
    %288 = vector.shape_cast %287 : vector<1x224x28xbf16> to vector<224x28xbf16>
    %cst_194 = arith.constant dense<0.000000e+00> : vector<72x28xf32>
    %289 = tpu.matmul %286, %288, %cst_194 {dimension_numbers = #tpu.dot_dimension_numbers<[1], [0], [0], [1], [0, 0, 1, 1], [], []>} : vector<72x224xbf16>, vector<224x28xbf16>, vector<72x28xf32> -> vector<72x28xf32>
    %c1_195 = arith.constant 1 : index
    %c0_196 = arith.constant 0 : index
    %c0_197 = arith.constant 0 : index
    %290 = vector.load %arg4[%c1_195, %c0_196, %c0_197] : memref<3x224x28xbf16, #tpu.memory_space<vmem>>, vector<1x224x28xbf16>
    %291 = vector.shape_cast %290 : vector<1x224x28xbf16> to vector<224x28xbf16>
    %cst_198 = arith.constant dense<0.000000e+00> : vector<72x28xf32>
    %292 = tpu.matmul %286, %291, %cst_198 {dimension_numbers = #tpu.dot_dimension_numbers<[1], [0], [0], [1], [0, 0, 1, 1], [], []>} : vector<72x224xbf16>, vector<224x28xbf16>, vector<72x28xf32> -> vector<72x28xf32>
    %c2_199 = arith.constant 2 : index
    %c0_200 = arith.constant 0 : index
    %c0_201 = arith.constant 0 : index
    %293 = vector.load %arg4[%c2_199, %c0_200, %c0_201] : memref<3x224x28xbf16, #tpu.memory_space<vmem>>, vector<1x224x28xbf16>
    %294 = vector.shape_cast %293 : vector<1x224x28xbf16> to vector<224x28xbf16>
    %cst_202 = arith.constant dense<0.000000e+00> : vector<72x28xf32>
    %295 = tpu.matmul %286, %294, %cst_202 {dimension_numbers = #tpu.dot_dimension_numbers<[1], [0], [0], [1], [0, 0, 1, 1], [], []>} : vector<72x224xbf16>, vector<224x28xbf16>, vector<72x28xf32> -> vector<72x28xf32>
    %c0_203 = arith.constant 0 : index
    %c0_204 = arith.constant 0 : index
    %296 = vector.load %arg8[%c0_203, %c0_204] : memref<1x28xf32, #tpu.memory_space<vmem>>, vector<1x28xf32>
    %297 = vector.extract_strided_slice %289 {offsets = [27, 0], sizes = [7, 28], strides = [1, 1]} : vector<72x28xf32> to vector<7x28xf32>
    %298 = vector.broadcast %296 : vector<1x28xf32> to vector<7x28xf32>
    %299 = arith.addf %298, %297 : vector<7x28xf32>
    %300 = vector.extract_strided_slice %292 {offsets = [1, 0], sizes = [7, 28], strides = [1, 1]} : vector<72x28xf32> to vector<7x28xf32>
    %301 = arith.addf %299, %300 : vector<7x28xf32>
    %302 = vector.extract_strided_slice %295 {offsets = [10, 0], sizes = [7, 28], strides = [1, 1]} : vector<72x28xf32> to vector<7x28xf32>
    %303 = arith.addf %301, %302 : vector<7x28xf32>
    %304 = math.tanh %303 : vector<7x28xf32>
    %c0_205 = arith.constant 0 : index
    %c0_206 = arith.constant 0 : index
    %c0_207 = arith.constant 0 : index
    %c0_208 = arith.constant 0 : index
    %305 = vector.load %arg9[%c0_205, %c0_206, %c0_207, %c0_208] : memref<2x4x7x28xf32, #tpu.memory_space<vmem>>, vector<1x1x7x28xf32>
    %306 = vector.shape_cast %305 : vector<1x1x7x28xf32> to vector<7x28xf32>
    %307 = vector.shape_cast %304 : vector<7x28xf32> to vector<1x1x7x28xf32>
    tpu.vector_store %arg9[%c0_205, %c0_206, %c0_207, %c0_208], %307 {strides = array<i32>} : memref<2x4x7x28xf32, #tpu.memory_space<vmem>>, vector<1x1x7x28xf32>,
    %c0_209 = arith.constant 0 : index
    %c0_210 = arith.constant 0 : index
    %308 = vector.load %arg8[%c0_209, %c0_210] : memref<1x28xf32, #tpu.memory_space<vmem>>, vector<1x28xf32>
    %309 = vector.extract_strided_slice %289 {offsets = [1, 0], sizes = [7, 28], strides = [1, 1]} : vector<72x28xf32> to vector<7x28xf32>
    %310 = vector.broadcast %308 : vector<1x28xf32> to vector<7x28xf32>
    %311 = arith.addf %310, %309 : vector<7x28xf32>
    %312 = vector.extract_strided_slice %292 {offsets = [10, 0], sizes = [7, 28], strides = [1, 1]} : vector<72x28xf32> to vector<7x28xf32>
    %313 = arith.addf %311, %312 : vector<7x28xf32>
    %314 = vector.extract_strided_slice %295 {offsets = [19, 0], sizes = [7, 28], strides = [1, 1]} : vector<72x28xf32> to vector<7x28xf32>
    %315 = arith.addf %313, %314 : vector<7x28xf32>
    %316 = math.tanh %315 : vector<7x28xf32>
    %c0_211 = arith.constant 0 : index
    %c1_212 = arith.constant 1 : index
    %c0_213 = arith.constant 0 : index
    %c0_214 = arith.constant 0 : index
    %317 = vector.load %arg9[%c0_211, %c1_212, %c0_213, %c0_214] : memref<2x4x7x28xf32, #tpu.memory_space<vmem>>, vector<1x1x7x28xf32>
    %318 = vector.shape_cast %317 : vector<1x1x7x28xf32> to vector<7x28xf32>
    %319 = vector.shape_cast %316 : vector<7x28xf32> to vector<1x1x7x28xf32>
    tpu.vector_store %arg9[%c0_211, %c1_212, %c0_213, %c0_214], %319 {strides = array<i32>} : memref<2x4x7x28xf32, #tpu.memory_space<vmem>>, vector<1x1x7x28xf32>,
    %c0_215 = arith.constant 0 : index
    %c0_216 = arith.constant 0 : index
    %320 = vector.load %arg8[%c0_215, %c0_216] : memref<1x28xf32, #tpu.memory_space<vmem>>, vector<1x28xf32>
    %321 = vector.extract_strided_slice %289 {offsets = [10, 0], sizes = [7, 28], strides = [1, 1]} : vector<72x28xf32> to vector<7x28xf32>
    %322 = vector.broadcast %320 : vector<1x28xf32> to vector<7x28xf32>
    %323 = arith.addf %322, %321 : vector<7x28xf32>
    %324 = vector.extract_strided_slice %292 {offsets = [19, 0], sizes = [7, 28], strides = [1, 1]} : vector<72x28xf32> to vector<7x28xf32>
    %325 = arith.addf %323, %324 : vector<7x28xf32>
    %326 = vector.extract_strided_slice %295 {offsets = [28, 0], sizes = [7, 28], strides = [1, 1]} : vector<72x28xf32> to vector<7x28xf32>
    %327 = arith.addf %325, %326 : vector<7x28xf32>
    %328 = math.tanh %327 : vector<7x28xf32>
    %c0_217 = arith.constant 0 : index
    %c2_218 = arith.constant 2 : index
    %c0_219 = arith.constant 0 : index
    %c0_220 = arith.constant 0 : index
    %329 = vector.load %arg9[%c0_217, %c2_218, %c0_219, %c0_220] : memref<2x4x7x28xf32, #tpu.memory_space<vmem>>, vector<1x1x7x28xf32>
    %330 = vector.shape_cast %329 : vector<1x1x7x28xf32> to vector<7x28xf32>
    %331 = vector.shape_cast %328 : vector<7x28xf32> to vector<1x1x7x28xf32>
    tpu.vector_store %arg9[%c0_217, %c2_218, %c0_219, %c0_220], %331 {strides = array<i32>} : memref<2x4x7x28xf32, #tpu.memory_space<vmem>>, vector<1x1x7x28xf32>,
    %c0_221 = arith.constant 0 : index
    %c0_222 = arith.constant 0 : index
    %332 = vector.load %arg8[%c0_221, %c0_222] : memref<1x28xf32, #tpu.memory_space<vmem>>, vector<1x28xf32>
    %333 = vector.extract_strided_slice %289 {offsets = [19, 0], sizes = [7, 28], strides = [1, 1]} : vector<72x28xf32> to vector<7x28xf32>
    %334 = vector.broadcast %332 : vector<1x28xf32> to vector<7x28xf32>
    %335 = arith.addf %334, %333 : vector<7x28xf32>
    %336 = vector.extract_strided_slice %292 {offsets = [28, 0], sizes = [7, 28], strides = [1, 1]} : vector<72x28xf32> to vector<7x28xf32>
    %337 = arith.addf %335, %336 : vector<7x28xf32>
    %338 = vector.extract_strided_slice %295 {offsets = [2, 0], sizes = [7, 28], strides = [1, 1]} : vector<72x28xf32> to vector<7x28xf32>
    %339 = arith.addf %337, %338 : vector<7x28xf32>
    %340 = math.tanh %339 : vector<7x28xf32>
    %c0_223 = arith.constant 0 : index
    %c3_224 = arith.constant 3 : index
    %c0_225 = arith.constant 0 : index
    %c0_226 = arith.constant 0 : index
    %341 = vector.load %arg9[%c0_223, %c3_224, %c0_225, %c0_226] : memref<2x4x7x28xf32, #tpu.memory_space<vmem>>, vector<1x1x7x28xf32>
    %342 = vector.shape_cast %341 : vector<1x1x7x28xf32> to vector<7x28xf32>
    %343 = vector.shape_cast %340 : vector<7x28xf32> to vector<1x1x7x28xf32>
    tpu.vector_store %arg9[%c0_223, %c3_224, %c0_225, %c0_226], %343 {strides = array<i32>} : memref<2x4x7x28xf32, #tpu.memory_space<vmem>>, vector<1x1x7x28xf32>,
    %c0_227 = arith.constant 0 : index
    %c0_228 = arith.constant 0 : index
    %344 = vector.load %arg8[%c0_227, %c0_228] : memref<1x28xf32, #tpu.memory_space<vmem>>, vector<1x28xf32>
    %345 = vector.extract_strided_slice %289 {offsets = [63, 0], sizes = [7, 28], strides = [1, 1]} : vector<72x28xf32> to vector<7x28xf32>
    %346 = vector.broadcast %344 : vector<1x28xf32> to vector<7x28xf32>
    %347 = arith.addf %346, %345 : vector<7x28xf32>
    %348 = vector.extract_strided_slice %292 {offsets = [37, 0], sizes = [7, 28], strides = [1, 1]} : vector<72x28xf32> to vector<7x28xf32>
    %349 = arith.addf %347, %348 : vector<7x28xf32>
    %350 = vector.extract_strided_slice %295 {offsets = [46, 0], sizes = [7, 28], strides = [1, 1]} : vector<72x28xf32> to vector<7x28xf32>
    %351 = arith.addf %349, %350 : vector<7x28xf32>
    %352 = math.tanh %351 : vector<7x28xf32>
    %c1_229 = arith.constant 1 : index
    %c0_230 = arith.constant 0 : index
    %c0_231 = arith.constant 0 : index
    %c0_232 = arith.constant 0 : index
    %353 = vector.load %arg9[%c1_229, %c0_230, %c0_231, %c0_232] : memref<2x4x7x28xf32, #tpu.memory_space<vmem>>, vector<1x1x7x28xf32>
    %354 = vector.shape_cast %353 : vector<1x1x7x28xf32> to vector<7x28xf32>
    %355 = vector.shape_cast %352 : vector<7x28xf32> to vector<1x1x7x28xf32>
    tpu.vector_store %arg9[%c1_229, %c0_230, %c0_231, %c0_232], %355 {strides = array<i32>} : memref<2x4x7x28xf32, #tpu.memory_space<vmem>>, vector<1x1x7x28xf32>,
    %c0_233 = arith.constant 0 : index
    %c0_234 = arith.constant 0 : index
    %356 = vector.load %arg8[%c0_233, %c0_234] : memref<1x28xf32, #tpu.memory_space<vmem>>, vector<1x28xf32>
    %357 = vector.extract_strided_slice %289 {offsets = [37, 0], sizes = [7, 28], strides = [1, 1]} : vector<72x28xf32> to vector<7x28xf32>
    %358 = vector.broadcast %356 : vector<1x28xf32> to vector<7x28xf32>
    %359 = arith.addf %358, %357 : vector<7x28xf32>
    %360 = vector.extract_strided_slice %292 {offsets = [46, 0], sizes = [7, 28], strides = [1, 1]} : vector<72x28xf32> to vector<7x28xf32>
    %361 = arith.addf %359, %360 : vector<7x28xf32>
    %362 = vector.extract_strided_slice %295 {offsets = [55, 0], sizes = [7, 28], strides = [1, 1]} : vector<72x28xf32> to vector<7x28xf32>
    %363 = arith.addf %361, %362 : vector<7x28xf32>
    %364 = math.tanh %363 : vector<7x28xf32>
    %c1_235 = arith.constant 1 : index
    %c1_236 = arith.constant 1 : index
    %c0_237 = arith.constant 0 : index
    %c0_238 = arith.constant 0 : index
    %365 = vector.load %arg9[%c1_235, %c1_236, %c0_237, %c0_238] : memref<2x4x7x28xf32, #tpu.memory_space<vmem>>, vector<1x1x7x28xf32>
    %366 = vector.shape_cast %365 : vector<1x1x7x28xf32> to vector<7x28xf32>
    %367 = vector.shape_cast %364 : vector<7x28xf32> to vector<1x1x7x28xf32>
    tpu.vector_store %arg9[%c1_235, %c1_236, %c0_237, %c0_238], %367 {strides = array<i32>} : memref<2x4x7x28xf32, #tpu.memory_space<vmem>>, vector<1x1x7x28xf32>,
    %c0_239 = arith.constant 0 : index
    %c0_240 = arith.constant 0 : index
    %368 = vector.load %arg8[%c0_239, %c0_240] : memref<1x28xf32, #tpu.memory_space<vmem>>, vector<1x28xf32>
    %369 = vector.extract_strided_slice %289 {offsets = [46, 0], sizes = [7, 28], strides = [1, 1]} : vector<72x28xf32> to vector<7x28xf32>
    %370 = vector.broadcast %368 : vector<1x28xf32> to vector<7x28xf32>
    %371 = arith.addf %370, %369 : vector<7x28xf32>
    %372 = vector.extract_strided_slice %292 {offsets = [55, 0], sizes = [7, 28], strides = [1, 1]} : vector<72x28xf32> to vector<7x28xf32>
    %373 = arith.addf %371, %372 : vector<7x28xf32>
    %374 = vector.extract_strided_slice %295 {offsets = [64, 0], sizes = [7, 28], strides = [1, 1]} : vector<72x28xf32> to vector<7x28xf32>
    %375 = arith.addf %373, %374 : vector<7x28xf32>
    %376 = math.tanh %375 : vector<7x28xf32>
    %c1_241 = arith.constant 1 : index
    %c2_242 = arith.constant 2 : index
    %c0_243 = arith.constant 0 : index
    %c0_244 = arith.constant 0 : index
    %377 = vector.load %arg9[%c1_241, %c2_242, %c0_243, %c0_244] : memref<2x4x7x28xf32, #tpu.memory_space<vmem>>, vector<1x1x7x28xf32>
    %378 = vector.shape_cast %377 : vector<1x1x7x28xf32> to vector<7x28xf32>
    %379 = vector.shape_cast %376 : vector<7x28xf32> to vector<1x1x7x28xf32>
    tpu.vector_store %arg9[%c1_241, %c2_242, %c0_243, %c0_244], %379 {strides = array<i32>} : memref<2x4x7x28xf32, #tpu.memory_space<vmem>>, vector<1x1x7x28xf32>,
    %c0_245 = arith.constant 0 : index
    %c0_246 = arith.constant 0 : index
    %380 = vector.load %arg8[%c0_245, %c0_246] : memref<1x28xf32, #tpu.memory_space<vmem>>, vector<1x28xf32>
    %381 = vector.extract_strided_slice %289 {offsets = [55, 0], sizes = [7, 28], strides = [1, 1]} : vector<72x28xf32> to vector<7x28xf32>
    %382 = vector.broadcast %380 : vector<1x28xf32> to vector<7x28xf32>
    %383 = arith.addf %382, %381 : vector<7x28xf32>
    %384 = vector.extract_strided_slice %292 {offsets = [64, 0], sizes = [7, 28], strides = [1, 1]} : vector<72x28xf32> to vector<7x28xf32>
    %385 = arith.addf %383, %384 : vector<7x28xf32>
    %386 = vector.extract_strided_slice %295 {offsets = [38, 0], sizes = [7, 28], strides = [1, 1]} : vector<72x28xf32> to vector<7x28xf32>
    %387 = arith.addf %385, %386 : vector<7x28xf32>
    %388 = math.tanh %387 : vector<7x28xf32>
    %c1_247 = arith.constant 1 : index
    %c3_248 = arith.constant 3 : index
    %c0_249 = arith.constant 0 : index
    %c0_250 = arith.constant 0 : index
    %389 = vector.load %arg9[%c1_247, %c3_248, %c0_249, %c0_250] : memref<2x4x7x28xf32, #tpu.memory_space<vmem>>, vector<1x1x7x28xf32>
    %390 = vector.shape_cast %389 : vector<1x1x7x28xf32> to vector<7x28xf32>
    %391 = vector.shape_cast %388 : vector<7x28xf32> to vector<1x1x7x28xf32>
    tpu.vector_store %arg9[%c1_247, %c3_248, %c0_249, %c0_250], %391 {strides = array<i32>} : memref<2x4x7x28xf32, #tpu.memory_space<vmem>>, vector<1x1x7x28xf32>,
    return
  }
}

</mosaic_0001>

<bundles_post_ra>
// kernel: decoder_forward.1
= control target key start
LH: loop header
LB: loop body
LE: loop exit
PB: predicated region body
PF: predicated region fallthrough
CT: control target
= control target key end

     0   :  { %14 = vsyncpa [#allocation6], 0  ;;  %s5850_s0 = inlined_call_operand.vmem [shape: f32[2,16], index: 0, kind: input, shape index: {}]   ;;  %s5851_s1 = inlined_call_operand.vmem [shape: bf16[7,16,224], index: 1, kind: input, shape index: {}]   ;;  %s5852_s2 = inlined_call_operand.hbm [shape: bf16[2,2,224,224], index: 2, kind: input, shape index: {}]   ;;  %s5853_s3 = inlined_call_operand.hbm [shape: bf16[2,2,224,224], index: 3, kind: input, shape index: {}]   ;;  %s5854_s4 = inlined_call_operand.vmem [shape: bf16[3,224,28], index: 4, kind: input, shape index: {}]   ;;  %s5855_s5 = inlined_call_operand.vmem [shape: f32[1,224], index: 5, kind: input, shape index: {}]   ;;  %s5856_s6 = inlined_call_operand.vmem [shape: f32[1,224], index: 6, kind: input, shape index: {}]   ;;  %s5857_s7 = inlined_call_operand.vmem [shape: f32[1,224], index: 7, kind: input, shape index: {}]   ;;  %s5858_s8 = inlined_call_operand.vmem [shape: f32[1,28], index: 8, kind: input, shape index: {}]   ;;  %s5859_s9 = inlined_call_operand.vmem [shape: f32[2,4,7,28], index: 9, kind: output, shape index: {}]  }
   0x1   :  { %15 = vsyncpa [#allocation8], 0  ;;  %s5024_s30 = smov [#allocation5]   ;;  %s4976_s13 = scalar_lea.hbm %s5852_s2, 14336 }
   0x2   :  { %s25_s10 = sshll.u32 %s5024_s30, 4  ;;  %p4977_p0 = scmp.ne.s32.totalorder %s5852_s2, %s4976_s13  ;;  %s26_s10 = int_to_ptr.vmem [resolvable:$true] %s25_s10 }
   0x3   :  { %p4980_p1 = scmp.lt.u32.totalorder %s4976_s13, %s5852_s2 }
   0x5   :  { %p4982_p2 = pnand %p4980_p1, %p4977_p0 }
   0x7   :  { %4985 = shalt.err (!%p4982_p2)
}
   0x8   :  { %s4986_s18 = scalar_lea.vmem %s26_s10, 14336  ;;  %p4991_p4 = scmp.lt.s32.totalorder %s26_s10, %s26_s10 }
   0x9   :  { %p4987_p3 = scmp.ne.s32.totalorder %s26_s10, %s4986_s18  ;;  %p4992_p5 = scmp.lt.s32.totalorder %s4986_s18, %s4986_s18 }
   0xb   :  { %p4993_p6 = por %p4992_p5, %p4991_p4 }
   0xd   :  { %p4994_p7 = pnand %p4993_p6, %p4987_p3 }
   0xf   :  { %4997 = shalt.err (!%p4994_p7)
}
  0x10   :  { %s5025_s19 = smov 128   ;;  %s5026_s20 = smov 8  }
  0x11   :  { %31 = dma.hbm_to_vmem [thread:$0]  %s5852_s2, 14336, %s26_s10, [#allocation6], %s5025_s19, %s5025_s19, %s5026_s20  }
  0x12   :  { %s5027_s23 = smov [#allocation7]   ;;  %s4998_s27 = scalar_lea.hbm %s5853_s3, 14336 }
  0x13   :  { %s37_s24 = sshll.u32 %s5027_s23, 4  ;;  %p4999_p8 = scmp.ne.s32.totalorder %s5853_s3, %s4998_s27  ;;  %s38_s24 = int_to_ptr.vmem [resolvable:$true] %s37_s24 }
  0x14   :  { %p5002_p9 = scmp.lt.u32.totalorder %s4998_s27, %s5853_s3 }
  0x16   :  { %p5004_p10 = pnand %p5002_p9, %p4999_p8 }
  0x18   :  { %5007 = shalt.err (!%p5004_p10)
}
  0x19   :  { %s5008_s12 = scalar_lea.vmem %s38_s24, 14336  ;;  %p5013_p12 = scmp.lt.s32.totalorder %s38_s24, %s38_s24 }
  0x1a   :  { %p5009_p11 = scmp.ne.s32.totalorder %s38_s24, %s5008_s12  ;;  %p5014_p13 = scmp.lt.s32.totalorder %s5008_s12, %s5008_s12 }
  0x1c   :  { %p5015_p0 = por %p5014_p13, %p5013_p12 }
  0x1e   :  { %p5016_p1 = pnand %p5015_p0, %p5009_p11 }
  0x20   :  { %5019 = shalt.err (!%p5016_p1)
}
  0x21   :  { %43 = dma.hbm_to_vmem [thread:$0]  %s5853_s3, 14336, %s38_s24, [#allocation8], %s5025_s19, %s5025_s19, %s5026_s20  }
  0x22   :  { %5020 = dma.done.wait [#allocation6], 14336  }
  0x23   :  { %5021 = vsyncadd [#allocation6], 4294952960 }
  0x24   :  { %5022 = dma.done.wait [#allocation8], 14336  }
  0x25   :  { %5023 = vsyncadd [#allocation8], 4294952960  ;;  %v5028_v0 = vmov 0   ;;  %v4546_v1 = vld [vmem:[%s5851_s1 + $0x4] ss:$8 sps:$4 sm:$0xff]   ;;  %vm124_vm0 = vcmask 130048  }
  0x26   :  { %160 = vmatprep.mubr.bf16.mxu0 %v5028_v0  ;;  %269 = vmatprep.mubr.bf16.mxu1 %v5028_v0  ;;  %v4548_v2 = vld [vmem:[%s5851_s1 + $0x14] ss:$8 sps:$4 sm:$0xff]   ;;  %v4550_v3 = vld [vmem:[%s5851_s1] ss:$8 sps:$4 sm:$0xff]   ;;  %v4551_v4 = vld [vmem:[%s5851_s1 + $0x10] ss:$8 sps:$4 sm:$0xff]  }
  0x27   :  { %128 = vmatprep.subr.bf16.mxu0 %v4546_v1  ;;  %v98_v5 = vld [vmem:[%s5850_s0] sm:$0x3]  ;;  %237 = vmatprep.subr.bf16.mxu1 %v4548_v2  ;;  %v4554_v8 = vld [vmem:[%s5851_s1 + $0x24] ss:$8 sps:$4 sm:$0xff]   ;;  %v4555_v9 = vld [vmem:[%s5851_s1 + $0x30] ss:$8 sps:$4 sm:$0xff]  }
  0x28   :  { %v99_v6 = vpack.c.bf16 %v98_v5, %v98_v5  ;;  %v4552_v7 = vld [vmem:[%s5851_s1 + $0x20] ss:$8 sps:$4 sm:$0xff]   ;;  %129 = vmatpush1.bf16.msra.mxu0 %v4550_v3  ;;  %238 = vmatpush1.bf16.msra.mxu1 %v4551_v4  ;;  %v4557_v10 = vld [vmem:[%s5851_s1 + $0x34] ss:$8 sps:$4 sm:$0xff]   ;;  %v4560_v11 = vld [vmem:[%s5851_s1 + $0x44] ss:$8 sps:$4 sm:$0xff]  }
  0x29   :  { %342 = vmatprep.subr.bf16.mxu0 %v4554_v8  ;;  %447 = vmatprep.subr.bf16.mxu1 %v4557_v10  ;;  %v4563_v12 = vld [vmem:[%s5851_s1 + $0x54] ss:$8 sps:$4 sm:$0xff]   ;;  %v4558_v13 = vld [vmem:[%s5851_s1 + $0x40] ss:$8 sps:$4 sm:$0xff]   ;;  %v4561_v14 = vld [vmem:[%s5851_s1 + $0x50] ss:$8 sps:$4 sm:$0xff]  }
  0x2a   :  { %v4566_v15 = vld [vmem:[%s5851_s1 + $0x64] ss:$8 sps:$4 sm:$0xff]   ;;  %v4569_v16 = vld [vmem:[#allocation5 + $0x4] ss:$8 sps:$4 sm:$0xff]   ;;  %v4564_v17 = vld [vmem:[%s5851_s1 + $0x60] ss:$8 sps:$4 sm:$0xff]  }
  0x2b   :  { %4102 = vmatmul.mubr.msk.bf16.vlgmr.msra.gmra.mrb[0].mxu0 %vm124_vm0, %v99_v6  ;;  %4107 = vmatmul.mubr.msk.bf16.vlgmr.msra.gmra.mrb[0].mxu1 %vm124_vm0, %v99_v6  ;;  %v4567_v18 = vld [vmem:[#allocation5] ss:$8 sps:$4 sm:$0xff]   ;;  %v4572_v19 = vld [vmem:[#allocation5 + $0xe4] ss:$8 sps:$4 sm:$0xff]   ;;  %v4575_v20 = vld [vmem:[#allocation5 + $0x14] ss:$8 sps:$4 sm:$0xff]  }
  0x2c   :  { %343 = vmatpush1.bf16.msra.mxu0 %v4552_v7  ;;  %448 = vmatpush1.bf16.msra.mxu1 %v4555_v9  ;;  %v4573_v21 = vld [vmem:[#allocation5 + $0x10] ss:$8 sps:$4 sm:$0xff]   ;;  %v4581_v22 = vld [vmem:[#allocation5 + $0x24] ss:$8 sps:$4 sm:$0xff]   ;;  %v4570_v23 = vld [vmem:[#allocation5 + $0xe0] ss:$8 sps:$4 sm:$0xff]  }
  0x2d   :  { %374 = vmatprep.mubr.bf16.mxu0 %v5028_v0  ;;  %479 = vmatprep.mubr.bf16.mxu1 %v5028_v0  ;;  %v4578_v24 = vld [vmem:[#allocation5 + $0xf4] ss:$8 sps:$4 sm:$0xff]   ;;  %v4579_v25 = vld [vmem:[#allocation5 + $0x20] ss:$8 sps:$4 sm:$0xff]   ;;  %v4576_v26 = vld [vmem:[#allocation5 + $0xf0] ss:$8 sps:$4 sm:$0xff]  }
  0x2e   :  { %552 = vmatprep.subr.bf16.mxu0 %v4560_v11  ;;  %657 = vmatprep.subr.bf16.mxu1 %v4563_v12  ;;  %v4584_v27 = vld [vmem:[#allocation5 + $0x104] ss:$8 sps:$4 sm:$0xff]   ;;  %v4582_v28 = vld [vmem:[#allocation5 + $0x100] ss:$8 sps:$4 sm:$0xff]   ;;  %v4587_v29 = vld [vmem:[#allocation5 + $0x34] ss:$8 sps:$4 sm:$0xff]  }
  0x2f   :  { %v4590_v30 = vld [vmem:[#allocation5 + $0x114] ss:$8 sps:$4 sm:$0xff]   ;;  %v4585_v31 = vld [vmem:[#allocation5 + $0x30] ss:$8 sps:$4 sm:$0xff]   ;;  %vm62_vm1 = vcmask 785408   ;;  %v5029_v35 = vmov 0.0  }
  0x30   :  { %v4588_v32 = vld [vmem:[#allocation5 + $0x110] ss:$8 sps:$4 sm:$0xff]   ;;  %v4593_v33 = vld [vmem:[#allocation5 + $0x44] ss:$8 sps:$4 sm:$0xff]   ;;  %61 = vst [vmem:[#allocation2] sm:$0xff] %v5029_v35  ;;  %63 = vst.msk [vmem:[#allocation2 + $0x8] sm:$0xff] %vm62_vm1, %v5029_v35 }
  0x31   :  { %v4596_v34 = vld [vmem:[#allocation5 + $0x124] ss:$8 sps:$4 sm:$0xff]   ;;  %64 = vst [vmem:[#allocation2 + $0x10] sm:$0xff] %v5029_v35  ;;  %65 = vst.msk [vmem:[#allocation2 + $0x18] sm:$0xff] %vm62_vm1, %v5029_v35  ;;  %v4591_v36 = vld [vmem:[#allocation5 + $0x40] ss:$8 sps:$4 sm:$0xff]  }
  0x32   :  { %66 = vst [vmem:[#allocation2 + $0x20] sm:$0x3] %v5029_v35  ;;  %69 = vst [vmem:[#allocation3] sm:$0xff] %v5029_v35  ;;  %v4594_v37 = vld [vmem:[#allocation5 + $0x120] ss:$8 sps:$4 sm:$0xff]   ;;  %vm67_vm2 = vcmask 779264  }
  0x33   :  { %4112 = vmatmul.mubr.msk.bf16.vlgmr.msra.gmra.mrb[4].mxu0 %vm124_vm0, %v99_v6  ;;  %4117 = vmatmul.mubr.msk.bf16.vlgmr.msra.gmra.mrb[4].mxu1 %vm124_vm0, %v99_v6  ;;  %70 = vst.msk [vmem:[#allocation3 + $0x8] sm:$0xff] %vm62_vm1, %v5029_v35  ;;  %71 = vst [vmem:[#allocation3 + $0x10] sm:$0xff] %v5029_v35  ;;  %v4599_v38 = vld [vmem:[#allocation5 + $0x54] ss:$8 sps:$4 sm:$0xff]   ;;  %v4597_v40 = vld [vmem:[#allocation5 + $0x50] ss:$8 sps:$4 sm:$0xff]  }
  0x34   :  { %553 = vmatpush1.bf16.msra.mxu0 %v4558_v13  ;;  %658 = vmatpush1.bf16.msra.mxu1 %v4561_v14  ;;  %72 = vst.msk [vmem:[#allocation3 + $0x18] sm:$0xff] %vm62_vm1, %v5029_v35  ;;  %73 = vst [vmem:[#allocation3 + $0x20] sm:$0xff] %v5029_v35  ;;  %v4602_v39 = vld [vmem:[#allocation5 + $0x134] ss:$8 sps:$4 sm:$0xff]   ;;  %v4600_v41 = vld [vmem:[#allocation5 + $0x130] ss:$8 sps:$4 sm:$0xff]   ;;  %v104_v13 = vlaneseq }
  0x35   :  { %584 = vmatprep.mubr.bf16.mxu0 %v5028_v0  ;;  %689 = vmatprep.mubr.bf16.mxu1 %v5028_v0  ;;  %74 = vst.msk [vmem:[#allocation3 + $0x28] sm:$0xff] %vm62_vm1, %v5029_v35  ;;  %75 = vst [vmem:[#allocation3 + $0x30] sm:$0xff] %v5029_v35  ;;  %v4605_v42 = vld [vmem:[#allocation5 + $0x64] ss:$8 sps:$4 sm:$0xff]   ;;  %v4603_v44 = vld [vmem:[#allocation5 + $0x60] ss:$8 sps:$4 sm:$0xff]  }
  0x36   :  { %762 = vmatprep.subr.bf16.mxu0 %v4566_v15  ;;  %1026 = vmatprep.subr.bf16.mxu1 %v4569_v16  ;;  %76 = vst.msk [vmem:[#allocation3 + $0x38] sm:$0xff] %vm62_vm1, %v5029_v35  ;;  %77 = vst [vmem:[#allocation3 + $0x40] sm:$0xf] %v5029_v35  ;;  %v4608_v43 = vld [vmem:[#allocation5 + $0x144] ss:$8 sps:$4 sm:$0xff]   ;;  %v105_v14 = vshrl.u32 %v104_v13, 7 }
  0x37   :  { %80 = vst [vmem:[#allocation4] sm:$0xff] %v5029_v35  ;;  %81 = vst.msk [vmem:[#allocation4 + $0x8] sm:$0xff] %vm62_vm1, %v5029_v35  ;;  %v4606_v45 = vld [vmem:[#allocation5 + $0x140] ss:$8 sps:$4 sm:$0xff]   ;;  %v4611_v46 = vld [vmem:[#allocation5 + $0x74] ss:$8 sps:$4 sm:$0xff]  }
  0x38   :  { %82 = vst [vmem:[#allocation4 + $0x10] sm:$0xff] %v5029_v35  ;;  %83 = vst.msk [vmem:[#allocation4 + $0x18] sm:$0xff] %vm62_vm1, %v5029_v35  ;;  %v4614_v47 = vld [vmem:[#allocation5 + $0x154] ss:$8 sps:$4 sm:$0xff]   ;;  %v4609_v48 = vld [vmem:[#allocation5 + $0x70] ss:$8 sps:$4 sm:$0xff]  }
  0x39   :  { %84 = vst [vmem:[#allocation4 + $0x20] sm:$0xff] %v5029_v35  ;;  %85 = vst.msk [vmem:[#allocation4 + $0x28] sm:$0xff] %vm62_vm1, %v5029_v35  ;;  %v4612_v49 = vld [vmem:[#allocation5 + $0x150] ss:$8 sps:$4 sm:$0xff]   ;;  %v4617_v50 = vld [vmem:[#allocation5 + $0x84] ss:$8 sps:$4 sm:$0xff]  }
  0x3a   :  { %86 = vst [vmem:[#allocation4 + $0x30] sm:$0xff] %v5029_v35  ;;  %87 = vst.msk [vmem:[#allocation4 + $0x38] sm:$0xff] %vm62_vm1, %v5029_v35  ;;  %v4620_v51 = vld [vmem:[#allocation5 + $0x164] ss:$8 sps:$4 sm:$0xff]   ;;  %v4615_v52 = vld [vmem:[#allocation5 + $0x80] ss:$8 sps:$4 sm:$0xff]  }
  0x3b   :  { %4122 = vmatmul.mubr.msk.bf16.vlgmr.msra.gmra.mrb[8].mxu0 %vm124_vm0, %v99_v6  ;;  %4127 = vmatmul.mubr.msk.bf16.vlgmr.msra.gmra.mrb[8].mxu1 %vm124_vm0, %v99_v6  ;;  %88 = vst [vmem:[#allocation4 + $0x40] sm:$0xff] %v5029_v35  ;;  %89 = vst.msk [vmem:[#allocation4 + $0x48] sm:$0xff] %vm62_vm1, %v5029_v35  ;;  %v4618_v53 = vld [vmem:[#allocation5 + $0x160] ss:$8 sps:$4 sm:$0xff]   ;;  %v4623_v54 = vld [vmem:[#allocation5 + $0x94] ss:$8 sps:$4 sm:$0xff]  }
  0x3c   :  { %763 = vmatpush1.bf16.msra.mxu0 %v4564_v17  ;;  %794 = vmatprep.mubr.bf16.mxu0 %v5028_v0  ;;  %90 = vst [vmem:[#allocation4 + $0x50] sm:$0xff] %v5029_v35  ;;  %91 = vst.msk [vmem:[#allocation4 + $0x58] sm:$0xff] %vm62_vm1, %v5029_v35  ;;  %v4626_v55 = vld [vmem:[#allocation5 + $0x174] ss:$8 sps:$4 sm:$0xff]   ;;  %v4621_v56 = vld [vmem:[#allocation5 + $0x90] ss:$8 sps:$4 sm:$0xff]  }
  0x3d   :  { %1244 = vmatprep.subr.bf16.mxu0 %v4572_v19  ;;  %1027 = vmatpush1.bf16.msra.mxu1 %v4567_v18  ;;  %92 = vst [vmem:[#allocation4 + $0x60] sm:$0xff] %v5029_v35  ;;  %93 = vst.msk [vmem:[#allocation4 + $0x68] sm:$0xff] %vm62_vm1, %v5029_v35  ;;  %v4624_v57 = vld [vmem:[#allocation5 + $0x170] ss:$8 sps:$4 sm:$0xff]   ;;  %v4629_v58 = vld [vmem:[#allocation5 + $0xa4] ss:$8 sps:$4 sm:$0xff]  }
  0x3e   :  { %1028 = vmatprep.subr.bf16.mxu1 %v4575_v20  ;;  %94 = vst [vmem:[#allocation4 + $0x70] sm:$0xff] %v5029_v35  ;;  %95 = vst.msk [vmem:[#allocation4 + $0x78] sm:$0xff] %vm62_vm1, %v5029_v35  ;;  %v4632_v59 = vld [vmem:[#allocation5 + $0x184] ss:$8 sps:$4 sm:$0xff]   ;;  %v4627_v60 = vld [vmem:[#allocation5 + $0xa0] ss:$8 sps:$4 sm:$0xff]  }
  0x3f   :  { %96 = vst [vmem:[#allocation4 + $0x80] sm:$0xff] %v5029_v35  ;;  %97 = vst.msk [vmem:[#allocation4 + $0x88] sm:$0xff] %vm62_vm1, %v5029_v35  ;;  %v4630_v61 = vld [vmem:[#allocation5 + $0x180] ss:$8 sps:$4 sm:$0xff]   ;;  %v4635_v62 = vld [vmem:[#allocation5 + $0xb4] ss:$8 sps:$4 sm:$0xff]  }
  0x40   :  { %68 = vst.msk [vmem:[#allocation2 + $0x28] sm:$0x3] %vm67_vm2, %v5029_v35  ;;  %v4638_v63 = vld [vmem:[#allocation5 + $0x194] ss:$8 sps:$4 sm:$0xff]   ;;  %v4633_v1 = vld [vmem:[#allocation5 + $0xb0] ss:$8 sps:$4 sm:$0xff]  }
  0x41   :  { %1029 = vmatpush1.bf16.msra.mxu1 %v4573_v21  ;;  %v4636_v2 = vld [vmem:[#allocation5 + $0x190] ss:$8 sps:$4 sm:$0xff]   ;;  %v4639_v3 = vld [vmem:[#allocation5 + $0xc0] ss:$8 sps:$4 sm:$0xff]   ;;  %v4641_v4 = vld [vmem:[#allocation5 + $0xc4] ss:$8 sps:$4 sm:$0xff]  }
  0x42   :  { %1030 = vmatprep.subr.bf16.mxu1 %v4581_v22  ;;  %v4642_v5 = vld [vmem:[#allocation5 + $0x1a0] ss:$8 sps:$4 sm:$0xff]   ;;  %v4645_v7 = vld [vmem:[#allocation5 + $0xd0] ss:$8 sps:$4 sm:$0xff]   ;;  %v4647_v8 = vld [vmem:[#allocation5 + $0xd4] ss:$8 sps:$4 sm:$0xff]  }
  0x43   :  { %4132 = vmatmul.mubr.msk.bf16.vlgmr.msra.gmra.mrb[12].mxu0 %vm124_vm0, %v99_v6  ;;  %v4644_v6 = vld [vmem:[#allocation5 + $0x1a4] ss:$8 sps:$4 sm:$0xff]   ;;  %v4648_v9 = vld [vmem:[#allocation5 + $0x1b0] ss:$8 sps:$4 sm:$0xff]   ;;  %v4650_v10 = vld [vmem:[#allocation5 + $0x1b4] ss:$8 sps:$4 sm:$0xff]  }
  0x44   :  { %1245 = vmatpush1.bf16.msra.mxu0 %v4570_v23  ;;  %v4653_v11 = vld [vmem:[#allocation5 + $0x1c4] ss:$8 sps:$4 sm:$0xff]   ;;  %v5213_v15 = vsub.s32 0, %v105_v14  ;;  %v102_v16 = vld [vmem:[%s5855_s5] sm:$0x3]  ;;  %v5218_v17 = vsub.s32 1, %v105_v14 }
  0x45   :  { %1246 = vmatprep.subr.bf16.mxu0 %v4578_v24  ;;  %1031 = vmatpush1.bf16.msra.mxu1 %v4579_v25  ;;  %v4656_v12 = vld [vmem:[#allocation5 + $0x2a4] ss:$8 sps:$4 sm:$0xff]   ;;  %v215_v18 = vld [vmem:[%s5855_s5] sm:$0x3]  ;;  %v5030_v19 = vmov 1966171168  }
  0x46   :  { %1032 = vmatprep.subr.bf16.mxu1 %v4587_v29  ;;  %v179_v20 = vunpack.c.l.s4 %v5030_v19  ;;  %v107_v21 = vrot.slane %v102_v16, %v5213_v15  ;;  %v220_v22 = vrot.slane %v215_v18, %v5213_v15  ;;  %v111_v23 = vrot.slane %v102_v16, %v5218_v17 }
  0x47   :  { %v224_v24 = vrot.slane %v215_v18, %v5218_v17  ;;  %vm5245_vm7 = vcmp.lt.s32.totalorder %v104_v13, 224 }
  0x48   :  { %1247 = vmatpush1.bf16.msra.mxu0 %v4576_v26  ;;  %v180_v25 = vunpack.c.0.s8 %v179_v20 }
  0x49   :  { %1248 = vmatprep.subr.bf16.mxu0 %v4584_v27  ;;  %1033 = vmatpush1.bf16.msra.mxu1 %v4585_v31 }
  0x4a   :  { %1034 = vmatprep.subr.bf16.mxu1 %v4593_v33 }
  0x4c   :  { %1249 = vmatpush1.bf16.msra.mxu0 %v4582_v28 }
  0x4d   :  { %1250 = vmatprep.subr.bf16.mxu0 %v4590_v30  ;;  %1035 = vmatpush1.bf16.msra.mxu1 %v4591_v36  ;;  %v320_v36 = vld [vmem:[%s5855_s5] sm:$0x3] }
  0x4e   :  { %1036 = vmatprep.subr.bf16.mxu1 %v4599_v38 }
  0x50   :  { %1251 = vmatpush1.bf16.msra.mxu0 %v4588_v32 }
  0x51   :  { %1252 = vmatprep.subr.bf16.mxu0 %v4596_v34  ;;  %1037 = vmatpush1.bf16.msra.mxu1 %v4597_v40 }
  0x52   :  { %1038 = vmatprep.subr.bf16.mxu1 %v4605_v42 }
  0x54   :  { %1253 = vmatpush1.bf16.msra.mxu0 %v4594_v37  ;;  %v425_v37 = vld [vmem:[%s5855_s5] sm:$0x3] }
  0x55   :  { %1254 = vmatprep.subr.bf16.mxu0 %v4602_v39  ;;  %1039 = vmatpush1.bf16.msra.mxu1 %v4603_v44  ;;  %v5233_v39 = vsub.s32 %v180_v25, %v105_v14 }
  0x56   :  { %1040 = vmatprep.subr.bf16.mxu1 %v4611_v46  ;;  %v325_v46 = vrot.slane %v320_v36, %v5213_v15 }
  0x58   :  { %1255 = vmatpush1.bf16.msra.mxu0 %v4600_v41 }
  0x59   :  { %1256 = vmatprep.subr.bf16.mxu0 %v4608_v43  ;;  %1041 = vmatpush1.bf16.msra.mxu1 %v4609_v48  ;;  %v530_v48 = vld [vmem:[%s5855_s5] sm:$0x3] }
  0x5a   :  { %1042 = vmatprep.subr.bf16.mxu1 %v4617_v50 }
  0x5c   :  { %1257 = vmatpush1.bf16.msra.mxu0 %v4606_v45 }
  0x5d   :  { %1258 = vmatprep.subr.bf16.mxu0 %v4614_v47  ;;  %1043 = vmatpush1.bf16.msra.mxu1 %v4615_v52  ;;  %v430_v47 = vrot.slane %v425_v37, %v5213_v15  ;;  %v329_v52 = vrot.slane %v320_v36, %v5218_v17 }
  0x5e   :  { %1044 = vmatprep.subr.bf16.mxu1 %v4623_v54 }
  0x60   :  { %1259 = vmatpush1.bf16.msra.mxu0 %v4612_v49  ;;  %v635_v49 = vld [vmem:[%s5855_s5] sm:$0x3] }
  0x61   :  { %1260 = vmatprep.subr.bf16.mxu0 %v4620_v51  ;;  %1045 = vmatpush1.bf16.msra.mxu1 %v4621_v56  ;;  %v4657_v56 = vld [vmem:[#allocation5 + $0x1d0] ss:$8 sps:$4 sm:$0xff]  }
  0x62   :  { %1046 = vmatprep.subr.bf16.mxu1 %v4629_v58 }
  0x64   :  { %1261 = vmatpush1.bf16.msra.mxu0 %v4618_v53  ;;  %v434_v53 = vrot.slane %v425_v37, %v5218_v17 }
  0x65   :  { %1262 = vmatprep.subr.bf16.mxu0 %v4626_v55  ;;  %1047 = vmatpush1.bf16.msra.mxu1 %v4627_v60  ;;  %v535_v60 = vrot.slane %v530_v48, %v5213_v15 }
  0x66   :  { %1048 = vmatprep.subr.bf16.mxu1 %v4635_v62 }
  0x68   :  { %1263 = vmatpush1.bf16.msra.mxu0 %v4624_v57 }
  0x69   :  { %1264 = vmatprep.subr.bf16.mxu0 %v4632_v59  ;;  %1049 = vmatpush1.bf16.msra.mxu1 %v4633_v1 }
  0x6a   :  { %1050 = vmatprep.subr.bf16.mxu1 %v4641_v4  ;;  %v539_v4 = vrot.slane %v530_v48, %v5218_v17 }
  0x6c   :  { %1265 = vmatpush1.bf16.msra.mxu0 %v4630_v61  ;;  %v640_v61 = vrot.slane %v635_v49, %v5213_v15 }
  0x6d   :  { %1266 = vmatprep.subr.bf16.mxu0 %v4638_v63  ;;  %1051 = vmatpush1.bf16.msra.mxu1 %v4639_v3 }
  0x6e   :  { %1052 = vmatprep.subr.bf16.mxu1 %v4647_v8 }
  0x70   :  { %1267 = vmatpush1.bf16.msra.mxu0 %v4636_v2 }
  0x71   :  { %1268 = vmatprep.subr.bf16.mxu0 %v4644_v6  ;;  %1053 = vmatpush1.bf16.msra.mxu1 %v4645_v7 }
  0x72   :  { %1464 = vmatprep.subr.bf16.mxu1 %v4653_v11 }
  0x74   :  { %1269 = vmatpush1.bf16.msra.mxu0 %v4642_v5 }
  0x75   :  { %1270 = vmatprep.subr.bf16.mxu0 %v4650_v10  ;;  %v644_v10 = vrot.slane %v635_v49, %v5218_v17 }
  0x78   :  { %1271 = vmatpush1.bf16.msra.mxu0 %v4648_v9 }
  0x79   :  { %1684 = vmatprep.subr.bf16.mxu0 %v4656_v12 }
  0xfe   :  { %v162_v26 = vpop.f32.mrb[0].mxu0  ;;  %v271_v27 = vpop.f32.mrb[0].mxu1 }
  0xff   :  { %v163_v28 = vadd.f32 %v162_v26, %v107_v21  ;;  %v164_v29 = vpop.f32.mrb[1].mxu0  ;;  %v272_v30 = vadd.f32 %v271_v27, %v220_v22  ;;  %v273_v31 = vpop.f32.mrb[1].mxu1 }
 0x100   :  { %v165_v32 = vadd.f32 %v164_v29, %v111_v23  ;;  %v166_v33 = vpop.f32.mrb[2].mxu0  ;;  %v274_v34 = vadd.f32 %v273_v31, %v224_v24  ;;  %v275_v35 = vpop.f32.mrb[2].mxu1  ;;  %v740_v29 = vld [vmem:[%s5855_s5] sm:$0x3] }
 0x101   :  { %vm169_vm3 = vcmp.ge.f32.partialorder %v163_v28, 0.0  ;;  %v171_v38 = vmul.f32 0.2, %v163_v28  ;;  %v167_v40 = vpop.f32.mrb[3].mxu0  ;;  %vm278_vm4 = vcmp.ge.f32.partialorder %v272_v30, 0.0  ;;  %v276_v41 = vpop.f32.mrb[3].mxu1 }
 0x102   :  { %vm170_vm5 = vcmp.ge.f32.partialorder %v165_v32, 0.0  ;;  %v172_v42 = vmul.f32 0.2, %v165_v32  ;;  %v280_v43 = vmul.f32 0.2, %v272_v30  ;;  %vm279_vm6 = vcmp.ge.f32.partialorder %v274_v34, 0.0 }
 0x103   :  { %v173_v44 = vsel %vm169_vm3, %v163_v28, %v171_v38  ;;  %v281_v45 = vmul.f32 0.2, %v274_v34 }
 0x104   :  { %v174_v50 = vsel %vm170_vm5, %v165_v32, %v172_v42  ;;  %v282_v51 = vsel %vm278_vm4, %v272_v30, %v280_v43  ;;  %vm78_vm4 = vcmask 781312  }
 0x105   :  { %v177_v54 = vcombine.low %v173_v44, %v174_v50  ;;  %v283_v55 = vsel %vm279_vm6, %v274_v34, %v281_v45  ;;  %v745_v44 = vrot.slane %v740_v29, %v5213_v15  ;;  %v749_v45 = vrot.slane %v740_v29, %v5218_v17 }
 0x106   :  { %v286_v57 = vcombine.low %v282_v51, %v283_v55  ;;  %v376_v58 = vpop.f32.mrb[4].mxu0  ;;  %v481_v59 = vpop.f32.mrb[4].mxu1  ;;  %vm1770_vm6 = vcmask 785409  }
 0x107   :  { %v184_v62 = vrot.slane %v177_v54, %v5233_v39  ;;  %v377_v63 = vadd.f32 %v376_v58, %v325_v46  ;;  %v378_v1 = vpop.f32.mrb[5].mxu0  ;;  %v482_v2 = vadd.f32 %v481_v59, %v430_v47  ;;  %v483_v3 = vpop.f32.mrb[5].mxu1 }
 0x108   :  { %v293_v5 = vrot.slane %v286_v57, %v5233_v39  ;;  %v379_v6 = vadd.f32 %v378_v1, %v329_v52  ;;  %v380_v7 = vpop.f32.mrb[6].mxu0  ;;  %v484_v8 = vadd.f32 %v483_v3, %v434_v53  ;;  %v485_v9 = vpop.f32.mrb[6].mxu1 }
 0x109   :  { %v191_v11 = vrot.slane %v184_v62, %v5233_v39  ;;  %v200_v12 = vcombine.high %v184_v62, %v184_v62  ;;  %vm383_vm8 = vcmp.ge.f32.partialorder %v377_v63, 0.0  ;;  %v385_v13 = vmul.f32 0.2, %v377_v63  ;;  %v381_v14 = vpop.f32.mrb[7].mxu0  ;;  %v486_v16 = vpop.f32.mrb[7].mxu1 }
 0x10a   :  { %v300_v18 = vrot.slane %v293_v5, %v5233_v39  ;;  %v305_v19 = vcombine.high %v293_v5, %v293_v5  ;;  %vm384_vm9 = vcmp.ge.f32.partialorder %v379_v6, 0.0  ;;  %v386_v20 = vmul.f32 0.2, %v379_v6 }
 0x10b   :  { %198 = vst.msk [vmem:[#allocation2 + $0x1] ss:$8 sm:$0x3] %vm5245_vm7, %v191_v11  ;;  %v207_v21 = vrot.slane %v200_v12, %v5233_v39  ;;  %v387_v22 = vsel %vm383_vm8, %v377_v63, %v385_v13  ;;  %vm488_vm10 = vcmp.ge.f32.partialorder %v482_v2, 0.0  ;;  %v490_v23 = vmul.f32 0.2, %v482_v2 }
 0x10c   :  { %303 = vst.msk [vmem:[#allocation2 + $0x2] ss:$8 sm:$0x3] %vm5245_vm7, %v300_v18  ;;  %v312_v24 = vrot.slane %v305_v19, %v5233_v39  ;;  %v388_v25 = vsel %vm384_vm9, %v379_v6, %v386_v20  ;;  %vm489_vm11 = vcmp.ge.f32.partialorder %v484_v8, 0.0  ;;  %v491_v26 = vmul.f32 0.2, %v484_v8 }
 0x10d   :  { %210 = vst.msk [vmem:[#allocation2 + $0x12] ss:$8 sm:$0x3] %vm5245_vm7, %v207_v21  ;;  %v391_v27 = vcombine.low %v387_v22, %v388_v25  ;;  %v492_v28 = vsel %vm488_vm10, %v482_v2, %v490_v23  ;;  %vm1776_vm8 = vcmask 1046528  }
 0x10e   :  { %315 = vst.msk [vmem:[#allocation2 + $0x13] ss:$8 sm:$0x3] %vm5245_vm7, %v312_v24  ;;  %v493_v30 = vsel %vm489_vm11, %v484_v8, %v491_v26  ;;  %v586_v31 = vpop.f32.mrb[8].mxu0  ;;  %v691_v32 = vpop.f32.mrb[8].mxu1  ;;  %vm1860_vm11 = vcmask 785411  }
 0x10f   :  { %v398_v33 = vrot.slane %v391_v27, %v5233_v39  ;;  %v496_v34 = vcombine.low %v492_v28, %v493_v30  ;;  %v587_v35 = vadd.f32 %v586_v31, %v535_v60  ;;  %v692_v36 = vadd.f32 %v691_v32, %v640_v61  ;;  %v588_v37 = vpop.f32.mrb[9].mxu0  ;;  %v693_v38 = vpop.f32.mrb[9].mxu1 }
 0x110   :  { %v589_v40 = vadd.f32 %v588_v37, %v539_v4  ;;  %v694_v41 = vadd.f32 %v693_v38, %v644_v10  ;;  %v590_v42 = vpop.f32.mrb[10].mxu0  ;;  %v695_v43 = vpop.f32.mrb[10].mxu1  ;;  %v4662_v38 = vld [vmem:[#allocation5 + $0x2b4] ss:$8 sps:$4 sm:$0xff]  }
 0x111   :  { %v405_v46 = vrot.slane %v398_v33, %v5233_v39  ;;  %v410_v47 = vcombine.high %v398_v33, %v398_v33  ;;  %v503_v48 = vrot.slane %v496_v34, %v5233_v39  ;;  %vm593_vm12 = vcmp.ge.f32.partialorder %v587_v35, 0.0  ;;  %v591_v49 = vpop.f32.mrb[11].mxu0  ;;  %v696_v50 = vpop.f32.mrb[11].mxu1  ;;  %v4651_v33 = vld [vmem:[#allocation5 + $0x1c0] ss:$8 sps:$4 sm:$0xff]  }
 0x112   :  { %v595_v51 = vmul.f32 0.2, %v587_v35  ;;  %vm698_vm13 = vcmp.ge.f32.partialorder %v692_v36, 0.0  ;;  %v700_v52 = vmul.f32 0.2, %v692_v36  ;;  %vm594_vm14 = vcmp.ge.f32.partialorder %v589_v40, 0.0 }
 0x113   :  { %408 = vst.msk [vmem:[#allocation2 + $0x3] ss:$8 sm:$0x3] %vm5245_vm7, %v405_v46  ;;  %v417_v53 = vrot.slane %v410_v47, %v5233_v39  ;;  %v510_v54 = vrot.slane %v503_v48, %v5233_v39  ;;  %v515_v55 = vcombine.high %v503_v48, %v503_v48  ;;  %v596_v57 = vmul.f32 0.2, %v589_v40 }
 0x114   :  { %v597_v58 = vsel %vm593_vm12, %v587_v35, %v595_v51  ;;  %v702_v59 = vsel %vm698_vm13, %v692_v36, %v700_v52  ;;  %vm699_vm15 = vcmp.ge.f32.partialorder %v694_v41, 0.0  ;;  %v701_v60 = vmul.f32 0.2, %v694_v41  ;;  %v4654_v34 = vld [vmem:[#allocation5 + $0x2a0] ss:$8 sps:$4 sm:$0xff]  }
 0x115   :  { %420 = vst.msk [vmem:[#allocation2 + $0x14] ss:$8 sm:$0x3] %vm5245_vm7, %v417_v53  ;;  %513 = vst.msk [vmem:[#allocation2 + $0x4] ss:$8 sm:$0x3] %vm5245_vm7, %v510_v54  ;;  %v522_v61 = vrot.slane %v515_v55, %v5233_v39  ;;  %v598_v62 = vsel %vm594_vm14, %v589_v40, %v596_v57 }
 0x116   :  { %v601_v63 = vcombine.low %v597_v58, %v598_v62  ;;  %v703_v1 = vsel %vm699_vm15, %v694_v41, %v701_v60  ;;  %v796_v2 = vpop.f32.mrb[12].mxu0  ;;  %v4660_v40 = vld [vmem:[#allocation5 + $0x2b0] ss:$8 sps:$4 sm:$0xff]   ;;  %v4665_v41 = vld [vmem:[#allocation5 + $0x1e4] ss:$8 sps:$4 sm:$0xff]   ;;  %vm1814_vm12 = vcmask 785410  }
 0x117   :  { %525 = vst.msk [vmem:[#allocation2 + $0x15] ss:$8 sm:$0x3] %vm5245_vm7, %v522_v61  ;;  %v706_v3 = vcombine.low %v702_v59, %v703_v1  ;;  %v797_v4 = vadd.f32 %v796_v2, %v745_v44  ;;  %v798_v5 = vpop.f32.mrb[13].mxu0  ;;  %v4668_v42 = vld [vmem:[#allocation5 + $0x2c4] ss:$8 sps:$4 sm:$0xff]  }
 0x118   :  { %v608_v6 = vrot.slane %v601_v63, %v5233_v39  ;;  %v799_v7 = vadd.f32 %v798_v5, %v749_v45  ;;  %v800_v8 = vpop.f32.mrb[14].mxu0  ;;  %v4663_v44 = vld [vmem:[#allocation5 + $0x1e0] ss:$8 sps:$4 sm:$0xff]   ;;  %v4671_v47 = vld [vmem:[#allocation5 + $0x1f4] ss:$8 sps:$4 sm:$0xff]   ;;  %vm1817_vm13 = vcmask 778240  }
 0x119   :  { %v713_v9 = vrot.slane %v706_v3, %v5233_v39  ;;  %vm803_vm0 = vcmp.ge.f32.partialorder %v797_v4, 0.0  ;;  %v805_v10 = vmul.f32 0.2, %v797_v4  ;;  %v801_v11 = vpop.f32.mrb[15].mxu0  ;;  %v4666_v45 = vld [vmem:[#allocation5 + $0x2c0] ss:$8 sps:$4 sm:$0xff]  }
 0x11a   :  { %v615_v12 = vrot.slane %v608_v6, %v5233_v39  ;;  %v620_v13 = vcombine.high %v608_v6, %v608_v6  ;;  %vm804_vm3 = vcmp.ge.f32.partialorder %v799_v7, 0.0  ;;  %v806_v14 = vmul.f32 0.2, %v799_v7  ;;  %v4674_v48 = vld [vmem:[#allocation5 + $0x2d4] ss:$8 sps:$4 sm:$0xff]  }
 0x11b   :  { %v720_v16 = vrot.slane %v713_v9, %v5233_v39  ;;  %v725_v18 = vcombine.high %v713_v9, %v713_v9  ;;  %v807_v19 = vsel %vm803_vm0, %v797_v4, %v805_v10  ;;  %v4669_v49 = vld [vmem:[#allocation5 + $0x1f0] ss:$8 sps:$4 sm:$0xff]   ;;  %v4677_v51 = vld [vmem:[#allocation5 + $0x204] ss:$8 sps:$4 sm:$0xff]   ;;  %v4675_v53 = vld [vmem:[#allocation5 + $0x200] ss:$8 sps:$4 sm:$0xff]  }
 0x11c   :  { %618 = vst.msk [vmem:[#allocation2 + $0x5] ss:$8 sm:$0x3] %vm5245_vm7, %v615_v12  ;;  %v627_v20 = vrot.slane %v620_v13, %v5233_v39  ;;  %v808_v21 = vsel %vm804_vm3, %v799_v7, %v806_v14  ;;  %v4672_v50 = vld [vmem:[#allocation5 + $0x2d0] ss:$8 sps:$4 sm:$0xff]  }
 0x11d   :  { %723 = vst.msk [vmem:[#allocation2 + $0x6] ss:$8 sm:$0x3] %vm5245_vm7, %v720_v16  ;;  %v732_v22 = vrot.slane %v725_v18, %v5233_v39  ;;  %v811_v23 = vcombine.low %v807_v19, %v808_v21  ;;  %v4680_v52 = vld [vmem:[#allocation5 + $0x2e4] ss:$8 sps:$4 sm:$0xff]  }
 0x11e   :  { %630 = vst.msk [vmem:[#allocation2 + $0x16] ss:$8 sm:$0x3] %vm5245_vm7, %v627_v20  ;;  %v4678_v54 = vld [vmem:[#allocation5 + $0x2e0] ss:$8 sps:$4 sm:$0xff]  }
 0x11f   :  { %735 = vst.msk [vmem:[#allocation2 + $0x17] ss:$8 sm:$0x3] %vm5245_vm7, %v732_v22  ;;  %v818_v24 = vrot.slane %v811_v23, %v5233_v39  ;;  %v4683_v55 = vld [vmem:[#allocation5 + $0x214] ss:$8 sps:$4 sm:$0xff]  }
 0x120   :  { %v4686_v57 = vld [vmem:[#allocation5 + $0x2f4] ss:$8 sps:$4 sm:$0xff]   ;;  %v4681_v58 = vld [vmem:[#allocation5 + $0x210] ss:$8 sps:$4 sm:$0xff]   ;;  %v4689_v60 = vld [vmem:[#allocation5 + $0x224] ss:$8 sps:$4 sm:$0xff]  }
 0x121   :  { %v825_v25 = vrot.slane %v818_v24, %v5233_v39  ;;  %v830_v26 = vcombine.high %v818_v24, %v818_v24  ;;  %v4684_v59 = vld [vmem:[#allocation5 + $0x2f0] ss:$8 sps:$4 sm:$0xff]   ;;  %v4692_v61 = vld [vmem:[#allocation5 + $0x304] ss:$8 sps:$4 sm:$0xff]   ;;  %v4687_v62 = vld [vmem:[#allocation5 + $0x220] ss:$8 sps:$4 sm:$0xff]  }
 0x122   :  { %v4690_v63 = vld [vmem:[#allocation5 + $0x300] ss:$8 sps:$4 sm:$0xff]   ;;  %v4695_v1 = vld [vmem:[#allocation5 + $0x234] ss:$8 sps:$4 sm:$0xff]   ;;  %v4693_v3 = vld [vmem:[#allocation5 + $0x230] ss:$8 sps:$4 sm:$0xff]  }
 0x123   :  { %828 = vst.msk [vmem:[#allocation2 + $0x7] ss:$8 sm:$0x3] %vm5245_vm7, %v825_v25  ;;  %v837_v27 = vrot.slane %v830_v26, %v5233_v39  ;;  %v4659_v39 = vld [vmem:[#allocation5 + $0x1d4] ss:$8 sps:$4 sm:$0xff]  }
 0x124   :  { %v4698_v2 = vld [vmem:[#allocation5 + $0x314] ss:$8 sps:$4 sm:$0xff]   ;;  %v4696_v4 = vld [vmem:[#allocation5 + $0x310] ss:$8 sps:$4 sm:$0xff]   ;;  %v4701_v5 = vld [vmem:[#allocation5 + $0x244] ss:$8 sps:$4 sm:$0xff]  }
 0x125   :  { %840 = vst.msk [vmem:[#allocation2 + $0x20] ss:$8 sm:$0x3] %vm5245_vm7, %v837_v27  ;;  %v4704_v6 = vld [vmem:[#allocation5 + $0x324] ss:$8 sps:$4 sm:$0xff]  }
 0x126   :  { %v845_v28 = vld [vmem:[#allocation2 + $0x18] sm:$0xff]  ;;  %v844_v31 = vld [vmem:[#allocation2 + $0x10] sm:$0xff]  ;;  %v4707_v9 = vld [vmem:[#allocation5 + $0x254] ss:$8 sps:$4 sm:$0xff]  }
 0x127   :  { %v4699_v7 = vld [vmem:[#allocation5 + $0x240] ss:$8 sps:$4 sm:$0xff]   ;;  %v4710_v10 = vld [vmem:[#allocation5 + $0x334] ss:$8 sps:$4 sm:$0xff]   ;;  %v4705_v11 = vld [vmem:[#allocation5 + $0x250] ss:$8 sps:$4 sm:$0xff]  }
 0x128   :  { %v4702_v8 = vld [vmem:[#allocation5 + $0x320] ss:$8 sps:$4 sm:$0xff]   ;;  %v4708_v12 = vld [vmem:[#allocation5 + $0x330] ss:$8 sps:$4 sm:$0xff]   ;;  %v4713_v13 = vld [vmem:[#allocation5 + $0x264] ss:$8 sps:$4 sm:$0xff]  }
 0x129   :  { %v4716_v14 = vld [vmem:[#allocation5 + $0x344] ss:$8 sps:$4 sm:$0xff]   ;;  %v4711_v16 = vld [vmem:[#allocation5 + $0x260] ss:$8 sps:$4 sm:$0xff]   ;;  %v4719_v19 = vld [vmem:[#allocation5 + $0x274] ss:$8 sps:$4 sm:$0xff]  }
 0x12a   :  { %v843_v29 = vld [vmem:[#allocation2 + $0x8] sm:$0xff]  ;;  %v842_v30 = vld [vmem:[#allocation2] sm:$0xff]  ;;  %v4714_v18 = vld [vmem:[#allocation5 + $0x340] ss:$8 sps:$4 sm:$0xff]  }
 0x12b   :  { %v849_v32 = vpack.c.bf16 %v845_v28, %v843_v29  ;;  %v5307_v35 = vpack.c.bf16 %v844_v31, %v842_v30  ;;  %v4722_v20 = vld [vmem:[#allocation5 + $0x354] ss:$8 sps:$4 sm:$0xff]   ;;  %v4717_v21 = vld [vmem:[#allocation5 + $0x270] ss:$8 sps:$4 sm:$0xff]   ;;  %v4725_v23 = vld [vmem:[#allocation5 + $0x284] ss:$8 sps:$4 sm:$0xff]  }
 0x12c   :  { %v847_v36 = vld [vmem:[#allocation2 + $0x28] sm:$0x3]  ;;  %v846_v43 = vld [vmem:[#allocation2 + $0x20] sm:$0x3]  ;;  %v4728_v24 = vld [vmem:[#allocation5 + $0x364] ss:$8 sps:$4 sm:$0xff]  }
 0x12d   :  { %4161 = vmatprep.mubr.msk.bf16.mxu1 %vm62_vm1, %v849_v32  ;;  %4191 = vmatprep.mubr.msk.bf16.mxu0 %vm62_vm1, %v849_v32  ;;  %v5311_v37 = vpack.c.bf16 %v847_v36, %v847_v36  ;;  %v5319_v46 = vpack.c.bf16 %v846_v43, %v846_v43  ;;  %v4720_v22 = vld [vmem:[#allocation5 + $0x350] ss:$8 sps:$4 sm:$0xff]   ;;  %v4723_v25 = vld [vmem:[#allocation5 + $0x280] ss:$8 sps:$4 sm:$0xff]   ;;  %v4731_v27 = vld [vmem:[#allocation5 + $0x294] ss:$8 sps:$4 sm:$0xff]  }
 0x12e   :  { %1059 = vmatmul.mubr.bf16.vlgmr.msra.gmra.mrb[12].mxu1 %v5307_v35  ;;  %1277 = vmatmul.mubr.bf16.vlgmr.msra.gmra.mrb[16].mxu0 %v5307_v35  ;;  %v4726_v26 = vld [vmem:[#allocation5 + $0x360] ss:$8 sps:$4 sm:$0xff]   ;;  %v4734_v28 = vld [vmem:[#allocation5 + $0x374] ss:$8 sps:$4 sm:$0xff]   ;;  %v4729_v29 = vld [vmem:[#allocation5 + $0x290] ss:$8 sps:$4 sm:$0xff]  }
 0x12f   :  { %1465 = vmatpush1.bf16.msra.mxu1 %v4651_v33  ;;  %1685 = vmatpush1.bf16.msra.mxu0 %v4654_v34  ;;  %v4732_v30 = vld [vmem:[#allocation5 + $0x370] ss:$8 sps:$4 sm:$0xff]   ;;  %v4735_v31 = vld [vmem:[#allocation7] ss:$8 sps:$4 sm:$0xff]   ;;  %v4740_v34 = vld [vmem:[#allocation7 + $0xe4] ss:$8 sps:$4 sm:$0xff]  }
 0x130   :  { %4162 = vmatprep.mubr.msk.bf16.mxu1 %vm62_vm1, %v5311_v37  ;;  %4192 = vmatprep.mubr.msk.bf16.mxu0 %vm62_vm1, %v5311_v37  ;;  %v4738_v33 = vld [vmem:[#allocation7 + $0xe0] ss:$8 sps:$4 sm:$0xff]   ;;  %v4743_v36 = vld [vmem:[#allocation7 + $0x14] ss:$8 sps:$4 sm:$0xff]  }
 0x131   :  { %1466 = vmatprep.subr.bf16.mxu1 %v4659_v39  ;;  %1686 = vmatprep.subr.bf16.mxu0 %v4662_v38  ;;  %v4746_v39 = vld [vmem:[#allocation7 + $0xf4] ss:$8 sps:$4 sm:$0xff]   ;;  %v4744_v38 = vld [vmem:[#allocation7 + $0xf0] ss:$8 sps:$4 sm:$0xff]  }
 0x132   :  { %v4758_v43 = vld [vmem:[#allocation7 + $0x114] ss:$8 sps:$4 sm:$0xff]  }
 0x133   :  { %1467 = vmatpush1.bf16.msra.mxu1 %v4657_v56  ;;  %1687 = vmatpush1.bf16.msra.mxu0 %v4660_v40  ;;  %v4749_v56 = vld [vmem:[#allocation7 + $0x24] ss:$8 sps:$4 sm:$0xff]   ;;  %v4747_v40 = vld [vmem:[#allocation7 + $0x20] ss:$8 sps:$4 sm:$0xff]  }
 0x134   :  { %1468 = vmatprep.subr.bf16.mxu1 %v4665_v41  ;;  %1688 = vmatprep.subr.bf16.mxu0 %v4668_v42  ;;  %v4750_v41 = vld [vmem:[#allocation7 + $0x100] ss:$8 sps:$4 sm:$0xff]   ;;  %v4755_v42 = vld [vmem:[#allocation7 + $0x34] ss:$8 sps:$4 sm:$0xff]  }
 0x136   :  { %1069 = vmatmul.mubr.bf16.gmra.mrb[16].mxu1 %v5319_v46  ;;  %1287 = vmatmul.mubr.bf16.gmra.mrb[20].mxu0 %v5319_v46 }
 0x137   :  { %1469 = vmatpush1.bf16.msra.mxu1 %v4663_v44  ;;  %1689 = vmatpush1.bf16.msra.mxu0 %v4666_v45  ;;  %v4753_v44 = vld [vmem:[#allocation7 + $0x30] ss:$8 sps:$4 sm:$0xff]  }
 0x138   :  { %4221 = vmatprep.mubr.msk.bf16.mxu1 %vm62_vm1, %v849_v32  ;;  %4251 = vmatprep.mubr.msk.bf16.mxu0 %vm62_vm1, %v849_v32  ;;  %v4737_v32 = vld [vmem:[#allocation7 + $0x4] ss:$8 sps:$4 sm:$0xff]   ;;  %v4756_v45 = vld [vmem:[#allocation7 + $0x110] ss:$8 sps:$4 sm:$0xff]  }
 0x139   :  { %1470 = vmatprep.subr.bf16.mxu1 %v4671_v47  ;;  %1690 = vmatprep.subr.bf16.mxu0 %v4674_v48  ;;  %v4764_v47 = vld [vmem:[#allocation7 + $0x124] ss:$8 sps:$4 sm:$0xff]   ;;  %v4759_v48 = vld [vmem:[#allocation7 + $0x40] ss:$8 sps:$4 sm:$0xff]  }
 0x13b   :  { %1471 = vmatpush1.bf16.msra.mxu1 %v4669_v49  ;;  %1691 = vmatpush1.bf16.msra.mxu0 %v4672_v50  ;;  %v4762_v49 = vld [vmem:[#allocation7 + $0x120] ss:$8 sps:$4 sm:$0xff]   ;;  %v4767_v50 = vld [vmem:[#allocation7 + $0x54] ss:$8 sps:$4 sm:$0xff]  }
 0x13c   :  { %1472 = vmatprep.subr.bf16.mxu1 %v4677_v51  ;;  %1692 = vmatprep.subr.bf16.mxu0 %v4680_v52  ;;  %v4770_v51 = vld [vmem:[#allocation7 + $0x134] ss:$8 sps:$4 sm:$0xff]   ;;  %v4765_v52 = vld [vmem:[#allocation7 + $0x50] ss:$8 sps:$4 sm:$0xff]  }
 0x13f   :  { %1473 = vmatpush1.bf16.msra.mxu1 %v4675_v53  ;;  %1693 = vmatpush1.bf16.msra.mxu0 %v4678_v54  ;;  %v4768_v53 = vld [vmem:[#allocation7 + $0x130] ss:$8 sps:$4 sm:$0xff]   ;;  %v4773_v54 = vld [vmem:[#allocation7 + $0x64] ss:$8 sps:$4 sm:$0xff]  }
 0x140   :  { %1474 = vmatprep.subr.bf16.mxu1 %v4683_v55  ;;  %1694 = vmatprep.subr.bf16.mxu0 %v4686_v57  ;;  %v4776_v55 = vld [vmem:[#allocation7 + $0x144] ss:$8 sps:$4 sm:$0xff]   ;;  %v4771_v57 = vld [vmem:[#allocation7 + $0x60] ss:$8 sps:$4 sm:$0xff]  }
 0x143   :  { %1475 = vmatpush1.bf16.msra.mxu1 %v4681_v58  ;;  %1695 = vmatpush1.bf16.msra.mxu0 %v4684_v59  ;;  %v4774_v58 = vld [vmem:[#allocation7 + $0x140] ss:$8 sps:$4 sm:$0xff]   ;;  %v4779_v59 = vld [vmem:[#allocation7 + $0x74] ss:$8 sps:$4 sm:$0xff]  }
 0x144   :  { %1476 = vmatprep.subr.bf16.mxu1 %v4689_v60  ;;  %1696 = vmatprep.subr.bf16.mxu0 %v4692_v61  ;;  %v4782_v60 = vld [vmem:[#allocation7 + $0x154] ss:$8 sps:$4 sm:$0xff]   ;;  %v4777_v61 = vld [vmem:[#allocation7 + $0x70] ss:$8 sps:$4 sm:$0xff]  }
 0x147   :  { %1477 = vmatpush1.bf16.msra.mxu1 %v4687_v62  ;;  %1697 = vmatpush1.bf16.msra.mxu0 %v4690_v63  ;;  %v4780_v62 = vld [vmem:[#allocation7 + $0x150] ss:$8 sps:$4 sm:$0xff]   ;;  %v4785_v63 = vld [vmem:[#allocation7 + $0x84] ss:$8 sps:$4 sm:$0xff]  }
 0x148   :  { %1478 = vmatprep.subr.bf16.mxu1 %v4695_v1  ;;  %1698 = vmatprep.subr.bf16.mxu0 %v4698_v2  ;;  %v4788_v1 = vld [vmem:[#allocation7 + $0x164] ss:$8 sps:$4 sm:$0xff]   ;;  %v4783_v2 = vld [vmem:[#allocation7 + $0x80] ss:$8 sps:$4 sm:$0xff]  }
 0x14b   :  { %1479 = vmatpush1.bf16.msra.mxu1 %v4693_v3  ;;  %1699 = vmatpush1.bf16.msra.mxu0 %v4696_v4  ;;  %v4786_v3 = vld [vmem:[#allocation7 + $0x160] ss:$8 sps:$4 sm:$0xff]   ;;  %v4791_v4 = vld [vmem:[#allocation7 + $0x94] ss:$8 sps:$4 sm:$0xff]  }
 0x14c   :  { %1480 = vmatprep.subr.bf16.mxu1 %v4701_v5  ;;  %1700 = vmatprep.subr.bf16.mxu0 %v4704_v6  ;;  %v4794_v5 = vld [vmem:[#allocation7 + $0x174] ss:$8 sps:$4 sm:$0xff]   ;;  %v4789_v6 = vld [vmem:[#allocation7 + $0x90] ss:$8 sps:$4 sm:$0xff]  }
 0x14f   :  { %1481 = vmatpush1.bf16.msra.mxu1 %v4699_v7  ;;  %1701 = vmatpush1.bf16.msra.mxu0 %v4702_v8  ;;  %v4792_v7 = vld [vmem:[#allocation7 + $0x170] ss:$8 sps:$4 sm:$0xff]   ;;  %v4797_v8 = vld [vmem:[#allocation7 + $0xa4] ss:$8 sps:$4 sm:$0xff]  }
 0x150   :  { %1482 = vmatprep.subr.bf16.mxu1 %v4707_v9  ;;  %1702 = vmatprep.subr.bf16.mxu0 %v4710_v10  ;;  %v4800_v9 = vld [vmem:[#allocation7 + $0x184] ss:$8 sps:$4 sm:$0xff]   ;;  %v4795_v10 = vld [vmem:[#allocation7 + $0xa0] ss:$8 sps:$4 sm:$0xff]  }
 0x153   :  { %1483 = vmatpush1.bf16.msra.mxu1 %v4705_v11  ;;  %1703 = vmatpush1.bf16.msra.mxu0 %v4708_v12  ;;  %v4798_v11 = vld [vmem:[#allocation7 + $0x180] ss:$8 sps:$4 sm:$0xff]   ;;  %v4803_v12 = vld [vmem:[#allocation7 + $0xb4] ss:$8 sps:$4 sm:$0xff]  }
 0x154   :  { %1484 = vmatprep.subr.bf16.mxu1 %v4713_v13  ;;  %1704 = vmatprep.subr.bf16.mxu0 %v4716_v14  ;;  %v4806_v13 = vld [vmem:[#allocation7 + $0x194] ss:$8 sps:$4 sm:$0xff]   ;;  %v4801_v14 = vld [vmem:[#allocation7 + $0xb0] ss:$8 sps:$4 sm:$0xff]  }
 0x157   :  { %1485 = vmatpush1.bf16.msra.mxu1 %v4711_v16  ;;  %1705 = vmatpush1.bf16.msra.mxu0 %v4714_v18  ;;  %v4804_v16 = vld [vmem:[#allocation7 + $0x190] ss:$8 sps:$4 sm:$0xff]   ;;  %v4809_v18 = vld [vmem:[#allocation7 + $0xc4] ss:$8 sps:$4 sm:$0xff]  }
 0x158   :  { %1486 = vmatprep.subr.bf16.mxu1 %v4719_v19  ;;  %1706 = vmatprep.subr.bf16.mxu0 %v4722_v20  ;;  %v4812_v19 = vld [vmem:[#allocation7 + $0x1a4] ss:$8 sps:$4 sm:$0xff]   ;;  %v4807_v20 = vld [vmem:[#allocation7 + $0xc0] ss:$8 sps:$4 sm:$0xff]  }
 0x15b   :  { %1487 = vmatpush1.bf16.msra.mxu1 %v4717_v21  ;;  %1707 = vmatpush1.bf16.msra.mxu0 %v4720_v22  ;;  %v4810_v21 = vld [vmem:[#allocation7 + $0x1a0] ss:$8 sps:$4 sm:$0xff]   ;;  %v4815_v22 = vld [vmem:[#allocation7 + $0xd4] ss:$8 sps:$4 sm:$0xff]  }
 0x15c   :  { %1488 = vmatprep.subr.bf16.mxu1 %v4725_v23  ;;  %1708 = vmatprep.subr.bf16.mxu0 %v4728_v24  ;;  %v4818_v23 = vld [vmem:[#allocation7 + $0x1b4] ss:$8 sps:$4 sm:$0xff]   ;;  %v4813_v24 = vld [vmem:[#allocation7 + $0xd0] ss:$8 sps:$4 sm:$0xff]  }
 0x15f   :  { %1489 = vmatpush1.bf16.msra.mxu1 %v4723_v25  ;;  %1709 = vmatpush1.bf16.msra.mxu0 %v4726_v26  ;;  %v4975_v25 = vld [vmem:[#allocation3] sm:$0xff]  ;;  %v4816_v26 = vld [vmem:[#allocation7 + $0x1b0] ss:$8 sps:$4 sm:$0xff]  }
 0x160   :  { %1490 = vmatprep.subr.bf16.mxu1 %v4731_v27  ;;  %1710 = vmatprep.subr.bf16.mxu0 %v4734_v28  ;;  %79 = vst.msk [vmem:[#allocation3 + $0x48] sm:$0xf] %vm78_vm4, %v4975_v25  ;;  %v4821_v27 = vld [vmem:[#allocation7 + $0x1c4] ss:$8 sps:$4 sm:$0xff]  }
 0x161   :  { %v4824_v28 = vld [vmem:[#allocation7 + $0x2a4] ss:$8 sps:$4 sm:$0xff]  }
 0x163   :  { %1491 = vmatpush1.bf16.msra.mxu1 %v4729_v29  ;;  %1711 = vmatpush1.bf16.msra.mxu0 %v4732_v30  ;;  %v1743_v29 = vld [vmem:[%s5856_s6] sm:$0x3] }
 0x164   :  { %2120 = vmatprep.subr.bf16.mxu1 %v4737_v32  ;;  %2350 = vmatprep.subr.bf16.mxu0 %v4740_v34 }
 0x166   :  { %1497 = vmatmul.mubr.bf16.vlgmr.msra.gmra.mrb[20].mxu1 %v5307_v35  ;;  %1717 = vmatmul.mubr.bf16.vlgmr.msra.gmra.mrb[24].mxu0 %v5307_v35  ;;  %v4741_v35 = vld [vmem:[#allocation7 + $0x10] ss:$8 sps:$4 sm:$0xff]  }
 0x167   :  { %4222 = vmatprep.mubr.msk.bf16.mxu1 %vm62_vm1, %v5311_v37  ;;  %4252 = vmatprep.mubr.msk.bf16.mxu0 %vm62_vm1, %v5311_v37  ;;  %v4752_v37 = vld [vmem:[#allocation7 + $0x104] ss:$8 sps:$4 sm:$0xff]  }
 0x168   :  { %2121 = vmatpush1.bf16.msra.mxu1 %v4735_v31  ;;  %2351 = vmatpush1.bf16.msra.mxu0 %v4738_v33  ;;  %v1748_v33 = vrot.slane %v1743_v29, %v5213_v15 }
 0x169   :  { %2122 = vmatprep.subr.bf16.mxu1 %v4743_v36  ;;  %2352 = vmatprep.subr.bf16.mxu0 %v4746_v39 }
 0x16c   :  { %2123 = vmatpush1.bf16.msra.mxu1 %v4741_v35  ;;  %2353 = vmatpush1.bf16.msra.mxu0 %v4744_v38  ;;  %v1752_v35 = vrot.slane %v1743_v29, %v5218_v17 }
 0x16d   :  { %2124 = vmatprep.subr.bf16.mxu1 %v4749_v56  ;;  %2354 = vmatprep.subr.bf16.mxu0 %v4752_v37 }
 0x16e   :  { %1507 = vmatmul.mubr.bf16.gmra.mrb[24].mxu1 %v5319_v46  ;;  %1727 = vmatmul.mubr.bf16.gmra.mrb[28].mxu0 %v5319_v46  ;;  %v4761_v46 = vld [vmem:[#allocation7 + $0x44] ss:$8 sps:$4 sm:$0xff]  }
 0x170   :  { %2125 = vmatpush1.bf16.msra.mxu1 %v4747_v40  ;;  %2355 = vmatpush1.bf16.msra.mxu0 %v4750_v41 }
 0x171   :  { %2126 = vmatprep.subr.bf16.mxu1 %v4755_v42  ;;  %2356 = vmatprep.subr.bf16.mxu0 %v4758_v43 }
 0x174   :  { %2127 = vmatpush1.bf16.msra.mxu1 %v4753_v44  ;;  %2357 = vmatpush1.bf16.msra.mxu0 %v4756_v45  ;;  %v1833_v45 = vld [vmem:[%s5856_s6] sm:$0x3] }
 0x175   :  { %2128 = vmatprep.subr.bf16.mxu1 %v4761_v46  ;;  %2358 = vmatprep.subr.bf16.mxu0 %v4764_v47 }
 0x178   :  { %2129 = vmatpush1.bf16.msra.mxu1 %v4759_v48  ;;  %2359 = vmatpush1.bf16.msra.mxu0 %v4762_v49 }
 0x179   :  { %2130 = vmatprep.subr.bf16.mxu1 %v4767_v50  ;;  %2360 = vmatprep.subr.bf16.mxu0 %v4770_v51 }
 0x17c   :  { %2131 = vmatpush1.bf16.msra.mxu1 %v4765_v52  ;;  %2361 = vmatpush1.bf16.msra.mxu0 %v4768_v53  ;;  %v1838_v53 = vrot.slane %v1833_v45, %v5213_v15 }
 0x17d   :  { %2132 = vmatprep.subr.bf16.mxu1 %v4773_v54  ;;  %2362 = vmatprep.subr.bf16.mxu0 %v4776_v55 }
 0x180   :  { %2133 = vmatpush1.bf16.msra.mxu1 %v4771_v57  ;;  %2363 = vmatpush1.bf16.msra.mxu0 %v4774_v58 }
 0x181   :  { %2134 = vmatprep.subr.bf16.mxu1 %v4779_v59  ;;  %2364 = vmatprep.subr.bf16.mxu0 %v4782_v60 }
 0x184   :  { %2135 = vmatpush1.bf16.msra.mxu1 %v4777_v61  ;;  %2365 = vmatpush1.bf16.msra.mxu0 %v4780_v62 }
 0x185   :  { %2136 = vmatprep.subr.bf16.mxu1 %v4785_v63  ;;  %2366 = vmatprep.subr.bf16.mxu0 %v4788_v1 }
 0x188   :  { %2137 = vmatpush1.bf16.msra.mxu1 %v4783_v2  ;;  %2367 = vmatpush1.bf16.msra.mxu0 %v4786_v3  ;;  %v1842_v2 = vrot.slane %v1833_v45, %v5218_v17 }
 0x189   :  { %2138 = vmatprep.subr.bf16.mxu1 %v4791_v4  ;;  %2368 = vmatprep.subr.bf16.mxu0 %v4794_v5 }
 0x18c   :  { %2139 = vmatpush1.bf16.msra.mxu1 %v4789_v6  ;;  %2369 = vmatpush1.bf16.msra.mxu0 %v4792_v7 }
 0x18d   :  { %2140 = vmatprep.subr.bf16.mxu1 %v4797_v8  ;;  %2370 = vmatprep.subr.bf16.mxu0 %v4800_v9 }
 0x190   :  { %2141 = vmatpush1.bf16.msra.mxu1 %v4795_v10  ;;  %2371 = vmatpush1.bf16.msra.mxu0 %v4798_v11 }
 0x191   :  { %2142 = vmatprep.subr.bf16.mxu1 %v4803_v12  ;;  %2372 = vmatprep.subr.bf16.mxu0 %v4806_v13 }
 0x194   :  { %2143 = vmatpush1.bf16.msra.mxu1 %v4801_v14  ;;  %2373 = vmatpush1.bf16.msra.mxu0 %v4804_v16 }
 0x195   :  { %2144 = vmatprep.subr.bf16.mxu1 %v4809_v18  ;;  %2374 = vmatprep.subr.bf16.mxu0 %v4812_v19 }
 0x198   :  { %2145 = vmatpush1.bf16.msra.mxu1 %v4807_v20  ;;  %2375 = vmatpush1.bf16.msra.mxu0 %v4810_v21 }
 0x199   :  { %2146 = vmatprep.subr.bf16.mxu1 %v4815_v22  ;;  %2376 = vmatprep.subr.bf16.mxu0 %v4818_v23  ;;  %v1787_v22 = vld [vmem:[%s5856_s6] sm:$0x3] }
 0x19c   :  { %2147 = vmatpush1.bf16.msra.mxu1 %v4813_v24  ;;  %2377 = vmatpush1.bf16.msra.mxu0 %v4816_v26 }
 0x19d   :  { %2580 = vmatprep.subr.bf16.mxu1 %v4821_v27  ;;  %2810 = vmatprep.subr.bf16.mxu0 %v4824_v28 }
 0x201   :  { %v1060_v30 = vpop.f32.mrb[12].mxu1  ;;  %v1278_v31 = vpop.f32.mrb[16].mxu0 }
 0x202   :  { %v1737_v32 = vrot.slane %v1278_v31, 1  ;;  %v1062_v34 = vpop.f32.mrb[13].mxu1  ;;  %v1280_v36 = vpop.f32.mrb[17].mxu0 }
 0x203   :  { %v1738_v39 = vrot.slane %v1280_v36, 1  ;;  %v1064_v38 = vpop.f32.mrb[14].mxu1  ;;  %v1282_v56 = vpop.f32.mrb[18].mxu0 }
 0x204   :  { %v1741_v37 = vadd.f32 %v1737_v32, %v1060_v30  ;;  %v1066_v40 = vpop.f32.mrb[15].mxu1  ;;  %v1284_v41 = vpop.f32.mrb[19].mxu0  ;;  %v1823_v51 = vrot.slane %v1282_v56, 1  ;;  %v1792_v30 = vrot.slane %v1787_v22, %v5213_v15 }
 0x205   :  { %v1742_v42 = vadd.f32 %v1738_v39, %v1062_v34  ;;  %v1826_v59 = vrot.slane %v1284_v41, 1  ;;  %v1878_v34 = vld [vmem:[%s5856_s6] sm:$0x3] }
 0x206   :  { %v1755_v43 = vadd.f32 %v1748_v33, %v1741_v37  ;;  %v1796_v33 = vrot.slane %v1787_v22, %v5218_v17 }
 0x207   :  { %v1756_v44 = vadd.f32 %v1752_v35, %v1742_v42 }
 0x208   :  { %vm1757_vm5 = vcmp.ge.f32.partialorder %v1755_v43, 0.0  ;;  %v1759_v46 = vmul.f32 0.2, %v1755_v43 }
 0x209   :  { %vm1758_vm7 = vcmp.ge.f32.partialorder %v1756_v44, 0.0  ;;  %v1760_v47 = vmul.f32 0.2, %v1756_v44  ;;  %v1070_v48 = vpop.f32.mrb[16].mxu1  ;;  %v1288_v49 = vpop.f32.mrb[20].mxu0 }
 0x20a   :  { %v1761_v50 = vsel %vm1757_vm5, %v1755_v43, %v1759_v46  ;;  %v1824_v52 = vrot.slane %v1288_v49, 1  ;;  %v1071_v54 = vpop.f32.mrb[17].mxu1  ;;  %v1290_v55 = vpop.f32.mrb[21].mxu0 }
 0x20b   :  { %v1765_v57 = vrot.slane %v1761_v50, 7  ;;  %v1762_v58 = vsel %vm1758_vm7, %v1756_v44, %v1760_v47  ;;  %v1827_v60 = vrot.slane %v1290_v55, 1  ;;  %v1072_v61 = vpop.f32.mrb[18].mxu1  ;;  %v1292_v62 = vpop.f32.mrb[22].mxu0  ;;  %v1887_v47 = vrot.slane %v1878_v34, %v5218_v17 }
 0x20c   :  { %v1766_v63 = vrot.slane %v1762_v58, 7  ;;  %v1825_v1 = vsel %vm1776_vm8, %v1823_v51, %v1824_v52  ;;  %v1073_v3 = vpop.f32.mrb[19].mxu1  ;;  %v1293_v4 = vpop.f32.mrb[23].mxu0 }
 0x20d   :  { %1769 = vst [vmem:[#allocation3] sm:$0xfe] %v1765_v57  ;;  %v1831_v5 = vadd.f32 %v1825_v1, %v1064_v38  ;;  %v1828_v6 = vsel %vm1776_vm8, %v1826_v59, %v1827_v60 }
 0x20e   :  { %1771 = vst.msk [vmem:[#allocation3 + $0x8] sm:$0xfe] %vm1770_vm6, %v1766_v63  ;;  %v1832_v7 = vadd.f32 %v1828_v6, %v1066_v40  ;;  %v1883_v40 = vrot.slane %v1878_v34, %v5213_v15 }
 0x20f   :  { %v1845_v8 = vadd.f32 %v1838_v53, %v1831_v5 }
 0x210   :  { %v1846_v9 = vadd.f32 %v1842_v2, %v1832_v7 }
 0x211   :  { %vm1847_vm9 = vcmp.ge.f32.partialorder %v1845_v8, 0.0  ;;  %v1849_v10 = vmul.f32 0.2, %v1845_v8 }
 0x212   :  { %vm1848_vm10 = vcmp.ge.f32.partialorder %v1846_v9, 0.0  ;;  %v1850_v11 = vmul.f32 0.2, %v1846_v9 }
 0x213   :  { %v1851_v12 = vsel %vm1847_vm9, %v1845_v8, %v1849_v10  ;;  %vm1910_vm9 = vcmask 1041408  }
 0x214   :  { %v1855_v13 = vrot.slane %v1851_v12, 6  ;;  %v1852_v14 = vsel %vm1848_vm10, %v1846_v9, %v1850_v11  ;;  %vm1922_vm10 = vcmask 785412  }
 0x215   :  { %v1856_v16 = vrot.slane %v1852_v14, 6  ;;  %v1928_v22 = vld [vmem:[#allocation3 + $0x8] sm:$0xff] }
 0x216   :  { %1859 = vst [vmem:[#allocation3 + $0x20] sm:$0xf8] %v1855_v13  ;;  %1862 = vst [vmem:[#allocation3 + $0x30] sm:$0x3] %v1855_v13 }
 0x217   :  { %1861 = vst.msk [vmem:[#allocation3 + $0x28] sm:$0xf8] %vm1860_vm11, %v1856_v16 }
 0x218   :  { %1863 = vst.msk [vmem:[#allocation3 + $0x38] sm:$0x3] %vm67_vm2, %v1856_v16 }
 0x239   :  { %v1498_v18 = vpop.f32.mrb[20].mxu1  ;;  %v1718_v19 = vpop.f32.mrb[24].mxu0 }
 0x23a   :  { %v1500_v20 = vpop.f32.mrb[21].mxu1  ;;  %v1720_v21 = vpop.f32.mrb[25].mxu0  ;;  %v1777_v25 = vrot.slane %v1718_v19, 1 }
 0x23b   :  { %v1502_v23 = vpop.f32.mrb[22].mxu1  ;;  %v1722_v24 = vpop.f32.mrb[26].mxu0  ;;  %v1780_v29 = vrot.slane %v1720_v21, 1 }
 0x23c   :  { %v1778_v26 = vrot.slane %v1722_v24, 1  ;;  %v1504_v27 = vpop.f32.mrb[23].mxu1  ;;  %v1724_v28 = vpop.f32.mrb[27].mxu0 }
 0x23d   :  { %v1781_v31 = vrot.slane %v1724_v28, 1 }
 0x23e   :  { %v1779_v32 = vsel %vm1776_vm8, %v1777_v25, %v1778_v26  ;;  %v4819_v25 = vld [vmem:[#allocation7 + $0x1c0] ss:$8 sps:$4 sm:$0xff]  }
 0x23f   :  { %v1785_v36 = vadd.f32 %v1779_v32, %v1498_v18  ;;  %v1782_v39 = vsel %vm1776_vm8, %v1780_v29, %v1781_v31  ;;  %v4827_v29 = vld [vmem:[#allocation7 + $0x1d4] ss:$8 sps:$4 sm:$0xff]   ;;  %v4828_v32 = vld [vmem:[#allocation7 + $0x2b0] ss:$8 sps:$4 sm:$0xff]  }
 0x240   :  { %v1786_v35 = vadd.f32 %v1782_v39, %v1500_v20  ;;  %v4833_v39 = vld [vmem:[#allocation7 + $0x1e4] ss:$8 sps:$4 sm:$0xff]  }
 0x241   :  { %v1799_v38 = vadd.f32 %v1792_v30, %v1785_v36  ;;  %v1508_v56 = vpop.f32.mrb[24].mxu1  ;;  %v1728_v37 = vpop.f32.mrb[28].mxu0  ;;  %v4830_v30 = vld [vmem:[#allocation7 + $0x2b4] ss:$8 sps:$4 sm:$0xff]  }
 0x242   :  { %v1800_v41 = vadd.f32 %v1796_v33, %v1786_v35  ;;  %v1866_v42 = vrot.slane %v1728_v37, 1  ;;  %v1510_v43 = vpop.f32.mrb[25].mxu1  ;;  %v1730_v44 = vpop.f32.mrb[29].mxu0  ;;  %v4836_v35 = vld [vmem:[#allocation7 + $0x2c4] ss:$8 sps:$4 sm:$0xff]  }
 0x243   :  { %vm1801_vm14 = vcmp.ge.f32.partialorder %v1799_v38, 0.0  ;;  %v1803_v45 = vmul.f32 0.2, %v1799_v38  ;;  %v1868_v46 = vrot.slane %v1730_v44, 1  ;;  %v1512_v48 = vpop.f32.mrb[26].mxu1  ;;  %v1732_v49 = vpop.f32.mrb[30].mxu0 }
 0x244   :  { %vm1802_vm15 = vcmp.ge.f32.partialorder %v1800_v41, 0.0  ;;  %v1804_v50 = vmul.f32 0.2, %v1800_v41  ;;  %v1867_v51 = vsel %vm1776_vm8, %v1778_v26, %v1866_v42  ;;  %v1876_v52 = vadd.f32 %v1866_v42, %v1508_v56  ;;  %v1513_v53 = vpop.f32.mrb[27].mxu1  ;;  %v1733_v54 = vpop.f32.mrb[31].mxu0 }
 0x245   :  { %v1805_v55 = vsel %vm1801_vm14, %v1799_v38, %v1803_v45  ;;  %v1874_v57 = vadd.f32 %v1867_v51, %v1502_v23  ;;  %v1869_v58 = vsel %vm1776_vm8, %v1781_v31, %v1868_v46  ;;  %v1877_v59 = vadd.f32 %v1868_v46, %v1510_v43  ;;  %v4822_v26 = vld [vmem:[#allocation7 + $0x2a0] ss:$8 sps:$4 sm:$0xff]   ;;  %v4825_v31 = vld [vmem:[#allocation7 + $0x1d0] ss:$8 sps:$4 sm:$0xff]   ;;  %v4839_v43 = vld [vmem:[#allocation7 + $0x1f4] ss:$8 sps:$4 sm:$0xff]  }
 0x246   :  { %v1809_v60 = vrot.slane %v1805_v55, 7  ;;  %v1806_v61 = vsel %vm1802_vm15, %v1800_v41, %v1804_v50  ;;  %v1892_v62 = vadd.f32 %v1883_v40, %v1876_v52  ;;  %v1875_v63 = vadd.f32 %v1869_v58, %v1504_v27  ;;  %v1927_v27 = vld [vmem:[#allocation3] sm:$0xff]  ;;  %v4842_v44 = vld [vmem:[#allocation7 + $0x2d4] ss:$8 sps:$4 sm:$0xff]   ;;  %v4837_v46 = vld [vmem:[#allocation7 + $0x1f0] ss:$8 sps:$4 sm:$0xff]  }
 0x247   :  { %v1810_v1 = vrot.slane %v1806_v61, 7  ;;  %v1890_v2 = vadd.f32 %v1883_v40, %v1874_v57  ;;  %v1893_v3 = vadd.f32 %v1887_v47, %v1877_v59  ;;  %vm1925_vm14 = vcmask 780288   ;;  %v4831_v56 = vld [vmem:[#allocation7 + $0x1e0] ss:$8 sps:$4 sm:$0xff]   ;;  %v4845_v48 = vld [vmem:[#allocation7 + $0x204] ss:$8 sps:$4 sm:$0xff]  }
 0x248   :  { %1813 = vst [vmem:[#allocation3 + $0x10] sm:$0xfc] %v1809_v60  ;;  %1816 = vst [vmem:[#allocation3 + $0x20] sm:$0x1] %v1809_v60  ;;  %vm1896_vm0 = vcmp.ge.f32.partialorder %v1892_v62, 0.0  ;;  %v1891_v5 = vadd.f32 %v1887_v47, %v1875_v63 }
 0x249   :  { %v1900_v4 = vmul.f32 0.2, %v1892_v62  ;;  %1815 = vst.msk [vmem:[#allocation3 + $0x18] sm:$0xfc] %vm1814_vm12, %v1810_v1  ;;  %vm1894_vm3 = vcmp.ge.f32.partialorder %v1890_v2, 0.0  ;;  %vm1897_vm5 = vcmp.ge.f32.partialorder %v1893_v3, 0.0 }
 0x24a   :  { %1818 = vst.msk [vmem:[#allocation3 + $0x28] sm:$0x1] %vm1817_vm13, %v1810_v1  ;;  %v1898_v6 = vmul.f32 0.2, %v1890_v2  ;;  %v1901_v7 = vmul.f32 0.2, %v1893_v3 }
 0x24b   :  { %v1904_v8 = vsel %vm1896_vm0, %v1892_v62, %v1900_v4  ;;  %vm1895_vm7 = vcmp.ge.f32.partialorder %v1891_v5, 0.0  ;;  %v1899_v9 = vmul.f32 0.2, %v1891_v5  ;;  %v4834_v37 = vld [vmem:[#allocation7 + $0x2c0] ss:$8 sps:$4 sm:$0xff]  }
 0x24c   :  { %v1902_v10 = vsel %vm1894_vm3, %v1890_v2, %v1898_v6  ;;  %v1913_v11 = vrot.slane %v1904_v8, 6  ;;  %v1905_v12 = vsel %vm1897_vm5, %v1893_v3, %v1901_v7  ;;  %v4840_v47 = vld [vmem:[#allocation7 + $0x2d0] ss:$8 sps:$4 sm:$0xff]   ;;  %v4848_v49 = vld [vmem:[#allocation7 + $0x2e4] ss:$8 sps:$4 sm:$0xff]   ;;  %vm3080_vm3 = vcmask 785413  }
 0x24d   :  { %v1911_v13 = vrot.slane %v1902_v10, 6  ;;  %v1903_v14 = vsel %vm1895_vm7, %v1891_v5, %v1899_v9  ;;  %v1915_v16 = vrot.slane %v1905_v12, 6  ;;  %v4843_v51 = vld [vmem:[#allocation7 + $0x200] ss:$8 sps:$4 sm:$0xff]   ;;  %v4851_v54 = vld [vmem:[#allocation7 + $0x214] ss:$8 sps:$4 sm:$0xff]  }
 0x24e   :  { %v1912_v18 = vrot.slane %v1903_v14, 6  ;;  %v4846_v52 = vld [vmem:[#allocation7 + $0x2e0] ss:$8 sps:$4 sm:$0xff]   ;;  %v4854_v55 = vld [vmem:[#allocation7 + $0x2f4] ss:$8 sps:$4 sm:$0xff]  }
 0x24f   :  { %v1914_v19 = vsel %vm1910_vm9, %v1911_v13, %v1913_v11  ;;  %1921 = vst [vmem:[#allocation3 + $0x30] sm:$0xf0] %v1911_v13  ;;  %v1929_v21 = vld [vmem:[#allocation3 + $0x10] sm:$0xff]  ;;  %v1931_v40 = vld [vmem:[#allocation3 + $0x20] sm:$0xff] }
 0x250   :  { %1924 = vst [vmem:[#allocation3 + $0x40] sm:$0x7] %v1914_v19  ;;  %v1916_v20 = vsel %vm1910_vm9, %v1912_v18, %v1915_v16  ;;  %1923 = vst.msk [vmem:[#allocation3 + $0x38] sm:$0xf0] %vm1922_vm10, %v1912_v18  ;;  %v1930_v23 = vld [vmem:[#allocation3 + $0x18] sm:$0xff]  ;;  %v5371_v28 = vpack.c.bf16 %v1929_v21, %v1927_v27 }
 0x251   :  { %1926 = vst.msk [vmem:[#allocation3 + $0x48] sm:$0x7] %vm1925_vm14, %v1916_v20  ;;  %v5369_v24 = vpack.c.bf16 %v1930_v23, %v1928_v22  ;;  %v1932_v33 = vld [vmem:[#allocation3 + $0x28] sm:$0xff]  ;;  %v4849_v57 = vld [vmem:[#allocation7 + $0x210] ss:$8 sps:$4 sm:$0xff]  }
 0x252   :  { %v4852_v58 = vld [vmem:[#allocation7 + $0x2f0] ss:$8 sps:$4 sm:$0xff]   ;;  %v4857_v59 = vld [vmem:[#allocation7 + $0x224] ss:$8 sps:$4 sm:$0xff]   ;;  %v4855_v61 = vld [vmem:[#allocation7 + $0x220] ss:$8 sps:$4 sm:$0xff]  }
 0x253   :  { %4281 = vmatprep.mubr.msk.bf16.mxu1 %vm62_vm1, %v5369_v24  ;;  %4312 = vmatprep.mubr.msk.bf16.mxu0 %vm62_vm1, %v5369_v24  ;;  %v4860_v60 = vld [vmem:[#allocation7 + $0x304] ss:$8 sps:$4 sm:$0xff]   ;;  %v4858_v62 = vld [vmem:[#allocation7 + $0x300] ss:$8 sps:$4 sm:$0xff]   ;;  %v4863_v63 = vld [vmem:[#allocation7 + $0x234] ss:$8 sps:$4 sm:$0xff]  }
 0x254   :  { %2153 = vmatmul.mubr.bf16.vlgmr.msra.gmra.mrb[28].mxu1 %v5371_v28  ;;  %2383 = vmatmul.mubr.bf16.vlgmr.msra.gmra.mrb[32].mxu0 %v5371_v28  ;;  %v4866_v1 = vld [vmem:[#allocation7 + $0x314] ss:$8 sps:$4 sm:$0xff]   ;;  %v4861_v2 = vld [vmem:[#allocation7 + $0x230] ss:$8 sps:$4 sm:$0xff]   ;;  %v4869_v4 = vld [vmem:[#allocation7 + $0x244] ss:$8 sps:$4 sm:$0xff]  }
 0x255   :  { %2581 = vmatpush1.bf16.msra.mxu1 %v4819_v25  ;;  %2811 = vmatpush1.bf16.msra.mxu0 %v4822_v26  ;;  %v4864_v3 = vld [vmem:[#allocation7 + $0x310] ss:$8 sps:$4 sm:$0xff]   ;;  %v4872_v5 = vld [vmem:[#allocation7 + $0x324] ss:$8 sps:$4 sm:$0xff]   ;;  %v4867_v6 = vld [vmem:[#allocation7 + $0x240] ss:$8 sps:$4 sm:$0xff]  }
 0x256   :  { %2582 = vmatprep.subr.bf16.mxu1 %v4827_v29  ;;  %2812 = vmatprep.subr.bf16.mxu0 %v4830_v30  ;;  %v1933_v38 = vld [vmem:[#allocation3 + $0x30] sm:$0xff]  ;;  %v4870_v7 = vld [vmem:[#allocation7 + $0x320] ss:$8 sps:$4 sm:$0xff]   ;;  %v4881_v12 = vld [vmem:[#allocation7 + $0x264] ss:$8 sps:$4 sm:$0xff]  }
 0x257   :  { %v1934_v34 = vld [vmem:[#allocation3 + $0x38] sm:$0xff]  ;;  %v5385_v42 = vpack.c.bf16 %v1933_v38, %v1931_v40  ;;  %v1935_v50 = vld [vmem:[#allocation3 + $0x40] sm:$0xf]  ;;  %v4884_v13 = vld [vmem:[#allocation7 + $0x344] ss:$8 sps:$4 sm:$0xff]  }
 0x258   :  { %v5379_v36 = vpack.c.bf16 %v1934_v34, %v1932_v33  ;;  %v1936_v41 = vld [vmem:[#allocation3 + $0x48] sm:$0xf]  ;;  %v5395_v53 = vpack.c.bf16 %v1935_v50, %v1935_v50  ;;  %v4875_v8 = vld [vmem:[#allocation7 + $0x254] ss:$8 sps:$4 sm:$0xff]   ;;  %v4873_v10 = vld [vmem:[#allocation7 + $0x250] ss:$8 sps:$4 sm:$0xff]  }
 0x259   :  { %2583 = vmatpush1.bf16.msra.mxu1 %v4825_v31  ;;  %2813 = vmatpush1.bf16.msra.mxu0 %v4828_v32  ;;  %v5389_v45 = vpack.c.bf16 %v1936_v41, %v1936_v41  ;;  %v4878_v9 = vld [vmem:[#allocation7 + $0x334] ss:$8 sps:$4 sm:$0xff]   ;;  %v4876_v11 = vld [vmem:[#allocation7 + $0x330] ss:$8 sps:$4 sm:$0xff]   ;;  %v4879_v14 = vld [vmem:[#allocation7 + $0x260] ss:$8 sps:$4 sm:$0xff]  }
 0x25a   :  { %4282 = vmatprep.mubr.msk.bf16.mxu1 %vm62_vm1, %v5379_v36  ;;  %4313 = vmatprep.mubr.msk.bf16.mxu0 %vm62_vm1, %v5379_v36  ;;  %v4882_v16 = vld [vmem:[#allocation7 + $0x340] ss:$8 sps:$4 sm:$0xff]   ;;  %v4887_v18 = vld [vmem:[#allocation7 + $0x274] ss:$8 sps:$4 sm:$0xff]   ;;  %v4885_v20 = vld [vmem:[#allocation7 + $0x270] ss:$8 sps:$4 sm:$0xff]  }
 0x25b   :  { %2584 = vmatprep.subr.bf16.mxu1 %v4833_v39  ;;  %2814 = vmatprep.subr.bf16.mxu0 %v4836_v35  ;;  %v4890_v19 = vld [vmem:[#allocation7 + $0x354] ss:$8 sps:$4 sm:$0xff]   ;;  %v4888_v21 = vld [vmem:[#allocation7 + $0x350] ss:$8 sps:$4 sm:$0xff]   ;;  %v4893_v22 = vld [vmem:[#allocation7 + $0x284] ss:$8 sps:$4 sm:$0xff]  }
 0x25c   :  { %2163 = vmatmul.mubr.bf16.gmra.mrb[32].mxu1 %v5385_v42  ;;  %2393 = vmatmul.mubr.bf16.gmra.mrb[36].mxu0 %v5385_v42  ;;  %v4896_v23 = vld [vmem:[#allocation7 + $0x364] ss:$8 sps:$4 sm:$0xff]   ;;  %v4894_v25 = vld [vmem:[#allocation7 + $0x360] ss:$8 sps:$4 sm:$0xff]   ;;  %v4899_v26 = vld [vmem:[#allocation7 + $0x294] ss:$8 sps:$4 sm:$0xff]  }
 0x25d   :  { %2585 = vmatpush1.bf16.msra.mxu1 %v4831_v56  ;;  %2815 = vmatpush1.bf16.msra.mxu0 %v4834_v37  ;;  %v4902_v27 = vld [vmem:[#allocation7 + $0x374] ss:$8 sps:$4 sm:$0xff]   ;;  %v4897_v29 = vld [vmem:[#allocation7 + $0x290] ss:$8 sps:$4 sm:$0xff]   ;;  %v4904_v31 = vld [vmem:[%s5854_s4 + $0x70] sm:$0xff]  }
 0x25e   :  { %4283 = vmatprep.mubr.msk.bf16.mxu1 %vm62_vm1, %v5389_v45  ;;  %4314 = vmatprep.mubr.msk.bf16.mxu0 %vm62_vm1, %v5389_v45  ;;  %v4900_v30 = vld [vmem:[#allocation7 + $0x370] ss:$8 sps:$4 sm:$0xff]   ;;  %v4906_v33 = vld [vmem:[%s5854_s4 + $0x78] sm:$0xff]   ;;  %v4907_v34 = vld [vmem:[%s5854_s4 + $0x10] sm:$0xff]  }
 0x25f   :  { %2586 = vmatprep.subr.bf16.mxu1 %v4839_v43  ;;  %2816 = vmatprep.subr.bf16.mxu0 %v4842_v44  ;;  %v4905_v32 = vld [vmem:[%s5854_s4 + $0x8] sm:$0xff]   ;;  %v4909_v39 = vld [vmem:[%s5854_s4 + $0x18] sm:$0xff]   ;;  %v4911_v38 = vld [vmem:[%s5854_s4 + $0x20] sm:$0xff]  }
 0x260   :  { %v4910_v35 = vld [vmem:[%s5854_s4 + $0x88] sm:$0xff]   ;;  %v4912_v56 = vld [vmem:[%s5854_s4 + $0x90] sm:$0xff]   ;;  %v4914_v40 = vld [vmem:[%s5854_s4 + $0x98] sm:$0xff]  }
 0x261   :  { %2587 = vmatpush1.bf16.msra.mxu1 %v4837_v46  ;;  %2817 = vmatpush1.bf16.msra.mxu0 %v4840_v47  ;;  %v4913_v37 = vld [vmem:[%s5854_s4 + $0x28] sm:$0xff]   ;;  %v4915_v41 = vld [vmem:[%s5854_s4 + $0x30] sm:$0xff]   ;;  %v4917_v43 = vld [vmem:[%s5854_s4 + $0x38] sm:$0xff]  }
 0x262   :  { %2588 = vmatprep.subr.bf16.mxu1 %v4845_v48  ;;  %2818 = vmatprep.subr.bf16.mxu0 %v4848_v49  ;;  %v4918_v44 = vld [vmem:[%s5854_s4 + $0xa8] sm:$0xff]   ;;  %v4920_v46 = vld [vmem:[%s5854_s4 + $0xb0] sm:$0xff]   ;;  %v4922_v48 = vld [vmem:[%s5854_s4 + $0xb8] sm:$0xff]  }
 0x263   :  { %v4921_v47 = vld [vmem:[%s5854_s4 + $0x48] sm:$0xff]   ;;  %v4923_v49 = vld [vmem:[%s5854_s4 + $0x50] sm:$0xff]   ;;  %v4924_v50 = vld [vmem:[%s5854_s4 + $0xc0] sm:$0xff]  }
 0x264   :  { %2173 = vmatmul.mubr.bf16.gmra.mrb[36].mxu1 %v5395_v53  ;;  %2403 = vmatmul.mubr.bf16.gmra.mrb[40].mxu0 %v5395_v53 }
 0x265   :  { %2589 = vmatpush1.bf16.msra.mxu1 %v4843_v51  ;;  %2819 = vmatpush1.bf16.msra.mxu0 %v4846_v52  ;;  %v4925_v51 = vld [vmem:[%s5854_s4 + $0x58] sm:$0xff]   ;;  %v4926_v52 = vld [vmem:[%s5854_s4 + $0xc8] sm:$0xff]  }
 0x266   :  { %4343 = vmatprep.mubr.msk.bf16.mxu1 %vm62_vm1, %v5369_v24  ;;  %4374 = vmatprep.mubr.msk.bf16.mxu0 %vm62_vm1, %v5369_v24  ;;  %v4891_v24 = vld [vmem:[#allocation7 + $0x280] ss:$8 sps:$4 sm:$0xff]  }
 0x267   :  { %2590 = vmatprep.subr.bf16.mxu1 %v4851_v54  ;;  %2820 = vmatprep.subr.bf16.mxu0 %v4854_v55  ;;  %v4928_v54 = vld [vmem:[%s5854_s4 + $0xd0] sm:$0xff]   ;;  %v4929_v55 = vld [vmem:[%s5854_s4 + $0x68] sm:$0xff]  }
 0x269   :  { %2591 = vmatpush1.bf16.msra.mxu1 %v4849_v57  ;;  %2821 = vmatpush1.bf16.msra.mxu0 %v4852_v58  ;;  %v4930_v57 = vld [vmem:[%s5854_s4 + $0xd8] sm:$0xff]   ;;  %v2871_v58 = vld [vmem:[%s5857_s7] sm:$0x3] }
 0x26a   :  { %2592 = vmatprep.subr.bf16.mxu1 %v4857_v59  ;;  %2822 = vmatprep.subr.bf16.mxu0 %v4860_v60  ;;  %v2876_v59 = vrot.slane %v2871_v58, %v5213_v15 }
 0x26d   :  { %2593 = vmatpush1.bf16.msra.mxu1 %v4855_v61  ;;  %2823 = vmatpush1.bf16.msra.mxu0 %v4858_v62  ;;  %v2880_v62 = vrot.slane %v2871_v58, %v5218_v17 }
 0x26e   :  { %2594 = vmatprep.subr.bf16.mxu1 %v4863_v63  ;;  %2824 = vmatprep.subr.bf16.mxu0 %v4866_v1 }
 0x271   :  { %2595 = vmatpush1.bf16.msra.mxu1 %v4861_v2  ;;  %2825 = vmatpush1.bf16.msra.mxu0 %v4864_v3 }
 0x272   :  { %2596 = vmatprep.subr.bf16.mxu1 %v4869_v4  ;;  %2826 = vmatprep.subr.bf16.mxu0 %v4872_v5  ;;  %v2939_v4 = vld [vmem:[%s5857_s7] sm:$0x3] }
 0x275   :  { %2597 = vmatpush1.bf16.msra.mxu1 %v4867_v6  ;;  %2827 = vmatpush1.bf16.msra.mxu0 %v4870_v7 }
 0x276   :  { %2598 = vmatprep.subr.bf16.mxu1 %v4875_v8  ;;  %2828 = vmatprep.subr.bf16.mxu0 %v4878_v9  ;;  %v3033_v9 = vld [vmem:[%s5857_s7] sm:$0x3] }
 0x279   :  { %2599 = vmatpush1.bf16.msra.mxu1 %v4873_v10  ;;  %2829 = vmatpush1.bf16.msra.mxu0 %v4876_v11  ;;  %v3151_v11 = vld [vmem:[%s5857_s7] sm:$0x3] }
 0x27a   :  { %2600 = vmatprep.subr.bf16.mxu1 %v4881_v12  ;;  %2830 = vmatprep.subr.bf16.mxu0 %v4884_v13  ;;  %v2944_v12 = vrot.slane %v2939_v4, %v5213_v15 }
 0x27d   :  { %2601 = vmatpush1.bf16.msra.mxu1 %v4879_v14  ;;  %2831 = vmatpush1.bf16.msra.mxu0 %v4882_v16  ;;  %v2948_v14 = vrot.slane %v2939_v4, %v5218_v17 }
 0x27e   :  { %2602 = vmatprep.subr.bf16.mxu1 %v4887_v18  ;;  %2832 = vmatprep.subr.bf16.mxu0 %v4890_v19  ;;  %v3038_v18 = vrot.slane %v3033_v9, %v5213_v15 }
 0x281   :  { %2603 = vmatpush1.bf16.msra.mxu1 %v4885_v20  ;;  %2833 = vmatpush1.bf16.msra.mxu0 %v4888_v21  ;;  %v3156_v21 = vrot.slane %v3151_v11, %v5213_v15 }
 0x282   :  { %2604 = vmatprep.subr.bf16.mxu1 %v4893_v22  ;;  %2834 = vmatprep.subr.bf16.mxu0 %v4896_v23  ;;  %v3042_v23 = vrot.slane %v3033_v9, %v5218_v17 }
 0x285   :  { %2605 = vmatpush1.bf16.msra.mxu1 %v4891_v24  ;;  %2835 = vmatpush1.bf16.msra.mxu0 %v4894_v25 }
 0x286   :  { %2606 = vmatprep.subr.bf16.mxu1 %v4899_v26  ;;  %2836 = vmatprep.subr.bf16.mxu0 %v4902_v27 }
 0x289   :  { %2607 = vmatpush1.bf16.msra.mxu1 %v4897_v29  ;;  %2837 = vmatpush1.bf16.msra.mxu0 %v4900_v30  ;;  %v3160_v29 = vrot.slane %v3151_v11, %v5218_v17 }
 0x28a   :  { %3420 = vmatprep.subr.bf16.mxu1 %v5028_v0  ;;  %3605 = vmatprep.subr.bf16.mxu0 %v5028_v0 }
 0x28c   :  { %2613 = vmatmul.mubr.bf16.vlgmr.msra.gmra.mrb[40].mxu1 %v5371_v28  ;;  %2843 = vmatmul.mubr.bf16.vlgmr.msra.gmra.mrb[44].mxu0 %v5371_v28  ;;  %v4903_v28 = vld [vmem:[%s5854_s4] sm:$0xff]  }
 0x28d   :  { %4344 = vmatprep.mubr.msk.bf16.mxu1 %vm62_vm1, %v5379_v36  ;;  %4375 = vmatprep.mubr.msk.bf16.mxu0 %vm62_vm1, %v5379_v36  ;;  %v4908_v36 = vld [vmem:[%s5854_s4 + $0x80] sm:$0xff]  }
 0x28e   :  { %3421 = vmatpush1.bf16.msra.mxu1 %v4903_v28  ;;  %3606 = vmatpush1.bf16.msra.mxu0 %v4904_v31 }
 0x28f   :  { %3422 = vmatprep.subr.bf16.mxu1 %v5028_v0  ;;  %3607 = vmatprep.subr.bf16.mxu0 %v5028_v0 }
 0x292   :  { %3423 = vmatpush1.bf16.msra.mxu1 %v4905_v32  ;;  %3608 = vmatpush1.bf16.msra.mxu0 %v4906_v33 }
 0x293   :  { %3424 = vmatprep.subr.bf16.mxu1 %v5028_v0  ;;  %3609 = vmatprep.subr.bf16.mxu0 %v5028_v0 }
 0x294   :  { %2623 = vmatmul.mubr.bf16.gmra.mrb[44].mxu1 %v5385_v42  ;;  %2853 = vmatmul.mubr.bf16.gmra.mrb[48].mxu0 %v5385_v42  ;;  %v4916_v42 = vld [vmem:[%s5854_s4 + $0xa0] sm:$0xff]  }
 0x295   :  { %4345 = vmatprep.mubr.msk.bf16.mxu1 %vm62_vm1, %v5389_v45  ;;  %4376 = vmatprep.mubr.msk.bf16.mxu0 %vm62_vm1, %v5389_v45  ;;  %v4919_v45 = vld [vmem:[%s5854_s4 + $0x40] sm:$0xff]  }
 0x296   :  { %3425 = vmatpush1.bf16.msra.mxu1 %v4907_v34  ;;  %3610 = vmatpush1.bf16.msra.mxu0 %v4908_v36 }
 0x297   :  { %3426 = vmatprep.subr.bf16.mxu1 %v5028_v0  ;;  %3611 = vmatprep.subr.bf16.mxu0 %v5028_v0 }
 0x29a   :  { %3427 = vmatpush1.bf16.msra.mxu1 %v4909_v39  ;;  %3612 = vmatpush1.bf16.msra.mxu0 %v4910_v35 }
 0x29b   :  { %3428 = vmatprep.subr.bf16.mxu1 %v5028_v0  ;;  %3613 = vmatprep.subr.bf16.mxu0 %v5028_v0 }
 0x29c   :  { %2633 = vmatmul.mubr.bf16.gmra.mrb[48].mxu1 %v5395_v53  ;;  %2863 = vmatmul.mubr.bf16.gmra.mrb[52].mxu0 %v5395_v53  ;;  %v4927_v53 = vld [vmem:[%s5854_s4 + $0x60] sm:$0xff]  }
 0x29e   :  { %3429 = vmatpush1.bf16.msra.mxu1 %v4911_v38  ;;  %3614 = vmatpush1.bf16.msra.mxu0 %v4912_v56 }
 0x29f   :  { %3430 = vmatprep.subr.bf16.mxu1 %v5028_v0  ;;  %3615 = vmatprep.subr.bf16.mxu0 %v5028_v0 }
 0x2a2   :  { %3431 = vmatpush1.bf16.msra.mxu1 %v4913_v37  ;;  %3616 = vmatpush1.bf16.msra.mxu0 %v4914_v40 }
 0x2a3   :  { %3432 = vmatprep.subr.bf16.mxu1 %v5028_v0  ;;  %3617 = vmatprep.subr.bf16.mxu0 %v5028_v0 }
 0x2a6   :  { %3433 = vmatpush1.bf16.msra.mxu1 %v4915_v41  ;;  %3618 = vmatpush1.bf16.msra.mxu0 %v4916_v42 }
 0x2a7   :  { %3434 = vmatprep.subr.bf16.mxu1 %v5028_v0  ;;  %3619 = vmatprep.subr.bf16.mxu0 %v5028_v0 }
 0x2aa   :  { %3435 = vmatpush1.bf16.msra.mxu1 %v4917_v43  ;;  %3620 = vmatpush1.bf16.msra.mxu0 %v4918_v44 }
 0x2ab   :  { %3436 = vmatprep.subr.bf16.mxu1 %v5028_v0  ;;  %3621 = vmatprep.subr.bf16.mxu0 %v5028_v0 }
 0x2ae   :  { %3437 = vmatpush1.bf16.msra.mxu1 %v4919_v45  ;;  %3622 = vmatpush1.bf16.msra.mxu0 %v4920_v46 }
 0x2af   :  { %3438 = vmatprep.subr.bf16.mxu1 %v5028_v0  ;;  %3623 = vmatprep.subr.bf16.mxu0 %v5028_v0 }
 0x2b2   :  { %3439 = vmatpush1.bf16.msra.mxu1 %v4921_v47  ;;  %3624 = vmatpush1.bf16.msra.mxu0 %v4922_v48 }
 0x2b3   :  { %3440 = vmatprep.subr.bf16.mxu1 %v5028_v0  ;;  %3625 = vmatprep.subr.bf16.mxu0 %v5028_v0 }
 0x2b6   :  { %3441 = vmatpush1.bf16.msra.mxu1 %v4923_v49  ;;  %3626 = vmatpush1.bf16.msra.mxu0 %v4924_v50 }
 0x2b7   :  { %3442 = vmatprep.subr.bf16.mxu1 %v5028_v0  ;;  %3627 = vmatprep.subr.bf16.mxu0 %v5028_v0 }
 0x2ba   :  { %3443 = vmatpush1.bf16.msra.mxu1 %v4925_v51  ;;  %3628 = vmatpush1.bf16.msra.mxu0 %v4926_v52 }
 0x2bb   :  { %3444 = vmatprep.subr.bf16.mxu1 %v5028_v0  ;;  %3629 = vmatprep.subr.bf16.mxu0 %v5028_v0 }
 0x2be   :  { %3445 = vmatpush1.bf16.msra.mxu1 %v4927_v53  ;;  %3630 = vmatpush1.bf16.msra.mxu0 %v4928_v54 }
 0x2bf   :  { %3446 = vmatprep.subr.bf16.mxu1 %v5028_v0  ;;  %3631 = vmatprep.subr.bf16.mxu0 %v5028_v0 }
 0x2c2   :  { %3447 = vmatpush1.bf16.msra.mxu1 %v4929_v55  ;;  %3632 = vmatpush1.bf16.msra.mxu0 %v4930_v57 }
 0x2c3   :  { %3790 = vmatprep.subr.bf16.mxu0 %v5028_v0  ;;  %4511 = vmatprep.subr.bf16.mxu1 %v5028_v0 }
 0x327   :  { %v2154_v60 = vpop.f32.mrb[28].mxu1  ;;  %v2384_v61 = vpop.f32.mrb[32].mxu0 }
 0x328   :  { %v2156_v63 = vpop.f32.mrb[29].mxu1  ;;  %v2386_v1 = vpop.f32.mrb[33].mxu0  ;;  %v2951_v28 = vadd.f32 %v2944_v12, %v2154_v60 }
 0x329   :  { %v2158_v2 = vpop.f32.mrb[30].mxu1  ;;  %v2388_v3 = vpop.f32.mrb[34].mxu0  ;;  %v2952_v39 = vadd.f32 %v2948_v14, %v2156_v63 }
 0x32a   :  { %v2883_v5 = vadd.f32 %v2876_v59, %v2158_v2  ;;  %v2160_v6 = vpop.f32.mrb[31].mxu1  ;;  %v2390_v7 = vpop.f32.mrb[35].mxu0  ;;  %v2957_v25 = vrot.slane %v2388_v3, 1 }
 0x32b   :  { %v2884_v8 = vadd.f32 %v2880_v62, %v2160_v6  ;;  %v2960_v32 = vrot.slane %v2390_v7, 1 }
 0x32c   :  { %v2885_v10 = vadd.f32 %v2883_v5, %v2384_v61 }
 0x32d   :  { %v2886_v13 = vadd.f32 %v2884_v8, %v2386_v1 }
 0x32e   :  { %vm2887_vm15 = vcmp.ge.f32.partialorder %v2885_v10, 0.0  ;;  %v2889_v16 = vmul.f32 0.2, %v2885_v10 }
 0x32f   :  { %vm2888_vm0 = vcmp.ge.f32.partialorder %v2886_v13, 0.0  ;;  %v2890_v19 = vmul.f32 0.2, %v2886_v13  ;;  %v2164_v20 = vpop.f32.mrb[32].mxu1  ;;  %v2394_v22 = vpop.f32.mrb[36].mxu0 }
 0x330   :  { %v2891_v24 = vsel %vm2887_vm15, %v2885_v10, %v2889_v16  ;;  %v2958_v26 = vrot.slane %v2394_v22, 1  ;;  %v2166_v27 = vpop.f32.mrb[33].mxu1  ;;  %v2396_v30 = vpop.f32.mrb[37].mxu0  ;;  %v3163_v43 = vadd.f32 %v3156_v21, %v2164_v20 }
 0x331   :  { %2893 = vst [vmem:[#allocation4] sm:$0xfe] %v2891_v24  ;;  %v2892_v31 = vsel %vm2888_vm0, %v2886_v13, %v2890_v19  ;;  %v2961_v33 = vrot.slane %v2396_v30, 1  ;;  %v2168_v34 = vpop.f32.mrb[34].mxu1  ;;  %v2398_v36 = vpop.f32.mrb[38].mxu0  ;;  %v3164_v44 = vadd.f32 %v3160_v29, %v2166_v27  ;;  %vm3201_vm0 = vcmask 1043456  }
 0x332   :  { %2894 = vst.msk [vmem:[#allocation4 + $0x8] sm:$0xfe] %vm1770_vm6, %v2892_v31  ;;  %v2959_v35 = vsel %vm1776_vm8, %v2957_v25, %v2958_v26  ;;  %v3045_v38 = vadd.f32 %v3038_v18, %v2168_v34  ;;  %v2170_v56 = vpop.f32.mrb[35].mxu1  ;;  %v2400_v37 = vpop.f32.mrb[39].mxu0  ;;  %v3165_v48 = vadd.f32 %v3156_v21, %v2168_v34  ;;  %v3171_v53 = vrot.slane %v2398_v36, 1 }
 0x333   :  { %v2965_v40 = vadd.f32 %v2959_v35, %v2951_v28  ;;  %v2962_v41 = vsel %vm1776_vm8, %v2960_v32, %v2961_v33  ;;  %v3046_v42 = vadd.f32 %v3042_v23, %v2170_v56  ;;  %v3166_v13 = vadd.f32 %v3160_v29, %v2170_v56 }
 0x334   :  { %v2966_v45 = vadd.f32 %v2962_v41, %v2952_v39  ;;  %v3049_v46 = vadd.f32 %v3045_v38, %v2394_v22  ;;  %v3174_v14 = vrot.slane %v2400_v37, 1 }
 0x335   :  { %vm2967_vm5 = vcmp.ge.f32.partialorder %v2965_v40, 0.0  ;;  %v2969_v47 = vmul.f32 0.2, %v2965_v40  ;;  %v3050_v49 = vadd.f32 %v3046_v42, %v2396_v30 }
 0x336   :  { %vm2968_vm7 = vcmp.ge.f32.partialorder %v2966_v45, 0.0  ;;  %v2970_v50 = vmul.f32 0.2, %v2966_v45  ;;  %vm3053_vm6 = vcmp.ge.f32.partialorder %v3049_v46, 0.0  ;;  %v3057_v51 = vmul.f32 0.2, %v3049_v46 }
 0x337   :  { %v2971_v52 = vsel %vm2967_vm5, %v2965_v40, %v2969_v47  ;;  %vm3054_vm15 = vcmp.ge.f32.partialorder %v3050_v49, 0.0  ;;  %v3058_v54 = vmul.f32 0.2, %v3050_v49  ;;  %v2174_v55 = vpop.f32.mrb[36].mxu1  ;;  %v2404_v57 = vpop.f32.mrb[40].mxu0 }
 0x338   :  { %v2975_v58 = vrot.slane %v2971_v52, 6  ;;  %v2972_v59 = vsel %vm2968_vm7, %v2966_v45, %v2970_v50  ;;  %v3061_v60 = vsel %vm3053_vm6, %v3049_v46, %v3057_v51  ;;  %v3047_v61 = vadd.f32 %v3038_v18, %v2174_v55  ;;  %v2176_v62 = vpop.f32.mrb[37].mxu1  ;;  %v2406_v63 = vpop.f32.mrb[41].mxu0  ;;  %v2983_v45 = vld [vmem:[%s5857_s7] sm:$0x3] }
 0x339   :  { %v2976_v1 = vrot.slane %v2972_v59, 6  ;;  %v3069_v2 = vrot.slane %v3061_v60, 6  ;;  %v3062_v3 = vsel %vm3054_vm15, %v3050_v49, %v3058_v54  ;;  %v3172_v4 = vrot.slane %v2404_v57, 1  ;;  %v2178_v5 = vpop.f32.mrb[38].mxu1  ;;  %v2408_v6 = vpop.f32.mrb[42].mxu0 }
 0x33a   :  { %2979 = vst [vmem:[#allocation4 + $0x20] sm:$0xf8] %v2975_v58  ;;  %2981 = vst [vmem:[#allocation4 + $0x30] sm:$0x3] %v2975_v58  ;;  %v3070_v7 = vrot.slane %v3062_v3, 6  ;;  %v3051_v8 = vadd.f32 %v3047_v61, %v2398_v36  ;;  %v3048_v9 = vadd.f32 %v3042_v23, %v2176_v62  ;;  %v3175_v10 = vrot.slane %v2406_v63, 1 }
 0x33b   :  { %v2179_v11 = vpop.f32.mrb[39].mxu1  ;;  %v2409_v12 = vpop.f32.mrb[43].mxu0  ;;  %2980 = vst.msk [vmem:[#allocation4 + $0x28] sm:$0xf8] %vm1860_vm11, %v2976_v1  ;;  %3079 = vst [vmem:[#allocation4 + $0x40] sm:$0xe0] %v3069_v2  ;;  %v3173_v16 = vsel %vm1776_vm8, %v3171_v53, %v3172_v4  ;;  %v3183_v18 = vadd.f32 %v3172_v4, %v3165_v48  ;;  %v2988_v46 = vrot.slane %v2983_v45, %v5213_v15 }
 0x33c   :  { %2982 = vst.msk [vmem:[#allocation4 + $0x38] sm:$0x3] %vm67_vm2, %v2976_v1  ;;  %vm3055_vm5 = vcmp.ge.f32.partialorder %v3051_v8, 0.0  ;;  %v3059_v19 = vmul.f32 0.2, %v3051_v8  ;;  %v3181_v20 = vadd.f32 %v3173_v16, %v3163_v43  ;;  %v3052_v21 = vadd.f32 %v3048_v9, %v2400_v37 }
 0x33d   :  { %3081 = vst.msk [vmem:[#allocation4 + $0x48] sm:$0xe0] %vm3080_vm3, %v3070_v7  ;;  %vm3187_vm7 = vcmp.ge.f32.partialorder %v3183_v18, 0.0  ;;  %v3191_v22 = vmul.f32 0.2, %v3183_v18  ;;  %v3176_v23 = vsel %vm1776_vm8, %v3174_v14, %v3175_v10  ;;  %v3184_v24 = vadd.f32 %v3175_v10, %v3166_v13 }
 0x33e   :  { %v3063_v25 = vsel %vm3055_vm5, %v3051_v8, %v3059_v19  ;;  %vm3185_vm11 = vcmp.ge.f32.partialorder %v3181_v20, 0.0  ;;  %v3189_v26 = vmul.f32 0.2, %v3181_v20  ;;  %vm3056_vm2 = vcmp.ge.f32.partialorder %v3052_v21, 0.0  ;;  %v2895_v50 = vld [vmem:[%s5857_s7] sm:$0x3] }
 0x33f   :  { %v3071_v27 = vrot.slane %v3063_v25, 6  ;;  %v3195_v29 = vsel %vm3187_vm7, %v3183_v18, %v3191_v22  ;;  %v3060_v30 = vmul.f32 0.2, %v3052_v21  ;;  %v3182_v28 = vadd.f32 %v3176_v23, %v3164_v44  ;;  %v3084_v59 = vld [vmem:[%s5857_s7] sm:$0x3] }
 0x340   :  { %v3193_v31 = vsel %vm3185_vm11, %v3181_v20, %v3189_v26  ;;  %v3204_v32 = vrot.slane %v3195_v29, 4  ;;  %vm3188_vm3 = vcmp.ge.f32.partialorder %v3184_v24, 0.0  ;;  %v3192_v33 = vmul.f32 0.2, %v3184_v24  ;;  %v3218_v62 = vld [vmem:[%s5857_s7] sm:$0x3] }
 0x341   :  { %v3072_v34 = vsel %vm1910_vm9, %v3069_v2, %v3071_v27  ;;  %v3202_v36 = vrot.slane %v3193_v31, 4  ;;  %v3064_v39 = vsel %vm3056_vm2, %v3052_v21, %v3060_v30  ;;  %vm3186_vm6 = vcmp.ge.f32.partialorder %v3182_v28, 0.0 }
 0x342   :  { %3082 = vst [vmem:[#allocation4 + $0x50] sm:$0xf] %v3072_v34  ;;  %v3073_v35 = vrot.slane %v3064_v39, 6  ;;  %v3190_v38 = vmul.f32 0.2, %v3182_v28  ;;  %v3196_v56 = vsel %vm3188_vm3, %v3184_v24, %v3192_v33  ;;  %vm3213_vm15 = vcmask 785415  }
 0x343   :  { %v3205_v37 = vsel %vm3201_vm0, %v3202_v36, %v3204_v32  ;;  %3212 = vst [vmem:[#allocation4 + $0x60] sm:$0x80] %v3202_v36  ;;  %v3206_v40 = vrot.slane %v3196_v56, 4  ;;  %vm3216_vm5 = vcmask 783360   ;;  %v2992_v49 = vrot.slane %v2983_v45, %v5218_v17 }
 0x344   :  { %3215 = vst [vmem:[#allocation4 + $0x70] sm:$0x3f] %v3205_v37  ;;  %v3074_v41 = vsel %vm1910_vm9, %v3070_v7, %v3073_v35  ;;  %v3194_v42 = vsel %vm3186_vm6, %v3182_v28, %v3190_v38  ;;  %v2900_v60 = vrot.slane %v2895_v50, %v5213_v15  ;;  %v2904_v1 = vrot.slane %v2895_v50, %v5218_v17 }
 0x345   :  { %3083 = vst.msk [vmem:[#allocation4 + $0x58] sm:$0xf] %vm78_vm4, %v3074_v41  ;;  %v3203_v43 = vrot.slane %v3194_v42, 4  ;;  %v5581_v3 = vrot.slane %v3084_v59, %v5213_v15  ;;  %v5584_v5 = vrot.slane %v3084_v59, %v5218_v17  ;;  %v5587_v6 = vrot.slane %v3218_v62, %v5213_v15 }
 0x346   :  { %v5590_v11 = vrot.slane %v3218_v62, %v5218_v17 }
 0x347   :  { %v3207_v44 = vsel %vm3201_vm0, %v3203_v43, %v3206_v40  ;;  %3214 = vst.msk [vmem:[#allocation4 + $0x68] sm:$0x80] %vm3213_vm15, %v3203_v43 }
 0x348   :  { %3217 = vst.msk [vmem:[#allocation4 + $0x78] sm:$0x3f] %vm3216_vm5, %v3207_v44  ;;  %vm3134_vm5 = vcmask 1042432  }
 0x35f   :  { %v2614_v47 = vpop.f32.mrb[40].mxu1  ;;  %v2844_v48 = vpop.f32.mrb[44].mxu0 }
 0x360   :  { %v2616_v51 = vpop.f32.mrb[41].mxu1  ;;  %v2846_v52 = vpop.f32.mrb[45].mxu0  ;;  %v2907_v7 = vadd.f32 %v2900_v60, %v2614_v47 }
 0x361   :  { %v2618_v53 = vpop.f32.mrb[42].mxu1  ;;  %v2848_v54 = vpop.f32.mrb[46].mxu0  ;;  %v2908_v28 = vadd.f32 %v2904_v1, %v2616_v51 }
 0x362   :  { %v2995_v55 = vadd.f32 %v2988_v46, %v2618_v53  ;;  %v2620_v57 = vpop.f32.mrb[43].mxu1  ;;  %v2850_v58 = vpop.f32.mrb[47].mxu0  ;;  %v2913_v13 = vrot.slane %v2848_v54, 1 }
 0x363   :  { %v2996_v61 = vadd.f32 %v2992_v49, %v2620_v57  ;;  %v2916_v22 = vrot.slane %v2850_v58, 1 }
 0x364   :  { %v2999_v63 = vadd.f32 %v2995_v55, %v2844_v48 }
 0x365   :  { %v3000_v2 = vadd.f32 %v2996_v61, %v2846_v52 }
 0x366   :  { %vm3003_vm4 = vcmp.ge.f32.partialorder %v2999_v63, 0.0  ;;  %v3007_v4 = vmul.f32 0.2, %v2999_v63 }
 0x367   :  { %vm3004_vm7 = vcmp.ge.f32.partialorder %v3000_v2, 0.0  ;;  %v3008_v8 = vmul.f32 0.2, %v3000_v2  ;;  %v2624_v9 = vpop.f32.mrb[44].mxu1  ;;  %v2854_v10 = vpop.f32.mrb[48].mxu0 }
 0x368   :  { %v3011_v12 = vsel %vm3003_vm4, %v2999_v63, %v3007_v4  ;;  %v2997_v14 = vadd.f32 %v2988_v46, %v2624_v9  ;;  %v2914_v16 = vrot.slane %v2854_v10, 1  ;;  %v2626_v18 = vpop.f32.mrb[45].mxu1  ;;  %v2856_v19 = vpop.f32.mrb[49].mxu0  ;;  %v3096_v36 = vadd.f32 %v5581_v3, %v2624_v9 }
 0x369   :  { %v3019_v20 = vrot.slane %v3011_v12, 6  ;;  %v3012_v21 = vsel %vm3004_vm7, %v3000_v2, %v3008_v8  ;;  %v2998_v23 = vadd.f32 %v2992_v49, %v2626_v18  ;;  %v2628_v15 = vpop.f32.mrb[46].mxu1  ;;  %v5592_v24 = vpop.f32.mrb[50].mxu0  ;;  %v2917_v29 = vrot.slane %v2856_v19, 1 }
 0x36a   :  { %v3020_v25 = vrot.slane %v3012_v21, 6  ;;  %v3001_v26 = vadd.f32 %v2997_v14, %v2848_v54  ;;  %v2915_v27 = vsel %vm1776_vm8, %v2913_v13, %v2914_v16  ;;  %v2630_v17 = vpop.f32.mrb[47].mxu1  ;;  %v5595_v30 = vpop.f32.mrb[51].mxu0  ;;  %v3230_v33 = vadd.f32 %v5587_v6, %v2628_v15 }
 0x36b   :  { %3029 = vst [vmem:[#allocation4 + $0x30] sm:$0xf0] %v3019_v20  ;;  %v2921_v31 = vadd.f32 %v2915_v27, %v2907_v7  ;;  %v3002_v32 = vadd.f32 %v2998_v23, %v2850_v58  ;;  %v2918_v39 = vsel %vm1776_vm8, %v2916_v22, %v2917_v29  ;;  %v3097_v37 = vadd.f32 %v5584_v5, %v2626_v18 }
 0x36c   :  { %3030 = vst.msk [vmem:[#allocation4 + $0x38] sm:$0xf0] %vm1922_vm10, %v3020_v25  ;;  %vm3005_vm11 = vcmp.ge.f32.partialorder %v3001_v26, 0.0  ;;  %v3009_v34 = vmul.f32 0.2, %v3001_v26  ;;  %v2922_v40 = vadd.f32 %v2918_v39, %v2908_v28  ;;  %v3234_v41 = vadd.f32 %v3230_v33, %v2854_v10  ;;  %v3266_v39 = vld [vmem:[#allocation4 + $0x8] sm:$0xff] }
 0x36d   :  { %vm2923_vm2 = vcmp.ge.f32.partialorder %v2921_v31, 0.0  ;;  %v2925_v35 = vmul.f32 0.2, %v2921_v31  ;;  %vm3006_vm3 = vcmp.ge.f32.partialorder %v3002_v32, 0.0  ;;  %v3010_v38 = vmul.f32 0.2, %v3002_v32 }
 0x36e   :  { %v3013_v56 = vsel %vm3005_vm11, %v3001_v26, %v3009_v34  ;;  %v3231_v45 = vadd.f32 %v5590_v11, %v2630_v17  ;;  %vm2924_vm10 = vcmp.ge.f32.partialorder %v2922_v40, 0.0  ;;  %v2926_v50 = vmul.f32 0.2, %v2922_v40 }
 0x36f   :  { %v3021_v42 = vrot.slane %v3013_v56, 6  ;;  %v2927_v43 = vsel %vm2923_vm2, %v2921_v31, %v2925_v35  ;;  %v3014_v44 = vsel %vm3006_vm3, %v3002_v32, %v3010_v38  ;;  %v2634_v46 = vpop.f32.mrb[48].mxu1  ;;  %v2864_v47 = vpop.f32.mrb[52].mxu0  ;;  %vm3238_vm6 = vcmp.ge.f32.partialorder %v3234_v41, 0.0 }
 0x370   :  { %v2931_v48 = vrot.slane %v2927_v43, 7  ;;  %v3023_v49 = vrot.slane %v3014_v44, 6  ;;  %v2636_v51 = vpop.f32.mrb[49].mxu1  ;;  %v3242_v53 = vmul.f32 0.2, %v3234_v41  ;;  %v3235_v54 = vadd.f32 %v3231_v45, %v2856_v19  ;;  %v2866_v55 = vpop.f32.mrb[53].mxu0 }
 0x371   :  { %v3022_v52 = vsel %vm1910_vm9, %v3019_v20, %v3021_v42  ;;  %v2638_v57 = vpop.f32.mrb[50].mxu1  ;;  %v2928_v59 = vsel %vm2924_vm10, %v2922_v40, %v2926_v50  ;;  %v3098_v60 = vadd.f32 %v5581_v3, %v2628_v15  ;;  %v3232_v61 = vadd.f32 %v5587_v6, %v2634_v46  ;;  %v2868_v62 = vpop.f32.mrb[54].mxu0  ;;  %v4931_v42 = vld [vmem:[%s5854_s4 + $0xe0] sm:$0xff]  }
 0x372   :  { %3031 = vst [vmem:[#allocation4 + $0x40] sm:$0x7] %v3022_v52  ;;  %2935 = vst [vmem:[#allocation4 + $0x10] sm:$0xfc] %v2931_v48  ;;  %v3024_v58 = vsel %vm1910_vm9, %v3020_v25, %v3023_v49  ;;  %v2639_v63 = vpop.f32.mrb[51].mxu1  ;;  %v2932_v1 = vrot.slane %v2928_v59, 7  ;;  %v3246_v2 = vsel %vm3238_vm6, %v3234_v41, %v3242_v53  ;;  %v3233_v3 = vadd.f32 %v5590_v11, %v2636_v51 }
 0x373   :  { %2937 = vst [vmem:[#allocation4 + $0x20] sm:$0x1] %v2931_v48  ;;  %3032 = vst.msk [vmem:[#allocation4 + $0x48] sm:$0x7] %vm1925_vm14, %v3024_v58  ;;  %vm3239_vm15 = vcmp.ge.f32.partialorder %v3235_v54, 0.0  ;;  %v2869_v7 = vpop.f32.mrb[55].mxu0  ;;  %v3236_v9 = vadd.f32 %v3232_v61, %v5592_v24  ;;  %v3099_v6 = vadd.f32 %v5584_v5, %v2630_v17 }
 0x374   :  { %v3243_v4 = vmul.f32 0.2, %v3235_v54  ;;  %v3104_v8 = vrot.slane %v5592_v24, 1  ;;  %v3105_v10 = vrot.slane %v2864_v47, 1  ;;  %2936 = vst.msk [vmem:[#allocation4 + $0x18] sm:$0xfc] %vm1814_vm12, %v2932_v1  ;;  %v3237_v11 = vadd.f32 %v3233_v3, %v5595_v30 }
 0x375   :  { %2938 = vst.msk [vmem:[#allocation4 + $0x28] sm:$0x1] %vm1817_vm13, %v2932_v1  ;;  %v3107_v13 = vrot.slane %v5595_v30, 1  ;;  %vm3263_vm14 = vcmask 784384   ;;  %v3108_v14 = vrot.slane %v2866_v55, 1  ;;  %vm3146_vm4 = vcmask 785414  }
 0x376   :  { %v3247_v12 = vsel %vm3239_vm15, %v3235_v54, %v3243_v4  ;;  %v3254_v16 = vrot.slane %v3246_v2, 4  ;;  %vm3240_vm7 = vcmp.ge.f32.partialorder %v3236_v9, 0.0  ;;  %v3244_v18 = vmul.f32 0.2, %v3236_v9  ;;  %v3265_v41 = vld [vmem:[#allocation4] sm:$0xff]  ;;  %v3272_v50 = vld [vmem:[#allocation4 + $0x38] sm:$0xff] }
 0x377   :  { %v3106_v19 = vsel %vm1776_vm8, %v3104_v8, %v3105_v10  ;;  %v3116_v21 = vadd.f32 %v3105_v10, %v3098_v60  ;;  %v3109_v22 = vsel %vm1776_vm8, %v3107_v13, %v3108_v14  ;;  %v3257_v23 = vrot.slane %v3247_v12, 4  ;;  %v4932_v53 = vld [vmem:[%s5854_s4 + $0xe8] sm:$0xff]   ;;  %v3271_v55 = vld [vmem:[#allocation4 + $0x30] sm:$0xff]  ;;  %v4934_v62 = vld [vmem:[%s5854_s4 + $0xf8] sm:$0xff]  }
 0x378   :  { %v3114_v20 = vadd.f32 %v3106_v19, %v3096_v36  ;;  %v3248_v15 = vsel %vm3240_vm7, %v3236_v9, %v3244_v18  ;;  %v3115_v5 = vadd.f32 %v3109_v22, %v3097_v37  ;;  %v3117_v24 = vadd.f32 %v3108_v14, %v3099_v6  ;;  %v4933_v57 = vld [vmem:[%s5854_s4 + $0xf0] sm:$0xff]   ;;  %v4935_v2 = vld [vmem:[%s5854_s4 + $0x100] sm:$0xff]   ;;  %v3280_v8 = vld [vmem:[#allocation4 + $0x78] sm:$0xff] }
 0x379   :  { %v3255_v25 = vrot.slane %v3248_v15, 4  ;;  %vm3120_vm13 = vcmp.ge.f32.partialorder %v3116_v21, 0.0  ;;  %v3124_v27 = vmul.f32 0.2, %v3116_v21  ;;  %vm3241_vm11 = vcmp.ge.f32.partialorder %v3237_v11, 0.0  ;;  %v3267_v30 = vld [vmem:[#allocation4 + $0x10] sm:$0xff] }
 0x37a   :  { %vm3118_vm12 = vcmp.ge.f32.partialorder %v3114_v20, 0.0  ;;  %v3122_v26 = vmul.f32 0.2, %v3114_v20  ;;  %v3245_v29 = vmul.f32 0.2, %v3237_v11  ;;  %vm3119_vm2 = vcmp.ge.f32.partialorder %v3115_v5, 0.0 }
 0x37b   :  { %v3256_v17 = vsel %vm3201_vm0, %v3254_v16, %v3255_v25  ;;  %vm3121_vm3 = vcmp.ge.f32.partialorder %v3117_v24, 0.0  ;;  %v3123_v31 = vmul.f32 0.2, %v3115_v5  ;;  %v3128_v32 = vsel %vm3120_vm13, %v3116_v21, %v3124_v27  ;;  %v3268_v35 = vld [vmem:[#allocation4 + $0x18] sm:$0xff]  ;;  %v3269_v54 = vld [vmem:[#allocation4 + $0x20] sm:$0xff]  ;;  %v3274_v59 = vld [vmem:[#allocation4 + $0x48] sm:$0xff] }
 0x37c   :  { %v3126_v28 = vsel %vm3118_vm12, %v3114_v20, %v3122_v26  ;;  %3262 = vst [vmem:[#allocation4 + $0x80] sm:$0x7f] %v3256_v17  ;;  %v3249_v34 = vsel %vm3241_vm11, %v3237_v11, %v3245_v29  ;;  %v3125_v36 = vmul.f32 0.2, %v3117_v24  ;;  %v3137_v38 = vrot.slane %v3128_v32, 5  ;;  %v3270_v43 = vld [vmem:[#allocation4 + $0x28] sm:$0xff] }
 0x37d   :  { %v3135_v33 = vrot.slane %v3126_v28, 5  ;;  %v3258_v56 = vrot.slane %v3249_v34, 4  ;;  %v3127_v37 = vsel %vm3119_vm2, %v3115_v5, %v3123_v31  ;;  %v5620_v40 = vpack.c.bf16 %v3268_v35, %v3266_v39  ;;  %v3273_v1 = vld [vmem:[#allocation4 + $0x40] sm:$0xff]  ;;  %v4936_v10 = vld [vmem:[%s5854_s4 + $0x108] sm:$0xff]   ;;  %v3279_v6 = vld [vmem:[#allocation4 + $0x70] sm:$0xff] }
 0x37e   :  { %v3129_v44 = vsel %vm3121_vm3, %v3117_v24, %v3125_v36  ;;  %v3136_v45 = vrot.slane %v3127_v37, 5  ;;  %v5626_v46 = vpack.c.bf16 %v3267_v30, %v3265_v41  ;;  %vm3149_vm10 = vcmask 782336   ;;  %v4937_v12 = vld [vmem:[%s5854_s4 + $0x110] sm:$0xff]   ;;  %v4938_v18 = vld [vmem:[%s5854_s4 + $0x118] sm:$0xff]   ;;  %v4939_v20 = vld [vmem:[%s5854_s4 + $0x120] sm:$0xff]  }
 0x37f   :  { %3145 = vst [vmem:[#allocation4 + $0x50] sm:$0xc0] %v3135_v33  ;;  %v3138_v47 = vsel %vm3134_vm5, %v3135_v33, %v3137_v38  ;;  %v3259_v48 = vsel %vm3201_vm0, %v3257_v23, %v3258_v56  ;;  %v3139_v49 = vrot.slane %v3129_v44, 5  ;;  %4391 = vmatprep.mubr.msk.bf16.mxu1 %vm62_vm1, %v5620_v40  ;;  %4438 = vmatprep.mubr.msk.bf16.mxu0 %vm62_vm1, %v5620_v40  ;;  %v4940_v11 = vld [vmem:[%s5854_s4 + $0x128] sm:$0xff]   ;;  %v4941_v22 = vld [vmem:[%s5854_s4 + $0x130] sm:$0xff]   ;;  %v4942_v23 = vld [vmem:[%s5854_s4 + $0x138] sm:$0xff]  }
 0x380   :  { %3148 = vst [vmem:[#allocation4 + $0x60] sm:$0x1f] %v3138_v47  ;;  %3264 = vst.msk [vmem:[#allocation4 + $0x88] sm:$0x7f] %vm3263_vm14, %v3259_v48  ;;  %3453 = vmatmul.mubr.bf16.vlgmr.msra.gmra.mrb[52].mxu1 %v5626_v46  ;;  %3638 = vmatmul.mubr.bf16.vlgmr.msra.gmra.mrb[56].mxu0 %v5626_v46  ;;  %v5638_v51 = vpack.c.bf16 %v3272_v50, %v3270_v43  ;;  %v5655_v58 = vpack.c.bf16 %v3271_v55, %v3269_v54  ;;  %v4943_v15 = vld [vmem:[%s5854_s4 + $0x140] sm:$0xff]   ;;  %v4944_v5 = vld [vmem:[%s5854_s4 + $0x148] sm:$0xff]  }
 0x381   :  { %3147 = vst.msk [vmem:[#allocation4 + $0x58] sm:$0xc0] %vm3146_vm4, %v3136_v45  ;;  %v3140_v52 = vsel %vm3134_vm5, %v3136_v45, %v3139_v49  ;;  %3791 = vmatpush1.bf16.msra.mxu0 %v4931_v42  ;;  %4525 = vmatpush1.bf16.msra.mxu1 %v4931_v42  ;;  %v5742_v31 = vld [vmem:[%s5858_s8] ss:$0 sm:$0xff]  ;;  %vm3946_vm0 = vcmask 221184   ;;  %vm4005_vm6 = vcmask 228359  }
 0x382   :  { %3150 = vst.msk [vmem:[#allocation4 + $0x68] sm:$0x1f] %vm3149_vm10, %v3140_v52  ;;  %4392 = vmatprep.mubr.msk.bf16.mxu1 %vm62_vm1, %v5638_v51  ;;  %4439 = vmatprep.mubr.msk.bf16.mxu0 %vm62_vm1, %v5638_v51  ;;  %vm3890_vm15 = vcmask 222208   ;;  %vm4007_vm5 = vcmask 226304   ;;  %vm3916_vm14 = vcmask 228353   ;;  %vm3944_vm4 = vcmask 228354  }
 0x383   :  { %3792 = vmatprep.subr.bf16.mxu0 %v5028_v0  ;;  %4512 = vmatprep.subr.bf16.mxu1 %v5028_v0  ;;  %v3281_v19 = vld [vmem:[#allocation4 + $0x80] sm:$0xff]  ;;  %vm4037_vm7 = vcmask 228357   ;;  %vm4039_vm12 = vcmask 224256   ;;  %vm4065_vm13 = vcmask 228358   ;;  %vm4067_vm11 = vcmask 225280  }
 0x384   :  { %v3291_v21 = vpack.c.bf16 %v3281_v19, %v3281_v19 }
 0x385   :  { %3793 = vmatpush1.bf16.msra.mxu0 %v4932_v53  ;;  %4526 = vmatpush1.bf16.msra.mxu1 %v4932_v53 }
 0x386   :  { %3794 = vmatprep.subr.bf16.mxu0 %v5028_v0  ;;  %4513 = vmatprep.subr.bf16.mxu1 %v5028_v0  ;;  %v3275_v63 = vld [vmem:[#allocation4 + $0x50] sm:$0xff] }
 0x387   :  { %v5671_v7 = vpack.c.bf16 %v3275_v63, %v3273_v1  ;;  %v3277_v3 = vld [vmem:[#allocation4 + $0x60] sm:$0xff]  ;;  %v3282_v13 = vld [vmem:[#allocation4 + $0x88] sm:$0xff] }
 0x388   :  { %v3276_v60 = vld [vmem:[#allocation4 + $0x58] sm:$0xff]  ;;  %3461 = vmatmul.mubr.bf16.gmra.mrb[56].mxu1 %v5655_v58  ;;  %3646 = vmatmul.mubr.bf16.gmra.mrb[60].mxu0 %v5655_v58  ;;  %v3289_v14 = vpack.c.bf16 %v3279_v6, %v3277_v3  ;;  %v3292_v16 = vpack.c.bf16 %v3282_v13, %v3282_v13 }
 0x389   :  { %v3288_v61 = vpack.c.bf16 %v3276_v60, %v3274_v59  ;;  %3795 = vmatpush1.bf16.msra.mxu0 %v4933_v57  ;;  %4527 = vmatpush1.bf16.msra.mxu1 %v4933_v57  ;;  %v3278_v4 = vld [vmem:[#allocation4 + $0x68] sm:$0xff] }
 0x38a   :  { %3796 = vmatprep.subr.bf16.mxu0 %v5028_v0  ;;  %4514 = vmatprep.subr.bf16.mxu1 %v5028_v0  ;;  %v5675_v9 = vpack.c.bf16 %v3280_v8, %v3278_v4 }
 0x38b   :  { %4393 = vmatprep.mubr.msk.bf16.mxu1 %vm62_vm1, %v3288_v61  ;;  %4440 = vmatprep.mubr.msk.bf16.mxu0 %vm62_vm1, %v3288_v61 }
 0x38d   :  { %3797 = vmatpush1.bf16.msra.mxu0 %v4934_v62  ;;  %4528 = vmatpush1.bf16.msra.mxu1 %v4934_v62 }
 0x38e   :  { %3798 = vmatprep.subr.bf16.mxu0 %v5028_v0  ;;  %4515 = vmatprep.subr.bf16.mxu1 %v5028_v0 }
 0x390   :  { %3469 = vmatmul.mubr.bf16.gmra.mrb[60].mxu1 %v5671_v7  ;;  %3654 = vmatmul.mubr.bf16.gmra.mrb[64].mxu0 %v5671_v7 }
 0x391   :  { %3799 = vmatpush1.bf16.msra.mxu0 %v4935_v2  ;;  %4529 = vmatpush1.bf16.msra.mxu1 %v4935_v2 }
 0x392   :  { %4394 = vmatprep.mubr.msk.bf16.mxu1 %vm62_vm1, %v5675_v9  ;;  %4441 = vmatprep.mubr.msk.bf16.mxu0 %vm62_vm1, %v5675_v9 }
 0x393   :  { %3800 = vmatprep.subr.bf16.mxu0 %v5028_v0  ;;  %4516 = vmatprep.subr.bf16.mxu1 %v5028_v0 }
 0x395   :  { %3801 = vmatpush1.bf16.msra.mxu0 %v4936_v10  ;;  %4530 = vmatpush1.bf16.msra.mxu1 %v4936_v10 }
 0x396   :  { %3802 = vmatprep.subr.bf16.mxu0 %v5028_v0  ;;  %4517 = vmatprep.subr.bf16.mxu1 %v5028_v0 }
 0x398   :  { %3477 = vmatmul.mubr.bf16.gmra.mrb[64].mxu1 %v3289_v14  ;;  %3662 = vmatmul.mubr.bf16.gmra.mrb[68].mxu0 %v3289_v14 }
 0x399   :  { %3803 = vmatpush1.bf16.msra.mxu0 %v4937_v12  ;;  %4531 = vmatpush1.bf16.msra.mxu1 %v4937_v12 }
 0x39a   :  { %4395 = vmatprep.mubr.msk.bf16.mxu1 %vm62_vm1, %v3292_v16  ;;  %4442 = vmatprep.mubr.msk.bf16.mxu0 %vm62_vm1, %v3292_v16 }
 0x39b   :  { %3804 = vmatprep.subr.bf16.mxu0 %v5028_v0  ;;  %4518 = vmatprep.subr.bf16.mxu1 %v5028_v0 }
 0x39d   :  { %3805 = vmatpush1.bf16.msra.mxu0 %v4938_v18  ;;  %4532 = vmatpush1.bf16.msra.mxu1 %v4938_v18 }
 0x39e   :  { %3806 = vmatprep.subr.bf16.mxu0 %v5028_v0  ;;  %4519 = vmatprep.subr.bf16.mxu1 %v5028_v0 }
 0x3a0   :  { %3485 = vmatmul.mubr.bf16.gmra.mrb[68].mxu1 %v3291_v21  ;;  %3670 = vmatmul.mubr.bf16.gmra.mrb[72].mxu0 %v3291_v21 }
 0x3a1   :  { %3807 = vmatpush1.bf16.msra.mxu0 %v4939_v20  ;;  %4533 = vmatpush1.bf16.msra.mxu1 %v4939_v20 }
 0x3a2   :  { %4485 = vmatprep.mubr.msk.bf16.mxu0 %vm62_vm1, %v5620_v40  ;;  %4487 = vmatprep.mubr.msk.bf16.mxu1 %vm62_vm1, %v3288_v61 }
 0x3a3   :  { %3808 = vmatprep.subr.bf16.mxu0 %v5028_v0  ;;  %4520 = vmatprep.subr.bf16.mxu1 %v5028_v0 }
 0x3a5   :  { %3809 = vmatpush1.bf16.msra.mxu0 %v4940_v11  ;;  %4534 = vmatpush1.bf16.msra.mxu1 %v4940_v11 }
 0x3a6   :  { %3810 = vmatprep.subr.bf16.mxu0 %v5028_v0  ;;  %4521 = vmatprep.subr.bf16.mxu1 %v5028_v0 }
 0x3a9   :  { %3811 = vmatpush1.bf16.msra.mxu0 %v4941_v22  ;;  %4535 = vmatpush1.bf16.msra.mxu1 %v4941_v22 }
 0x3aa   :  { %3812 = vmatprep.subr.bf16.mxu0 %v5028_v0  ;;  %4522 = vmatprep.subr.bf16.mxu1 %v5028_v0 }
 0x3ad   :  { %3813 = vmatpush1.bf16.msra.mxu0 %v4942_v23  ;;  %4536 = vmatpush1.bf16.msra.mxu1 %v4942_v23 }
 0x3ae   :  { %3814 = vmatprep.subr.bf16.mxu0 %v5028_v0  ;;  %4523 = vmatprep.subr.bf16.mxu1 %v5028_v0 }
 0x3b1   :  { %3815 = vmatpush1.bf16.msra.mxu0 %v4943_v15  ;;  %4537 = vmatpush1.bf16.msra.mxu1 %v4943_v15 }
 0x3b2   :  { %3816 = vmatprep.subr.bf16.mxu0 %v5028_v0  ;;  %4524 = vmatprep.subr.bf16.mxu1 %v5028_v0 }
 0x3b5   :  { %3817 = vmatpush1.bf16.msra.mxu0 %v4944_v5  ;;  %4538 = vmatpush1.bf16.msra.mxu1 %v4944_v5 }
 0x3b8   :  { %3823 = vmatmul.mubr.bf16.vlgmr.msra.gmra.mrb[76].mxu0 %v5626_v46  ;;  %3839 = vmatmul.mubr.bf16.vlgmr.msra.gmra.mrb[72].mxu1 %v5671_v7 }
 0x3b9   :  { %4486 = vmatprep.mubr.msk.bf16.mxu0 %vm62_vm1, %v5638_v51  ;;  %4488 = vmatprep.mubr.msk.bf16.mxu1 %vm62_vm1, %v5675_v9 }
 0x3c0   :  { %3831 = vmatmul.mubr.bf16.gmra.mrb[80].mxu0 %v5655_v58  ;;  %3847 = vmatmul.mubr.bf16.gmra.mrb[76].mxu1 %v3289_v14 }
 0x3c1   :  { %4489 = vmatprep.mubr.msk.bf16.mxu1 %vm62_vm1, %v3292_v16  ;;  %vm3878_vm1 = vcmask 1040384  }
 0x3c8   :  { %3855 = vmatmul.mubr.bf16.gmra.mrb[80].mxu1 %v3291_v21 }
 0x453   :  { %v3454_v24 = vpop.f32.mrb[52].mxu1  ;;  %v3639_v0 = vpop.f32.mrb[56].mxu0 }
 0x454   :  { %v3456_v25 = vpop.f32.mrb[53].mxu1  ;;  %v3641_v26 = vpop.f32.mrb[57].mxu0  ;;  %v3899_v35 = vadd.f32 %v5742_v31, %v3454_v24  ;;  %v3872_v38 = vrot.slane %v3639_v0, 6 }
 0x455   :  { %v3457_v27 = vpop.f32.mrb[54].mxu1  ;;  %v3642_v29 = vpop.f32.mrb[58].mxu0 }
 0x456   :  { %v3459_v17 = vpop.f32.mrb[55].mxu1  ;;  %v3644_v28 = vpop.f32.mrb[59].mxu0  ;;  %v3902_v33 = vrot.slane %v3642_v29, 1  ;;  %v3925_v46 = vadd.f32 %v5742_v31, %v3457_v27 }
 0x45b   :  { %v3462_v30 = vpop.f32.mrb[56].mxu1  ;;  %v3647_v32 = vpop.f32.mrb[60].mxu0 }
 0x45c   :  { %v3903_v34 = vrot.slane %v3647_v32, 1  ;;  %v3464_v36 = vpop.f32.mrb[57].mxu1  ;;  %v3649_v39 = vpop.f32.mrb[61].mxu0  ;;  %v3926_v40 = vadd.f32 %v5742_v31, %v3462_v30 }
 0x45d   :  { %v3465_v56 = vpop.f32.mrb[58].mxu1  ;;  %v3650_v37 = vpop.f32.mrb[62].mxu0 }
 0x45e   :  { %v3904_v41 = vsel %vm1776_vm8, %v3902_v33, %v3903_v34  ;;  %v3869_v42 = vadd.f32 %v5742_v31, %v3465_v56  ;;  %v3928_v43 = vrot.slane %v3650_v37, 1  ;;  %v3467_v44 = vpop.f32.mrb[59].mxu1  ;;  %v3652_v45 = vpop.f32.mrb[63].mxu0 }
 0x45f   :  { %v5749_v47 = vadd.f32 %v3904_v41, %v3899_v35 }
 0x460   :  { %v5751_v48 = vadd.f32 %v3872_v38, %v3869_v42  ;;  %v3929_v49 = vsel %vm1776_vm8, %v3903_v34, %v3928_v43  ;;  %v5754_v50 = vadd.f32 %v3928_v43, %v3926_v40 }
 0x461   :  { %v5756_v51 = vadd.f32 %v3929_v49, %v3925_v46 }
 0x463   :  { %v3470_v52 = vpop.f32.mrb[60].mxu1  ;;  %v3655_v53 = vpop.f32.mrb[64].mxu0 }
 0x464   :  { %v3870_v54 = vadd.f32 %v5742_v31, %v3470_v52  ;;  %v3958_v55 = vrot.slane %v3655_v53, 1  ;;  %v3472_v57 = vpop.f32.mrb[61].mxu1  ;;  %v3657_v58 = vpop.f32.mrb[65].mxu0  ;;  %v3986_v63 = vrot.slane %v3655_v53, 6 }
 0x465   :  { %v3473_v59 = vpop.f32.mrb[62].mxu1  ;;  %v3658_v60 = vpop.f32.mrb[66].mxu0 }
 0x466   :  { %v5759_v61 = vadd.f32 %v3872_v38, %v3870_v54  ;;  %v5761_v62 = vadd.f32 %v3958_v55, %v3869_v42  ;;  %v3987_v1 = vrot.slane %v3658_v60, 6  ;;  %v3475_v2 = vpop.f32.mrb[63].mxu1  ;;  %v3660_v4 = vpop.f32.mrb[67].mxu0  ;;  %v3959_v7 = vsel %vm1776_vm8, %v3928_v43, %v3958_v55 }
 0x467   :  { %v3962_v9 = vadd.f32 %v3959_v7, %v3926_v40  ;;  %v4017_v6 = vadd.f32 %v5742_v31, %v3473_v59  ;;  %v4019_v12 = vrot.slane %v3658_v60, 1 }
 0x468   :  { %v3988_v8 = vsel %vm1910_vm9, %v3986_v63, %v3987_v1  ;;  %vm3888_vm9 = vcmask 228355  }
 0x46b   :  { %v3478_v10 = vpop.f32.mrb[64].mxu1  ;;  %v3663_v3 = vpop.f32.mrb[68].mxu0 }
 0x46c   :  { %v4020_v13 = vrot.slane %v3663_v3, 1  ;;  %v3480_v14 = vpop.f32.mrb[65].mxu1  ;;  %v3665_v16 = vpop.f32.mrb[69].mxu0  ;;  %v4049_v18 = vadd.f32 %v5742_v31, %v3478_v10 }
 0x46d   :  { %v3481_v19 = vpop.f32.mrb[66].mxu1  ;;  %v3666_v20 = vpop.f32.mrb[70].mxu0 }
 0x46e   :  { %v4021_v21 = vsel %vm1776_vm8, %v4019_v12, %v4020_v13  ;;  %v4077_v11 = vadd.f32 %v5742_v31, %v3481_v19  ;;  %v4051_v22 = vrot.slane %v3666_v20, 1  ;;  %v3483_v23 = vpop.f32.mrb[67].mxu1  ;;  %v3668_v15 = vpop.f32.mrb[71].mxu0  ;;  %v5769_v5 = vadd.f32 %v4020_v13, %v4017_v6 }
 0x46f   :  { %v5771_v24 = vadd.f32 %v4021_v21, %v3870_v54 }
 0x470   :  { %v4052_v0 = vsel %vm1776_vm8, %v4020_v13, %v4051_v22  ;;  %v5774_v25 = vadd.f32 %v4051_v22, %v4049_v18  ;;  %v3991_v26 = vadd.f32 %v4077_v11, %v3986_v63  ;;  %vm3908_vm8 = vcmask 1045504  }
 0x471   :  { %v5776_v27 = vadd.f32 %v4052_v0, %v4017_v6 }
 0x473   :  { %v3486_v29 = vpop.f32.mrb[68].mxu1  ;;  %v3671_v17 = vpop.f32.mrb[72].mxu0 }
 0x474   :  { %v3984_v28 = vadd.f32 %v5742_v31, %v3486_v29  ;;  %v4079_v30 = vrot.slane %v3671_v17, 1  ;;  %v3488_v32 = vpop.f32.mrb[69].mxu1  ;;  %v3673_v33 = vpop.f32.mrb[73].mxu0 }
 0x475   :  { %v3489_v34 = vpop.f32.mrb[70].mxu1  ;;  %v3674_v36 = vpop.f32.mrb[74].mxu0 }
 0x476   :  { %v3992_v39 = vadd.f32 %v3988_v8, %v3984_v28  ;;  %v4081_v35 = vadd.f32 %v4079_v30, %v4049_v18  ;;  %v4082_v38 = vadd.f32 %v4079_v30, %v4077_v11  ;;  %v3490_v56 = vpop.f32.mrb[71].mxu1  ;;  %v3675_v37 = vpop.f32.mrb[75].mxu0 }
 0x48b   :  { %v3824_v40 = vpop.f32.mrb[76].mxu0  ;;  %v3840_v41 = vpop.f32.mrb[72].mxu1 }
 0x48c   :  { %v3965_v42 = vrot.slane %v3824_v40, 7  ;;  %v3935_v43 = vrot.slane %v3840_v41, 2  ;;  %v4083_v44 = vrot.slane %v3840_v41, 7  ;;  %v3826_v45 = vpop.f32.mrb[77].mxu0  ;;  %v3842_v46 = vpop.f32.mrb[73].mxu1 }
 0x48d   :  { %v3827_v49 = vpop.f32.mrb[78].mxu0  ;;  %v3843_v31 = vpop.f32.mrb[74].mxu1 }
 0x48e   :  { %v3969_v52 = vadd.f32 %v3965_v42, %v3962_v9  ;;  %v3940_v53 = vadd.f32 %v3935_v43, %v5754_v50  ;;  %v4087_v54 = vadd.f32 %v4083_v44, %v4081_v35  ;;  %v3879_v55 = vrot.slane %v3827_v49, 7  ;;  %v3829_v57 = vpop.f32.mrb[79].mxu0  ;;  %v3845_v58 = vpop.f32.mrb[75].mxu1 }
 0x48f   :  { %v3995_v59 = vrot.slane %v3843_v31, 7 }
 0x490   :  { %4945 = vtanh.f32 %v3969_v52  ;;  %v3884_v60 = vadd.f32 %v3879_v55, %v5751_v48  ;;  %v3966_v63 = vsel %vm3878_vm1, %v3965_v42, %v3879_v55 }
 0x491   :  { %4947 = vtanh.f32 %v3940_v53  ;;  %v3970_v1 = vadd.f32 %v3966_v63, %v5761_v62  ;;  %v4000_v2 = vadd.f32 %v3995_v59, %v3991_v26  ;;  %v4084_v4 = vsel %vm3878_vm1, %v4083_v44, %v3995_v59 }
 0x492   :  { %4949 = vtanh.f32 %v4087_v54  ;;  %v4088_v7 = vadd.f32 %v4084_v4, %v4082_v38 }
 0x493   :  { %4951 = vtanh.f32 %v3884_v60  ;;  %v3832_v50 = vpop.f32.mrb[80].mxu0  ;;  %v3848_v8 = vpop.f32.mrb[76].mxu1 }
 0x494   :  { %4953 = vtanh.f32 %v3970_v1  ;;  %v3880_v9 = vrot.slane %v3832_v50, 7  ;;  %v3996_v10 = vrot.slane %v3848_v8, 7  ;;  %v3834_v3 = vpop.f32.mrb[81].mxu0  ;;  %v3850_v6 = vpop.f32.mrb[77].mxu1  ;;  %v3909_v48 = vrot.slane %v3832_v50, 2 }
 0x495   :  { %4955 = vtanh.f32 %v4000_v2  ;;  %v3835_v12 = vpop.f32.mrb[82].mxu0  ;;  %v3851_v13 = vpop.f32.mrb[78].mxu1  ;;  %v4027_v11 = vrot.slane %v3848_v8, 2 }
 0x496   :  { %4957 = vtanh.f32 %v4088_v7  ;;  %v3881_v62 = vsel %vm3878_vm1, %v3879_v55, %v3880_v9  ;;  %v3997_v14 = vsel %vm3878_vm1, %v3995_v59, %v3996_v10  ;;  %v3910_v16 = vrot.slane %v3835_v12, 2  ;;  %v3837_v18 = vpop.f32.mrb[83].mxu0  ;;  %v3853_v19 = vpop.f32.mrb[79].mxu1 }
 0x497   :  { %v3885_v20 = vadd.f32 %v3881_v62, %v5759_v61  ;;  %v4001_v21 = vadd.f32 %v3997_v14, %v3992_v39  ;;  %v4028_v22 = vrot.slane %v3851_v13, 2 }
 0x498   :  { %v3911_v23 = vsel %vm3908_vm8, %v3909_v48, %v3910_v16  ;;  %v3936_v15 = vsel %vm3908_vm8, %v3910_v16, %v3935_v43 }
 0x499   :  { %4959 = vtanh.f32 %v3885_v20  ;;  %v3913_v0 = vadd.f32 %v3911_v23, %v5749_v47  ;;  %v3939_v26 = vadd.f32 %v3936_v15, %v5756_v51  ;;  %v4029_v29 = vsel %vm3908_vm8, %v4027_v11, %v4028_v22 }
 0x49a   :  { %v4946_v17 = vpop.eup %4945  ;;  %4961 = vtanh.f32 %v4001_v21  ;;  %v4032_v61 = vadd.f32 %v4029_v29, %v5771_v24  ;;  %v4033_v28 = vadd.f32 %v4028_v22, %v5769_v5 }
 0x49b   :  { %v4948_v30 = vpop.eup %4947  ;;  %4497 = vst.msk [vmem:[%s5859_s9 + $0x15] sm:$0xf8] %vm3888_vm9, %v4946_v17  ;;  %4963 = vtanh.f32 %v3913_v0  ;;  %v3856_v32 = vpop.f32.mrb[80].mxu1 }
 0x49c   :  { %v4950_v47 = vpop.eup %4949  ;;  %4495 = vst.msk [vmem:[%s5859_s9 + $0x16] sm:$0x1] %vm3946_vm0, %v4948_v30  ;;  %4965 = vtanh.f32 %v3939_v26  ;;  %v4058_v51 = vrot.slane %v3856_v32, 2  ;;  %v3858_v24 = vpop.f32.mrb[81].mxu1 }
 0x49d   :  { %v4952_v33 = vpop.eup %4951  ;;  %4509 = vst.msk [vmem:[%s5859_s9 + $0x31] sm:$0x80] %vm4005_vm6, %v4950_v47  ;;  %4967 = vtanh.f32 %v4032_v61  ;;  %v3859_v5 = vpop.f32.mrb[82].mxu1 }
 0x49e   :  { %v4954_v34 = vpop.eup %4953  ;;  %3889 = vst.msk [vmem:[%s5859_s9 - $0x3] sm:$0xf8] %vm3888_vm9, %v4952_v33  ;;  %4969 = vtanh.f32 %v4033_v28  ;;  %v4060_v36 = vadd.f32 %v4058_v51, %v5776_v27  ;;  %v4061_v39 = vadd.f32 %v4058_v51, %v5774_v25  ;;  %v3860_v35 = vpop.f32.mrb[83].mxu1 }
 0x49f   :  { %v4956_v38 = vpop.eup %4955  ;;  %4498 = vst.msk [vmem:[%s5859_s9 + $0x1d] sm:$0x3] %vm3890_vm15, %v4954_v34 }
 0x4a0   :  { %v4958_v56 = vpop.eup %4957  ;;  %4500 = vst.msk [vmem:[%s5859_s9 + $0x19] sm:$0x80] %vm4005_vm6, %v4956_v38  ;;  %4971 = vtanh.f32 %v4060_v36 }
 0x4a1   :  { %4510 = vst.msk [vmem:[%s5859_s9 + $0x39] sm:$0x3f] %vm4007_vm5, %v4958_v56  ;;  %4973 = vtanh.f32 %v4061_v39 }
 0x4a3   :  { %v4960_v25 = vpop.eup %4959 }
 0x4a4   :  { %v4962_v27 = vpop.eup %4961  ;;  %3891 = vst.msk [vmem:[%s5859_s9 + $0x5] sm:$0x3] %vm3890_vm15, %v4960_v25 }
 0x4a5   :  { %v4964_v37 = vpop.eup %4963  ;;  %4501 = vst.msk [vmem:[%s5859_s9 + $0x21] sm:$0x3f] %vm4007_vm5, %v4962_v27 }
 0x4a6   :  { %v4966_v40 = vpop.eup %4965  ;;  %4492 = vst.msk [vmem:[%s5859_s9 + $0x7] sm:$0xfe] %vm3916_vm14, %v4964_v37 }
 0x4a7   :  { %v4968_v41 = vpop.eup %4967  ;;  %4494 = vst.msk [vmem:[%s5859_s9 + $0xe] sm:$0xfc] %vm3944_vm4, %v4966_v40 }
 0x4a8   :  { %v4970_v42 = vpop.eup %4969  ;;  %4503 = vst.msk [vmem:[%s5859_s9 + $0x23] sm:$0xe0] %vm4037_vm7, %v4968_v41 }
 0x4a9   :  { %4504 = vst.msk [vmem:[%s5859_s9 + $0x2b] sm:$0xf] %vm4039_vm12, %v4970_v42 }
 0x4aa   :  { %v4972_v43 = vpop.eup %4971 }
 0x4ab   :  { %v4974_v44 = vpop.eup %4973  ;;  %4506 = vst.msk [vmem:[%s5859_s9 + $0x2a] sm:$0xc0] %vm4065_vm13, %v4972_v43 }
 0x4ac   :  { %4507 = vst.msk [vmem:[%s5859_s9 + $0x32] sm:$0x1f] %vm4067_vm11, %v4974_v44 }
 0x4ad   :  { %4098 = vsyncpa [#allocation6], 1 }
 0x4ae   :  { %4099 = vsyncpa [#allocation8], 1 }

</bundles_post_ra>
